<compile_context>
chip_gen: v6e
topology: v6e:2x2x1
jax: 0.10.0
libtpu: 0.0.40
codegen_flags: <defaults>
</compile_context>

<pallas_src>
import functools

import jax
import jax.numpy as jnp
from jax.experimental import pallas as pl
from jax.experimental.pallas import tpu as pltpu


def _round_up(n, m):
    return ((n + m - 1) // m) * m


def _device_config():
    """Per-generation tiling / dtype knobs (safe fallbacks if query fails)."""
    kind = ""
    try:
        kind = jax.devices()[0].device_kind.lower()
    except Exception:
        pass
    is_v7 = "v7" in kind
    # TensorCores per chip: v7x (and megacore v4/v5p) have 2, v5e/v6e have 1.
    n_tc = 2 if (is_v7 or "v4" in kind or "v5p" in kind) else 1
    return {
        "n_tc": n_tc,
        # v6e/v7x VPUs have bf16 VALUs -> bias/ReLU in bf16; v5e keeps f32.
        "elementwise_bf16": is_v7 or ("v6" in kind),
        # Cap per-step tile so VMEM fits v7x's 64 MiB (32 MiB scoped) budget.
        "tb_cap": 4096 if is_v7 else 8192,
    }


# ----------------------------------------------------------------------------
# Kernel
# ----------------------------------------------------------------------------
def _dense(h, w_ref, b_ref, *, relu, cdtype):
    """bf16 MXU matmul with f32 accumulation; bias/ReLU in `cdtype`."""
    y = jnp.dot(h.astype(jnp.bfloat16), w_ref[...],
                preferred_element_type=jnp.float32)
    y = y.astype(cdtype) + b_ref[...]
    if relu:
        y = jnp.maximum(y, 0.0)
    return y


def _mlp_kernel(x_ref,
                w0_ref, b0_ref,
                w1_ref, b1_ref,
                w2_ref, b2_ref,
                w3_ref, b3_ref,
                o_ref,
                *, use_fma, cdtype):
    x = x_ref[...].astype(jnp.float32)            # (TB, C)

    # ---- Layer 0 ----
    if use_fma:
        # C is tiny: a K=C matmul wastes almost the whole MXU contraction
        # depth, so do C VPU broadcast-FMAs instead (w0 kept f32).  w0 is
        # loaded once; rows are sliced from the loaded value so the compiler
        # sees a single (TB, d0) accumulator chain.
        w0 = w0_ref[...]                          # (C, d0) f32
        h = b0_ref[...] + x[:, 0:1] * w0[0:1, :]
        for k in range(1, x_ref.shape[1]):
            h = h + x[:, k:k + 1] * w0[k:k + 1, :]
    else:
        h = jnp.dot(x.astype(jnp.bfloat16), w0_ref[...],
                    preferred_element_type=jnp.float32) + b0_ref[...]
    h = jnp.maximum(h, 0.0)

    # ---- Layers 1..3: bf16 MXU matmuls, f32 accumulate.  Bias+ReLU run in
    # `cdtype` (bf16 on v6e/v7x with bf16 VPUs, f32 on v5e). ----
    h = _dense(h, w1_ref, b1_ref, relu=True, cdtype=cdtype)
    h = _dense(h, w2_ref, b2_ref, relu=True, cdtype=cdtype)

    # Dropout: identity in eval mode.
    # TODO(synk): training-mode Dropout (Bernoulli mask + 1/(1-p) scale via
    #             pltpu.prng_seed / pltpu.prng_random_bits) not implemented.
    h = _dense(h, w3_ref, b3_ref, relu=False, cdtype=jnp.float32)

    o_ref[...] = h.astype(o_ref.dtype)


# ----------------------------------------------------------------------------
# Wrapper
# ----------------------------------------------------------------------------
def obs_average_bran_net(x, prep, *, n_tc=1, tb_cap=8192,
                         out_dtype=jnp.float32):
    """x: [B, channel] f32.  prep: dict from prepare_params (kernel dtypes)."""
    B, C = x.shape
    d0 = prep["w0"].shape[1]
    d1 = prep["w1"].shape[1]
    d2 = prep["w3"].shape[1]

    # Dtypes in `prep` are the single source of truth for the compute path.
    use_fma = prep["w0"].dtype == jnp.float32
    cdtype = prep["b1"].dtype

    # ---- Batch tiling ----
    # As few grid steps as possible (each step is ~0.35us of pure overhead on
    # single-TC v5e/v6e); tile count is a multiple of n_tc so both v7x
    # TensorCores get equal tiles; TB capped so per-step VMEM stays small.
    n_tiles = n_tc * max(1, pl.cdiv(_round_up(B, 8), n_tc * tb_cap))
    TB = _round_up(pl.cdiv(B, n_tiles), 8)
    B_pad = TB * n_tiles
    if B_pad != B:
        # Extra HBM copy; avoided whenever 8*n_tc divides B (the common case).
        # NOTE: padded rows carry ReLU(bias) garbage; they are sliced off below.
        x = jnp.pad(x, ((0, B_pad - B), (0, 0)))

    w0, b0 = prep["w0"], prep["b0"]
    w1, b1 = prep["w1"], prep["b1"]
    w2, b2 = prep["w2"], prep["b2"]
    w3, b3 = prep["w3"], prep["b3"]
    operands = (x, w0, b0, w1, b1, w2, b2, w3, b3)

    # x / out tiled along the batch; weights & biases use constant index_maps
    # (block index never changes -> they stay VMEM-resident, no re-DMA).
    in_specs = [
        pl.BlockSpec((TB, C), lambda i: (i, 0)),
        pl.BlockSpec(w0.shape, lambda i: (0, 0)),
        pl.BlockSpec(b0.shape, lambda i: (0, 0)),
        pl.BlockSpec(w1.shape, lambda i: (0, 0)),
        pl.BlockSpec(b1.shape, lambda i: (0, 0)),
        pl.BlockSpec(w2.shape, lambda i: (0, 0)),
        pl.BlockSpec(b2.shape, lambda i: (0, 0)),
        pl.BlockSpec(w3.shape, lambda i: (0, 0)),
        pl.BlockSpec(b3.shape, lambda i: (0, 0)),
    ]
    out_spec = pl.BlockSpec((TB, d2), lambda i: (i, 0))

    # Right-sized VMEM budget: resident params + double-buffered I/O tiles +
    # f32 intermediate headroom (leaves scoped-VMEM room for surrounding
    # fusions, important on v7x's 64 MiB physical / 32 MiB scoped VMEM).
    out_itemsize = jnp.dtype(out_dtype).itemsize
    param_bytes = sum(int(a.size) * a.dtype.itemsize for a in operands[1:])
    io_bytes = 2 * TB * (C * x.dtype.itemsize + d2 * out_itemsize)
    interm_bytes = 6 * TB * max(d0, d1, d2) * 4
    vmem_limit = int(min(max(1.25 * (param_bytes + io_bytes + interm_bytes),
                             4 << 20), 32 << 20))

    flops = 2 * B_pad * (C * d0 + d0 * d1 + d1 * d2 + d2 * d2)
    bytes_accessed = (int(x.size) * x.dtype.itemsize + param_bytes
                      + B_pad * d2 * out_itemsize)

    out = pl.pallas_call(
        functools.partial(_mlp_kernel, use_fma=use_fma, cdtype=cdtype),
        out_shape=jax.ShapeDtypeStruct((B_pad, d2), out_dtype),
        grid=(n_tiles,),
        in_specs=in_specs,
        out_specs=out_spec,
        compiler_params=pltpu.CompilerParams(
            dimension_semantics=("parallel",),     # 2x on v7x's two TCs
            vmem_limit_bytes=vmem_limit,
        ),
        cost_estimate=pl.CostEstimate(
            flops=flops, transcendentals=0, bytes_accessed=bytes_accessed),
    )(*operands)

    return out[:B] if B_pad != B else out


# ----------------------------------------------------------------------------
# Params
# ----------------------------------------------------------------------------
def init_params(key, channel, dims):
    """Deterministic init matching nn.Linear shapes (stored pre-transposed as (in, out))."""
    sizes = [(channel, dims[0]), (dims[0], dims[1]),
             (dims[1], dims[2]), (dims[2], dims[2])]
    params = {}
    for i, (fan_in, fan_out) in enumerate(sizes):
        key, kw, kb = jax.random.split(key, 3)
        bound = 1.0 / jnp.sqrt(jnp.float32(fan_in))
        # PyTorch Linear weight is (out, in); we keep the transposed (in, out) layout.
        params[f"w{i}"] = jax.random.uniform(kw, (fan_in, fan_out), jnp.float32,
                                             minval=-bound, maxval=bound)
        params[f"b{i}"] = jax.random.uniform(kb, (1, fan_out), jnp.float32,
                                             minval=-bound, maxval=bound)
    return params


def prepare_params(raw, *, use_fma, elementwise_bf16):
    """One-time dtype conversion (outside the per-call path, per perf review)."""
    cdtype = jnp.bfloat16 if elementwise_bf16 else jnp.float32
    prep = {
        "w0": raw["w0"].astype(jnp.float32 if use_fma else jnp.bfloat16),
        "b0": raw["b0"].astype(jnp.float32),
        "w1": raw["w1"].astype(jnp.bfloat16),
        "b1": raw["b1"].astype(cdtype),
        "w2": raw["w2"].astype(jnp.bfloat16),
        "b2": raw["b2"].astype(cdtype),
        "w3": raw["w3"].astype(jnp.bfloat16),
        "b3": raw["b3"].astype(jnp.float32),
    }
    return jax.block_until_ready(prep)


def reference_forward(x, prep):
    """Precision-matched pure-JAX reference mirroring the kernel compute graph."""
    use_fma = prep["w0"].dtype == jnp.float32
    cdtype = prep["b1"].dtype
    if use_fma:
        h = x.astype(jnp.float32) @ prep["w0"] + prep["b0"]
    else:
        h = jnp.dot(x.astype(jnp.bfloat16), prep["w0"],
                    preferred_element_type=jnp.float32) + prep["b0"]
    h = jnp.maximum(h, 0.0)
    for i, relu, cd in ((1, True, cdtype), (2, True, cdtype),
                        (3, False, jnp.float32)):
        y = jnp.dot(h.astype(jnp.bfloat16), prep[f"w{i}"],
                    preferred_element_type=jnp.float32)
        y = y.astype(cd) + prep[f"b{i}"]
        h = jnp.maximum(y, 0.0) if relu else y
    return h.astype(jnp.float32)


if __name__ == "__main__":
    key = jax.random.PRNGKey(0)

    # Small, shape-consistent configuration: x is [batch, channel].
    batch, channel = 512, 4
    dims = [128, 256, 256]

    key, kx = jax.random.split(key)
    x = jax.random.normal(kx, (batch, channel), jnp.float32)
    raw_params = init_params(key, channel, dims)

    cfg = _device_config()
    use_fma = channel <= 8
    params = prepare_params(raw_params, use_fma=use_fma,
                            elementwise_bf16=cfg["elementwise_bf16"])

    out = obs_average_bran_net(x, params,
                               n_tc=cfg["n_tc"], tb_cap=cfg["tb_cap"])
    out = jax.block_until_ready(out)

    ref = reference_forward(x, params)
    assert out.shape == (batch, dims[2])
    max_err = float(jnp.max(jnp.abs(out - ref)))
    assert jnp.allclose(out, ref, atol=2e-2, rtol=2e-2), \
        f"mismatch vs JAX reference (max abs err {max_err})"

    print("KERNEL_OK")
</pallas_src>

<mosaic_0001>
module attributes {stable_mosaic.version = 11 : i64} {
  func.func @_mlp_kernel(%arg0: i32, %arg1: memref<512x4xf32, #tpu.memory_space<vmem>>, %arg2: memref<4x128xf32, #tpu.memory_space<vmem>>, %arg3: memref<1x128xf32, #tpu.memory_space<vmem>>, %arg4: memref<128x256xbf16, #tpu.memory_space<vmem>>, %arg5: memref<1x256xf32, #tpu.memory_space<vmem>>, %arg6: memref<256x256xbf16, #tpu.memory_space<vmem>>, %arg7: memref<1x256xf32, #tpu.memory_space<vmem>>, %arg8: memref<256x256xbf16, #tpu.memory_space<vmem>>, %arg9: memref<1x256xf32, #tpu.memory_space<vmem>>, %arg10: memref<512x256xf32, #tpu.memory_space<vmem>>) attributes {dimension_semantics = [#tpu.dimension_semantics<parallel>], iteration_bounds = array<i64: 1>, scalar_prefetch = 0 : i64, scratch_operands = 0 : i64, tpu.core_type = #tpu.core_type<tc>, window_params = [{transform_indices = @transform_0, window_bounds = array<i64: 512, 4>}, {pipeline_mode = #tpu.pipeline_mode<synchronous>, transform_indices = @transform_1, window_bounds = array<i64: 4, 128>}, {pipeline_mode = #tpu.pipeline_mode<synchronous>, transform_indices = @transform_2, window_bounds = array<i64: 1, 128>}, {pipeline_mode = #tpu.pipeline_mode<synchronous>, transform_indices = @transform_3, window_bounds = array<i64: 128, 256>}, {pipeline_mode = #tpu.pipeline_mode<synchronous>, transform_indices = @transform_4, window_bounds = array<i64: 1, 256>}, {pipeline_mode = #tpu.pipeline_mode<synchronous>, transform_indices = @transform_5, window_bounds = array<i64: 256, 256>}, {pipeline_mode = #tpu.pipeline_mode<synchronous>, transform_indices = @transform_6, window_bounds = array<i64: 1, 256>}, {pipeline_mode = #tpu.pipeline_mode<synchronous>, transform_indices = @transform_7, window_bounds = array<i64: 256, 256>}, {pipeline_mode = #tpu.pipeline_mode<synchronous>, transform_indices = @transform_8, window_bounds = array<i64: 1, 256>}, {transform_indices = @transform_9, window_bounds = array<i64: 512, 256>}]} {
    %c0 = arith.constant 0 : index
    %c0_0 = arith.constant 0 : index
    %0 = vector.load %arg1[%c0, %c0_0] : memref<512x4xf32, #tpu.memory_space<vmem>>, vector<512x4xf32>
    %c0_1 = arith.constant 0 : index
    %c0_2 = arith.constant 0 : index
    %1 = vector.load %arg2[%c0_1, %c0_2] : memref<4x128xf32, #tpu.memory_space<vmem>>, vector<4x128xf32>
    %c0_3 = arith.constant 0 : index
    %c0_4 = arith.constant 0 : index
    %2 = vector.load %arg3[%c0_3, %c0_4] : memref<1x128xf32, #tpu.memory_space<vmem>>, vector<1x128xf32>
    %3 = vector.extract_strided_slice %0 {offsets = [0, 0], sizes = [512, 1], strides = [1, 1]} : vector<512x4xf32> to vector<512x1xf32>
    %4 = vector.extract_strided_slice %1 {offsets = [0, 0], sizes = [1, 128], strides = [1, 1]} : vector<4x128xf32> to vector<1x128xf32>
    %5 = vector.broadcast %3 : vector<512x1xf32> to vector<512x128xf32>
    %6 = vector.broadcast %4 : vector<1x128xf32> to vector<512x128xf32>
    %7 = arith.mulf %5, %6 : vector<512x128xf32>
    %8 = vector.broadcast %2 : vector<1x128xf32> to vector<512x128xf32>
    %9 = arith.addf %8, %7 : vector<512x128xf32>
    %10 = vector.extract_strided_slice %0 {offsets = [0, 1], sizes = [512, 1], strides = [1, 1]} : vector<512x4xf32> to vector<512x1xf32>
    %11 = vector.extract_strided_slice %1 {offsets = [1, 0], sizes = [1, 128], strides = [1, 1]} : vector<4x128xf32> to vector<1x128xf32>
    %12 = vector.broadcast %10 : vector<512x1xf32> to vector<512x128xf32>
    %13 = vector.broadcast %11 : vector<1x128xf32> to vector<512x128xf32>
    %14 = arith.mulf %12, %13 : vector<512x128xf32>
    %15 = arith.addf %9, %14 : vector<512x128xf32>
    %16 = vector.extract_strided_slice %0 {offsets = [0, 2], sizes = [512, 1], strides = [1, 1]} : vector<512x4xf32> to vector<512x1xf32>
    %17 = vector.extract_strided_slice %1 {offsets = [2, 0], sizes = [1, 128], strides = [1, 1]} : vector<4x128xf32> to vector<1x128xf32>
    %18 = vector.broadcast %16 : vector<512x1xf32> to vector<512x128xf32>
    %19 = vector.broadcast %17 : vector<1x128xf32> to vector<512x128xf32>
    %20 = arith.mulf %18, %19 : vector<512x128xf32>
    %21 = arith.addf %15, %20 : vector<512x128xf32>
    %22 = vector.extract_strided_slice %0 {offsets = [0, 3], sizes = [512, 1], strides = [1, 1]} : vector<512x4xf32> to vector<512x1xf32>
    %23 = vector.extract_strided_slice %1 {offsets = [3, 0], sizes = [1, 128], strides = [1, 1]} : vector<4x128xf32> to vector<1x128xf32>
    %24 = vector.broadcast %22 : vector<512x1xf32> to vector<512x128xf32>
    %25 = vector.broadcast %23 : vector<1x128xf32> to vector<512x128xf32>
    %26 = arith.mulf %24, %25 : vector<512x128xf32>
    %27 = arith.addf %21, %26 : vector<512x128xf32>
    %cst = arith.constant 0.000000e+00 : f32
    %28 = vector.broadcast %cst : f32 to vector<512x128xf32>
    %29 = arith.maximumf %27, %28 : vector<512x128xf32>
    %30 = arith.truncf %29 : vector<512x128xf32> to vector<512x128xbf16>
    %c0_5 = arith.constant 0 : index
    %c0_6 = arith.constant 0 : index
    %31 = vector.load %arg4[%c0_5, %c0_6] : memref<128x256xbf16, #tpu.memory_space<vmem>>, vector<128x256xbf16>
    %cst_7 = arith.constant dense<0.000000e+00> : vector<512x256xf32>
    %32 = tpu.matmul %30, %31, %cst_7 {dimension_numbers = #tpu.dot_dimension_numbers<[1], [0], [0], [1], [0, 0, 1, 1], [], []>} : vector<512x128xbf16>, vector<128x256xbf16>, vector<512x256xf32> -> vector<512x256xf32>
    %c0_8 = arith.constant 0 : index
    %c0_9 = arith.constant 0 : index
    %33 = vector.load %arg5[%c0_8, %c0_9] : memref<1x256xf32, #tpu.memory_space<vmem>>, vector<1x256xf32>
    %34 = vector.broadcast %33 : vector<1x256xf32> to vector<512x256xf32>
    %35 = arith.addf %32, %34 : vector<512x256xf32>
    %cst_10 = arith.constant 0.000000e+00 : f32
    %36 = vector.broadcast %cst_10 : f32 to vector<512x256xf32>
    %37 = arith.maximumf %35, %36 : vector<512x256xf32>
    %38 = arith.truncf %37 : vector<512x256xf32> to vector<512x256xbf16>
    %c0_11 = arith.constant 0 : index
    %c0_12 = arith.constant 0 : index
    %39 = vector.load %arg6[%c0_11, %c0_12] : memref<256x256xbf16, #tpu.memory_space<vmem>>, vector<256x256xbf16>
    %cst_13 = arith.constant dense<0.000000e+00> : vector<512x256xf32>
    %40 = tpu.matmul %38, %39, %cst_13 {dimension_numbers = #tpu.dot_dimension_numbers<[1], [0], [0], [1], [0, 0, 1, 1], [], []>} : vector<512x256xbf16>, vector<256x256xbf16>, vector<512x256xf32> -> vector<512x256xf32>
    %c0_14 = arith.constant 0 : index
    %c0_15 = arith.constant 0 : index
    %41 = vector.load %arg7[%c0_14, %c0_15] : memref<1x256xf32, #tpu.memory_space<vmem>>, vector<1x256xf32>
    %42 = vector.broadcast %41 : vector<1x256xf32> to vector<512x256xf32>
    %43 = arith.addf %40, %42 : vector<512x256xf32>
    %cst_16 = arith.constant 0.000000e+00 : f32
    %44 = vector.broadcast %cst_16 : f32 to vector<512x256xf32>
    %45 = arith.maximumf %43, %44 : vector<512x256xf32>
    %46 = arith.truncf %45 : vector<512x256xf32> to vector<512x256xbf16>
    %c0_17 = arith.constant 0 : index
    %c0_18 = arith.constant 0 : index
    %47 = vector.load %arg8[%c0_17, %c0_18] : memref<256x256xbf16, #tpu.memory_space<vmem>>, vector<256x256xbf16>
    %cst_19 = arith.constant dense<0.000000e+00> : vector<512x256xf32>
    %48 = tpu.matmul %46, %47, %cst_19 {dimension_numbers = #tpu.dot_dimension_numbers<[1], [0], [0], [1], [0, 0, 1, 1], [], []>} : vector<512x256xbf16>, vector<256x256xbf16>, vector<512x256xf32> -> vector<512x256xf32>
    %c0_20 = arith.constant 0 : index
    %c0_21 = arith.constant 0 : index
    %49 = vector.load %arg9[%c0_20, %c0_21] : memref<1x256xf32, #tpu.memory_space<vmem>>, vector<1x256xf32>
    %50 = vector.broadcast %49 : vector<1x256xf32> to vector<512x256xf32>
    %51 = arith.addf %48, %50 : vector<512x256xf32>
    %c0_22 = arith.constant 0 : index
    %c0_23 = arith.constant 0 : index
    %52 = vector.load %arg10[%c0_22, %c0_23] : memref<512x256xf32, #tpu.memory_space<vmem>>, vector<512x256xf32>
    tpu.vector_store %arg10[%c0_22, %c0_23], %51 {strides = array<i32>} : memref<512x256xf32, #tpu.memory_space<vmem>>, vector<512x256xf32>,
    return
  }
  func.func @transform_0(%arg0: i32) -> (i32, i32) {
    %c0_i32 = arith.constant 0 : i32
    %c0_i32_0 = arith.constant 0 : i32
    return %arg0, %c0_i32 : i32, i32
  }
  func.func @transform_1(%arg0: i32) -> (i32, i32) {
    %c0_i32 = arith.constant 0 : i32
    %c0_i32_0 = arith.constant 0 : i32
    %c0_i32_1 = arith.constant 0 : i32
    return %c0_i32, %c0_i32_0 : i32, i32
  }
  func.func @transform_2(%arg0: i32) -> (i32, i32) {
    %c0_i32 = arith.constant 0 : i32
    %c0_i32_0 = arith.constant 0 : i32
    %c0_i32_1 = arith.constant 0 : i32
    return %c0_i32, %c0_i32_0 : i32, i32
  }
  func.func @transform_3(%arg0: i32) -> (i32, i32) {
    %c0_i32 = arith.constant 0 : i32
    %c0_i32_0 = arith.constant 0 : i32
    %c0_i32_1 = arith.constant 0 : i32
    return %c0_i32, %c0_i32_0 : i32, i32
  }
  func.func @transform_4(%arg0: i32) -> (i32, i32) {
    %c0_i32 = arith.constant 0 : i32
    %c0_i32_0 = arith.constant 0 : i32
    %c0_i32_1 = arith.constant 0 : i32
    return %c0_i32, %c0_i32_0 : i32, i32
  }
  func.func @transform_5(%arg0: i32) -> (i32, i32) {
    %c0_i32 = arith.constant 0 : i32
    %c0_i32_0 = arith.constant 0 : i32
    %c0_i32_1 = arith.constant 0 : i32
    return %c0_i32, %c0_i32_0 : i32, i32
  }
  func.func @transform_6(%arg0: i32) -> (i32, i32) {
    %c0_i32 = arith.constant 0 : i32
    %c0_i32_0 = arith.constant 0 : i32
    %c0_i32_1 = arith.constant 0 : i32
    return %c0_i32, %c0_i32_0 : i32, i32
  }
  func.func @transform_7(%arg0: i32) -> (i32, i32) {
    %c0_i32 = arith.constant 0 : i32
    %c0_i32_0 = arith.constant 0 : i32
    %c0_i32_1 = arith.constant 0 : i32
    return %c0_i32, %c0_i32_0 : i32, i32
  }
  func.func @transform_8(%arg0: i32) -> (i32, i32) {
    %c0_i32 = arith.constant 0 : i32
    %c0_i32_0 = arith.constant 0 : i32
    %c0_i32_1 = arith.constant 0 : i32
    return %c0_i32, %c0_i32_0 : i32, i32
  }
  func.func @transform_9(%arg0: i32) -> (i32, i32) {
    %c0_i32 = arith.constant 0 : i32
    %c0_i32_0 = arith.constant 0 : i32
    return %arg0, %c0_i32 : i32, i32
  }
}

</mosaic_0001>

<bundles_post_ra>
// kernel: tpu_custom_call.1
= control target key start
LH: loop header
LB: loop body
LE: loop exit
PB: predicated region body
PF: predicated region fallthrough
CT: control target
= control target key end

     0   :  { %14 = vsyncpa [#allocation3], 0  ;;  %s6731_s0 = inlined_call_operand.vmem [shape: f32[512,4], index: 0, kind: input, shape index: {}]   ;;  %s6732_s1 = inlined_call_operand.vmem [shape: f32[4,128], index: 1, kind: input, shape index: {}]   ;;  %s6733_s2 = inlined_call_operand.vmem [shape: f32[1,128], index: 2, kind: input, shape index: {}]   ;;  %s6734_s3 = inlined_call_operand.hbm [shape: bf16[128,256], index: 3, kind: input, shape index: {}]   ;;  %s6735_s4 = inlined_call_operand.vmem [shape: f32[1,256], index: 4, kind: input, shape index: {}]   ;;  %s6736_s5 = inlined_call_operand.vmem [shape: bf16[256,256], index: 5, kind: input, shape index: {}]   ;;  %s6737_s6 = inlined_call_operand.vmem [shape: f32[1,256], index: 6, kind: input, shape index: {}]   ;;  %s6738_s7 = inlined_call_operand.vmem [shape: bf16[256,256], index: 7, kind: input, shape index: {}]   ;;  %s6739_s8 = inlined_call_operand.vmem [shape: f32[1,256], index: 8, kind: input, shape index: {}]   ;;  %s6740_s9 = inlined_call_operand.hbm [shape: f32[512,256], index: 9, kind: output, shape index: {}]  }
   0x1   :  { %15 = vsyncpa [#allocation4], 0  ;;  %s4342_s30 = smov [#allocation2]  }
   0x2   :  { %s27_s10 = sshll.u32 %s4342_s30, 4  ;;  %s28_s10 = int_to_ptr.vmem [resolvable:$true] %s27_s10 }
   0x3   :  { %s4306_s11 = scalar_lea.vmem %s28_s10, 2048  ;;  %p4311_p1 = scmp.lt.s32.totalorder %s28_s10, %s28_s10 }
   0x4   :  { %p4307_p0 = scmp.ne.s32.totalorder %s28_s10, %s4306_s11  ;;  %p4312_p2 = scmp.lt.s32.totalorder %s4306_s11, %s4306_s11 }
   0x6   :  { %p4313_p3 = por %p4312_p2, %p4311_p1 }
   0x8   :  { %p4314_p4 = pnand %p4313_p3, %p4307_p0 }
   0xa   :  { %4317 = shalt.err (!%p4314_p4)
}
   0xb   :  { %s4343_s12 = smov 128   ;;  %s4344_s13 = smov 8  }
   0xc   :  { %33 = dma.hbm_to_vmem [thread:$0]  %s6734_s3, 2048, %s28_s10, [#allocation3], %s4343_s12, %s4343_s12, %s4344_s13  }
   0xd   :  { %4338 = dma.done.wait [#allocation3], 2048  }
   0xe   :  { %4339 = vsyncadd [#allocation3], 4294965248  ;;  %v6747_v0 = vmov 1   ;;  %v6741_v1 = vmov 0   ;;  %v4412_v2 = vld [vmem:[%s6731_s0 + $0x10] sm:$0xff]  ;;  %v48_v3 = vld [vmem:[%s6731_s0] sm:$0xff] }
   0xf   :  { %4044 = vset.pattern.permute.xlu0 %v6747_v0  ;;  %4043 = vset.pattern.permute.xlu1 %v6741_v1  ;;  %v4421_v4 = vld [vmem:[%s6731_s0 + $0x18] sm:$0xff]  ;;  %v4428_v5 = vld [vmem:[%s6731_s0 + $0x28] sm:$0xff]  ;;  %v4433_v6 = vld [vmem:[%s6731_s0 + $0x20] sm:$0xff]  ;;  %v6745_v26 = vmov 2   ;;  %v6743_v27 = vmov 3  }
  0x10   :  { %1972 = vmatprep.mubr.bf16.mxu0 %v6741_v1  ;;  %2132 = vmatprep.mubr.bf16.mxu1 %v6741_v1  ;;  %v4440_v7 = vld [vmem:[%s6731_s0 + $0x38] sm:$0xff]  ;;  %v4445_v8 = vld [vmem:[%s6731_s0 + $0x30] sm:$0xff]  ;;  %v4450_v9 = vld [vmem:[%s6731_s0 + $0x48] sm:$0xff] }
  0x11   :  { %126 = vperm.xlu1 %4043, %v4412_v2   ;;  %573 = vperm.xlu0 %4044, %v48_v3   ;;  %v4455_v10 = vld [vmem:[%s6731_s0 + $0x40] sm:$0xff]  ;;  %v4462_v11 = vld [vmem:[%s6731_s0 + $0x58] sm:$0xff]  ;;  %v4467_v12 = vld [vmem:[%s6731_s0 + $0x50] sm:$0xff] }
  0x12   :  { %v4474_v13 = vld [vmem:[%s6731_s0 + $0x68] sm:$0xff]  ;;  %v4479_v14 = vld [vmem:[%s6731_s0 + $0x60] sm:$0xff]  ;;  %v4486_v15 = vld [vmem:[%s6731_s0 + $0x78] sm:$0xff] }
  0x13   :  { %v4491_v16 = vld [vmem:[%s6731_s0 + $0x70] sm:$0xff]  ;;  %v4498_v17 = vld [vmem:[%s6731_s0 + $0x88] sm:$0xff]  ;;  %v4503_v18 = vld [vmem:[%s6731_s0 + $0x80] sm:$0xff] }
  0x14   :  { %v4510_v19 = vld [vmem:[%s6731_s0 + $0x98] sm:$0xff]  ;;  %v4517_v20 = vld [vmem:[%s6731_s0 + $0x90] sm:$0xff]  ;;  %v4524_v21 = vld [vmem:[%s6731_s0 + $0xa8] sm:$0xff] }
  0x15   :  { %131 = vperm.xlu1 %4043, %v4421_v4   ;;  %581 = vperm.xlu0 %4044, %v4412_v2   ;;  %v4529_v22 = vld [vmem:[%s6731_s0 + $0x108] sm:$0xff]  ;;  %v4536_v23 = vld [vmem:[%s6731_s0 + $0x118] sm:$0xff]  ;;  %v4579_v28 = vld [vmem:[%s6731_s0 + $0xa0] sm:$0xff] }
  0x16   :  { %v4541_v24 = vld [vmem:[%s6731_s0 + $0x8] sm:$0xff]  ;;  %v4587_v29 = vld [vmem:[%s6731_s0 + $0xb0] sm:$0xff]  ;;  %v4594_v32 = vld [vmem:[%s6731_s0 + $0xc0] sm:$0xff] }
  0x17   :  { %v4549_v25 = vld [vmem:[%s6731_s0 + $0x128] sm:$0xff]  ;;  %v4160_v30 = vld [vmem:[#allocation2 + $0x74] ss:$8 sps:$4 sm:$0xff]   ;;  %v4162_v31 = vld [vmem:[#allocation2 + $0x70] ss:$8 sps:$4 sm:$0xff]  }
  0x18   :  { %6768 = vst [vmem:[#allocation8_spill] sm:$0xff] %v4549_v25  ;;  %1940 = vmatprep.subr.bf16.mxu0 %v4160_v30  ;;  %4017 = vmatprep.subr.bf16.mxu1 %v4160_v30  ;;  %v4163_v33 = vld [vmem:[#allocation2 + $0x64] ss:$8 sps:$4 sm:$0xff]   ;;  %v4165_v34 = vld [vmem:[#allocation2 + $0x60] ss:$8 sps:$4 sm:$0xff]   ;;  %v4602_v35 = vld [vmem:[%s6731_s0 + $0xd0] sm:$0xff] }
  0x19   :  { %141 = vperm.xlu1 %4043, %v4428_v5   ;;  %589 = vperm.xlu0 %4044, %v4433_v6   ;;  %v4166_v36 = vld [vmem:[#allocation2 + $0x54] ss:$8 sps:$4 sm:$0xff]   ;;  %v4168_v37 = vld [vmem:[#allocation2 + $0x50] ss:$8 sps:$4 sm:$0xff]   ;;  %v4609_v38 = vld [vmem:[%s6731_s0 + $0xe0] sm:$0xff] }
  0x1a   :  { %1941 = vmatpush1.bf16.msra.mxu0 %v4162_v31  ;;  %4025 = vmatpush1.bf16.msra.mxu1 %v4162_v31  ;;  %v4169_v39 = vld [vmem:[#allocation2 + $0x44] ss:$8 sps:$4 sm:$0xff]   ;;  %v4171_v40 = vld [vmem:[#allocation2 + $0x40] ss:$8 sps:$4 sm:$0xff]   ;;  %v4616_v41 = vld [vmem:[%s6731_s0 + $0xf0] sm:$0xff] }
  0x1b   :  { %1942 = vmatprep.subr.bf16.mxu0 %v4163_v33  ;;  %4018 = vmatprep.subr.bf16.mxu1 %v4163_v33  ;;  %v4172_v42 = vld [vmem:[#allocation2 + $0x34] ss:$8 sps:$4 sm:$0xff]   ;;  %v4174_v43 = vld [vmem:[#allocation2 + $0x30] ss:$8 sps:$4 sm:$0xff]   ;;  %v4175_v45 = vld [vmem:[#allocation2 + $0x24] ss:$8 sps:$4 sm:$0xff]  }
  0x1c   :  { %v4624_v44 = vld [vmem:[%s6731_s0 + $0x170] sm:$0xff]  ;;  %v4177_v46 = vld [vmem:[#allocation2 + $0x20] ss:$8 sps:$4 sm:$0xff]   ;;  %v4181_v49 = vld [vmem:[#allocation2 + $0x4] ss:$8 sps:$4 sm:$0xff]  }
  0x1d   :  { %151 = vperm.xlu1 %4043, %v4440_v7   ;;  %597 = vperm.xlu0 %4044, %v4445_v8   ;;  %v4178_v47 = vld [vmem:[#allocation2 + $0x14] ss:$8 sps:$4 sm:$0xff]   ;;  %v4180_v48 = vld [vmem:[#allocation2 + $0x10] ss:$8 sps:$4 sm:$0xff]   ;;  %v4183_v52 = vld [vmem:[#allocation2] ss:$8 sps:$4 sm:$0xff]  }
  0x1e   :  { %1943 = vmatpush1.bf16.msra.mxu0 %v4165_v34  ;;  %4026 = vmatpush1.bf16.msra.mxu1 %v4165_v34  ;;  %v4725_v33 = vld [vmem:[%s6731_s0 + $0xb8] sm:$0xff] }
  0x1f   :  { %1944 = vmatprep.subr.bf16.mxu0 %v4166_v36  ;;  %4019 = vmatprep.subr.bf16.mxu1 %v4166_v36  ;;  %6781 = vst [vmem:[#allocation21_spill] sm:$0xff] %v4725_v33  ;;  %v4734_v36 = vld [vmem:[%s6731_s0 + $0x120] sm:$0xff] }
  0x20   :  { %6782 = vst [vmem:[#allocation22_spill] sm:$0xff] %v4734_v36 }
  0x21   :  { %161 = vperm.xlu1 %4043, %v4450_v9   ;;  %605 = vperm.xlu0 %4044, %v4455_v10  }
  0x22   :  { %1945 = vmatpush1.bf16.msra.mxu0 %v4168_v37  ;;  %4027 = vmatpush1.bf16.msra.mxu1 %v4168_v37 }
  0x23   :  { %1946 = vmatprep.subr.bf16.mxu0 %v4169_v39  ;;  %4020 = vmatprep.subr.bf16.mxu1 %v4169_v39 }
  0x25   :  { %171 = vperm.xlu1 %4043, %v4462_v11   ;;  %613 = vperm.xlu0 %4044, %v4467_v12  }
  0x26   :  { %1947 = vmatpush1.bf16.msra.mxu0 %v4171_v40  ;;  %4028 = vmatpush1.bf16.msra.mxu1 %v4171_v40 }
  0x27   :  { %1948 = vmatprep.subr.bf16.mxu0 %v4172_v42  ;;  %4021 = vmatprep.subr.bf16.mxu1 %v4172_v42  ;;  %v4758_v42 = vld [vmem:[%s6731_s0 + $0x130] sm:$0xff] }
  0x28   :  { %6784 = vst [vmem:[#allocation24_spill] sm:$0xff] %v4758_v42 }
  0x29   :  { %181 = vperm.xlu1 %4043, %v4474_v13   ;;  %621 = vperm.xlu0 %4044, %v4479_v14  }
  0x2a   :  { %1949 = vmatpush1.bf16.msra.mxu0 %v4174_v43  ;;  %4029 = vmatpush1.bf16.msra.mxu1 %v4174_v43 }
  0x2b   :  { %1950 = vmatprep.subr.bf16.mxu0 %v4175_v45  ;;  %4022 = vmatprep.subr.bf16.mxu1 %v4175_v45 }
  0x2d   :  { %191 = vperm.xlu1 %4043, %v4486_v15   ;;  %629 = vperm.xlu0 %4044, %v4491_v16  }
  0x2e   :  { %1951 = vmatpush1.bf16.msra.mxu0 %v4177_v46  ;;  %4030 = vmatpush1.bf16.msra.mxu1 %v4177_v46  ;;  %v4769_v46 = vld [vmem:[%s6731_s0 + $0xd8] sm:$0xff] }
  0x2f   :  { %1952 = vmatprep.subr.bf16.mxu0 %v4178_v47  ;;  %4023 = vmatprep.subr.bf16.mxu1 %v4178_v47  ;;  %6785 = vst [vmem:[#allocation25_spill] sm:$0xff] %v4769_v46 }
  0x31   :  { %201 = vperm.xlu1 %4043, %v4498_v17   ;;  %637 = vperm.xlu0 %4044, %v4503_v18  }
  0x32   :  { %1953 = vmatpush1.bf16.msra.mxu0 %v4180_v48  ;;  %4031 = vmatpush1.bf16.msra.mxu1 %v4180_v48  ;;  %v4778_v48 = vld [vmem:[%s6731_s0 + $0x140] sm:$0xff] }
  0x33   :  { %1954 = vmatprep.subr.bf16.mxu0 %v4181_v49  ;;  %4024 = vmatprep.subr.bf16.mxu1 %v4181_v49  ;;  %6786 = vst [vmem:[#allocation26_spill] sm:$0xff] %v4778_v48 }
  0x35   :  { %211 = vperm.xlu1 %4043, %v4510_v19   ;;  %645 = vperm.xlu0 %4044, %v4517_v20  }
  0x36   :  { %1955 = vmatpush1.bf16.msra.mxu0 %v4183_v52  ;;  %4032 = vmatpush1.bf16.msra.mxu1 %v4183_v52 }
  0x39   :  { %221 = vperm.xlu1 %4043, %v4524_v21   ;;  %705 = vperm.xlu0 %4044, %v4529_v22  }
  0x3d   :  { %4045 = vset.pattern.permute.xlu1 %v6747_v0  ;;  %713 = vperm.xlu0 %4044, %v4536_v23  }
  0x3e   :  { %577 = vperm.xlu1 %4045, %v4541_v24  }
  0x41   :  { %721 = vperm.xlu0 %4044, %v4549_v25  }
  0x42   :  { %4046 = vset.pattern.permute.xlu1 %v6745_v26 }
  0x43   :  { %961 = vperm.xlu1 %4046, %v48_v3  }
  0x45   :  { %4089 = vset.pattern.permute.xlu0 %v6741_v1 }
  0x46   :  { %116 = vperm.xlu0 %4089, %v48_v3  }
  0x47   :  { %4047 = vset.pattern.permute.xlu1 %v6743_v27 }
  0x48   :  { %1349 = vperm.xlu1 %4047, %v48_v3  }
  0x4a   :  { %121 = vperm.xlu0 %4089, %v4541_v24  }
  0x4c   :  { %1353 = vperm.xlu1 %4047, %v4541_v24  }
  0x4e   :  { %136 = vperm.xlu0 %4089, %v4433_v6  }
  0x50   :  { %4048 = vset.pattern.permute.xlu1 %v6747_v0 }
  0x51   :  { %585 = vperm.xlu1 %4048, %v4421_v4  }
  0x52   :  { %146 = vperm.xlu0 %4089, %v4445_v8  }
  0x55   :  { %4049 = vset.pattern.permute.xlu1 %v6745_v26 }
  0x56   :  { %969 = vperm.xlu1 %4049, %v4412_v2   ;;  %156 = vperm.xlu0 %4089, %v4455_v10  }
  0x5a   :  { %4050 = vset.pattern.permute.xlu1 %v6743_v27  ;;  %166 = vperm.xlu0 %4089, %v4467_v12  }
  0x5b   :  { %1357 = vperm.xlu1 %4050, %v4412_v2  }
  0x5e   :  { %176 = vperm.xlu0 %4089, %v4479_v14  }
  0x5f   :  { %1361 = vperm.xlu1 %4050, %v4421_v4  }
  0x62   :  { %186 = vperm.xlu0 %4089, %v4491_v16  }
  0x63   :  { %4051 = vset.pattern.permute.xlu1 %v6747_v0 }
  0x64   :  { %593 = vperm.xlu1 %4051, %v4428_v5  }
  0x66   :  { %196 = vperm.xlu0 %4089, %v4503_v18  }
  0x68   :  { %4052 = vset.pattern.permute.xlu1 %v6745_v26 }
  0x69   :  { %977 = vperm.xlu1 %4052, %v4433_v6  }
  0x6a   :  { %206 = vperm.xlu0 %4089, %v4517_v20  }
  0x6d   :  { %4053 = vset.pattern.permute.xlu1 %v6743_v27 }
  0x6e   :  { %1365 = vperm.xlu1 %4053, %v4433_v6   ;;  %216 = vperm.xlu0 %4089, %v4579_v28  }
  0x72   :  { %1369 = vperm.xlu1 %4053, %v4428_v5   ;;  %226 = vperm.xlu0 %4089, %v4587_v29  }
  0x76   :  { %4054 = vset.pattern.permute.xlu1 %v6747_v0  ;;  %236 = vperm.xlu0 %4089, %v4594_v32  }
  0x77   :  { %601 = vperm.xlu1 %4054, %v4440_v7  }
  0x7a   :  { %246 = vperm.xlu0 %4089, %v4602_v35  }
  0x7b   :  { %4055 = vset.pattern.permute.xlu1 %v6745_v26 }
  0x7c   :  { %985 = vperm.xlu1 %4055, %v4445_v8  }
  0x7e   :  { %256 = vperm.xlu0 %4089, %v4609_v38  }
  0x80   :  { %4056 = vset.pattern.permute.xlu1 %v6743_v27 }
  0x81   :  { %1373 = vperm.xlu1 %4056, %v4445_v8  }
  0x82   :  { %266 = vperm.xlu0 %4089, %v4616_v41  }
  0x85   :  { %1377 = vperm.xlu1 %4056, %v4440_v7  }
  0x86   :  { %346 = vperm.xlu0 %4089, %v4624_v44  }
  0x89   :  { %4057 = vset.pattern.permute.xlu1 %v6747_v0 }
  0x8a   :  { %609 = vperm.xlu1 %4057, %v4450_v9   ;;  %4115 = vset.pattern.permute.xlu0 %v6745_v26 }
  0x8b   :  { %965 = vperm.xlu0 %4115, %v4541_v24   ;;  %v4713_v24 = vld [vmem:[%s6731_s0 + $0x110] sm:$0xff] }
  0x8c   :  { %v4632_v50 = vpop.permute.xlu1 %126  ;;  %v4634_v51 = vpop.permute.xlu0 %573 }
  0x8e   :  { %4058 = vset.pattern.permute.xlu1 %v6745_v26 }
  0x8f   :  { %993 = vperm.xlu1 %4058, %v4455_v10   ;;  %973 = vperm.xlu0 %4115, %v4421_v4  }
  0x90   :  { %v4639_v53 = vpop.permute.xlu1 %131  ;;  %v4641_v54 = vpop.permute.xlu0 %581 }
  0x93   :  { %4059 = vset.pattern.permute.xlu1 %v6743_v27  ;;  %981 = vperm.xlu0 %4115, %v4428_v5  }
  0x94   :  { %v4645_v55 = vpop.permute.xlu1 %141  ;;  %1381 = vperm.xlu1 %4059, %v4455_v10   ;;  %v4648_v56 = vpop.permute.xlu0 %589 }
  0x97   :  { %989 = vperm.xlu0 %4115, %v4440_v7  }
  0x98   :  { %v4651_v57 = vpop.permute.xlu1 %151  ;;  %1385 = vperm.xlu1 %4059, %v4450_v9   ;;  %v4654_v58 = vpop.permute.xlu0 %597 }
  0x9b   :  { %997 = vperm.xlu0 %4115, %v4450_v9   ;;  %v4698_v9 = vld [vmem:[%s6731_s0 + $0x100] sm:$0xff] }
  0x9c   :  { %v4657_v59 = vpop.permute.xlu1 %161  ;;  %4060 = vset.pattern.permute.xlu1 %v6747_v0  ;;  %v4660_v60 = vpop.permute.xlu0 %605 }
  0x9d   :  { %617 = vperm.xlu1 %4060, %v4462_v11  }
  0x9f   :  { %1005 = vperm.xlu0 %4115, %v4462_v11  }
  0xa0   :  { %v4664_v61 = vpop.permute.xlu1 %171  ;;  %v4666_v62 = vpop.permute.xlu0 %613 }
  0xa1   :  { %4061 = vset.pattern.permute.xlu1 %v6745_v26 }
  0xa2   :  { %1001 = vperm.xlu1 %4061, %v4467_v12  }
  0xa3   :  { %1013 = vperm.xlu0 %4115, %v4474_v13  }
  0xa4   :  { %v4671_v63 = vpop.permute.xlu1 %181  ;;  %v4673_v2 = vpop.permute.xlu0 %621 }
  0xa5   :  { %6769 = vst [vmem:[#allocation9_spill] sm:$0xff] %v4671_v63  ;;  %6770 = vst [vmem:[#allocation10_spill] sm:$0xff] %v4673_v2 }
  0xa6   :  { %4062 = vset.pattern.permute.xlu1 %v6743_v27 }
  0xa7   :  { %1389 = vperm.xlu1 %4062, %v4467_v12   ;;  %1021 = vperm.xlu0 %4115, %v4486_v15  }
  0xa8   :  { %v4678_v3 = vpop.permute.xlu1 %191  ;;  %v4680_v4 = vpop.permute.xlu0 %629 }
  0xa9   :  { %6771 = vst [vmem:[#allocation11_spill] sm:$0xff] %v4678_v3  ;;  %6772 = vst [vmem:[#allocation12_spill] sm:$0xff] %v4680_v4 }
  0xab   :  { %1393 = vperm.xlu1 %4062, %v4462_v11   ;;  %1029 = vperm.xlu0 %4115, %v4498_v17  }
  0xac   :  { %v4684_v5 = vpop.permute.xlu1 %201  ;;  %v4686_v6 = vpop.permute.xlu0 %637 }
  0xad   :  { %6773 = vst [vmem:[#allocation13_spill] sm:$0xff] %v4684_v5  ;;  %6774 = vst [vmem:[#allocation14_spill] sm:$0xff] %v4686_v6 }
  0xaf   :  { %4063 = vset.pattern.permute.xlu1 %v6747_v0  ;;  %1037 = vperm.xlu0 %4115, %v4510_v19  }
  0xb0   :  { %v4690_v7 = vpop.permute.xlu1 %211  ;;  %625 = vperm.xlu1 %4063, %v4474_v13   ;;  %v4693_v8 = vpop.permute.xlu0 %645 }
  0xb1   :  { %6775 = vst [vmem:[#allocation15_spill] sm:$0xff] %v4690_v7  ;;  %6776 = vst [vmem:[#allocation16_spill] sm:$0xff] %v4693_v8  ;;  %v434_v8 = vlaneseq }
  0xb3   :  { %1089 = vperm.xlu0 %4115, %v4698_v9  }
  0xb4   :  { %v4701_v10 = vpop.permute.xlu1 %221  ;;  %4064 = vset.pattern.permute.xlu1 %v6745_v26  ;;  %v4704_v11 = vpop.permute.xlu0 %705 }
  0xb5   :  { %6777 = vst [vmem:[#allocation17_spill] sm:$0xff] %v4701_v10  ;;  %6778 = vst [vmem:[#allocation18_spill] sm:$0xff] %v4704_v11  ;;  %1009 = vperm.xlu1 %4064, %v4479_v14   ;;  %v93_v11 = vld [vmem:[%s6731_s0 + $0x168] sm:$0xff] }
  0xb7   :  { %1045 = vperm.xlu0 %4115, %v4524_v21  }
  0xb8   :  { %v4708_v12 = vpop.permute.xlu0 %713 }
  0xb9   :  { %6779 = vst [vmem:[#allocation19_spill] sm:$0xff] %v4708_v12  ;;  %v4715_v30 = vpop.permute.xlu1 %577  ;;  %4065 = vset.pattern.permute.xlu1 %v6743_v27 }
  0xba   :  { %1397 = vperm.xlu1 %4065, %v4479_v14  }
  0xbb   :  { %1097 = vperm.xlu0 %4115, %v4713_v24  }
  0xbc   :  { %v4720_v31 = vpop.permute.xlu0 %721 }
  0xbd   :  { %6780 = vst [vmem:[#allocation20_spill] sm:$0xff] %v4720_v31  ;;  %v6789_v31 = vmov 2  }
  0xbe   :  { %1401 = vperm.xlu1 %4065, %v4474_v13   ;;  %v4728_v34 = vpop.permute.xlu1 %961  ;;  %v4746_v13 = vld [vmem:[%s6731_s0 + $0xc8] sm:$0xff] }
  0xbf   :  { %1053 = vperm.xlu0 %4115, %v4725_v33   ;;  %6783 = vst [vmem:[#allocation23_spill] sm:$0xff] %v4746_v13 }
  0xc1   :  { %v4736_v14 = vpop.permute.xlu0 %116 }
  0xc2   :  { %4066 = vset.pattern.permute.xlu1 %v6747_v0 }
  0xc3   :  { %633 = vperm.xlu1 %4066, %v4486_v15   ;;  %v4740_v37 = vpop.permute.xlu1 %1349  ;;  %1105 = vperm.xlu0 %4115, %v4734_v36  }
  0xc5   :  { %v4748_v39 = vpop.permute.xlu0 %121 }
  0xc7   :  { %4067 = vset.pattern.permute.xlu1 %v6745_v26  ;;  %v4751_v40 = vpop.permute.xlu1 %1353  ;;  %1061 = vperm.xlu0 %4115, %v4746_v13  }
  0xc8   :  { %1017 = vperm.xlu1 %4067, %v4491_v16  }
  0xc9   :  { %v4760_v43 = vpop.permute.xlu0 %136 }
  0xcb   :  { %1113 = vperm.xlu0 %4115, %v4758_v42   ;;  %v96_v42 = vld [vmem:[%s6731_s0 + $0x180] sm:$0xff] }
  0xcc   :  { %4068 = vset.pattern.permute.xlu1 %v6743_v27  ;;  %v4764_v45 = vpop.permute.xlu1 %585 }
  0xcd   :  { %1405 = vperm.xlu1 %4068, %v4491_v16   ;;  %v4772_v47 = vpop.permute.xlu0 %146  ;;  %v4789_v16 = vld [vmem:[%s6731_s0 + $0xe8] sm:$0xff] }
  0xce   :  { %6787 = vst [vmem:[#allocation27_spill] sm:$0xff] %v4789_v16 }
  0xcf   :  { %1069 = vperm.xlu0 %4115, %v4769_v46  }
  0xd1   :  { %1409 = vperm.xlu1 %4068, %v4486_v15   ;;  %v4781_v49 = vpop.permute.xlu1 %969  ;;  %v4783_v52 = vpop.permute.xlu0 %156  ;;  %v90_v15 = vld [vmem:[%s6731_s0 + $0x150] sm:$0xff] }
  0xd3   :  { %1121 = vperm.xlu0 %4115, %v4778_v48  }
  0xd5   :  { %4069 = vset.pattern.permute.xlu1 %v6747_v0  ;;  %v4792_v1 = vpop.permute.xlu0 %166  ;;  %v79_v0 = vld [vmem:[%s6731_s0 + $0xf8] sm:$0xff] }
  0xd6   :  { %641 = vperm.xlu1 %4069, %v4498_v17   ;;  %v4795_v27 = vpop.permute.xlu1 %1357 }
  0xd7   :  { %1077 = vperm.xlu0 %4115, %v4789_v16   ;;  %v6791_v16 = vmov 3  }
  0xd9   :  { %v4801_v26 = vpop.permute.xlu0 %176 }
  0xda   :  { %6788 = vst [vmem:[#allocation28_spill] sm:$0xff] %v4801_v26  ;;  %4070 = vset.pattern.permute.xlu1 %v6789_v31  ;;  %v4804_v12 = vpop.permute.xlu1 %1361 }
  0xdb   :  { %1025 = vperm.xlu1 %4070, %v4503_v18   ;;  %1129 = vperm.xlu0 %4115, %v90_v15  }
  0xdd   :  { %v4810_v48 = vpop.permute.xlu0 %186 }
  0xde   :  { %6790 = vst [vmem:[#allocation29_spill] sm:$0xff] %v4810_v48 }
  0xdf   :  { %4071 = vset.pattern.permute.xlu1 %v6791_v16  ;;  %v4813_v10 = vpop.permute.xlu1 %593  ;;  %1085 = vperm.xlu0 %4115, %v79_v0   ;;  %v6794_v0 = vmov 1  }
  0xe0   :  { %1413 = vperm.xlu1 %4071, %v4503_v18   ;;  %v99_v18 = vld [vmem:[%s6731_s0 + $0x198] sm:$0xff] }
  0xe1   :  { %v4819_v46 = vpop.permute.xlu0 %196 }
  0xe2   :  { %6792 = vst [vmem:[#allocation30_spill] sm:$0xff] %v4819_v46  ;;  %v112_v46 = vld [vmem:[%s6732_s1] sm:$0xf] }
  0xe3   :  { %1141 = vperm.xlu0 %4115, %v93_v11  }
  0xe4   :  { %1417 = vperm.xlu1 %4071, %v4498_v17   ;;  %v4822_v15 = vpop.permute.xlu1 %977 }
  0xe5   :  { %v4827_v7 = vpop.permute.xlu0 %206 }
  0xe6   :  { %6793 = vst [vmem:[#allocation31_spill] sm:$0xff] %v4827_v7 }
  0xe7   :  { %1153 = vperm.xlu0 %4115, %v96_v42   ;;  %v435_v42 = vshrl.u32 %v434_v8, 7 }
  0xe8   :  { %4072 = vset.pattern.permute.xlu1 %v6794_v0 }
  0xe9   :  { %649 = vperm.xlu1 %4072, %v4510_v19   ;;  %v4834_v11 = vpop.permute.xlu1 %1365  ;;  %v4836_v17 = vpop.permute.xlu0 %216  ;;  %v4848_v5 = vsub.s32 0, %v435_v42  ;;  %v1606_v63 = vsub.s32 3, %v435_v42 }
  0xea   :  { %6795 = vst [vmem:[#allocation32_spill] sm:$0xff] %v4836_v17  ;;  %v6799_v17 = vmov 0  }
  0xeb   :  { %1165 = vperm.xlu0 %4115, %v99_v18   ;;  %6798 = vst [vmem:[#allocation35_spill] sm:$0xff] %v4848_v5 }
  0xed   :  { %4073 = vset.pattern.permute.xlu1 %v6789_v31  ;;  %v4839_v13 = vpop.permute.xlu1 %1369  ;;  %v4841_v7 = vpop.permute.xlu0 %226 }
  0xee   :  { %6796 = vst [vmem:[#allocation33_spill] sm:$0xff] %v4841_v7  ;;  %1033 = vperm.xlu1 %4073, %v4517_v20  }
  0xef   :  { %4127 = vset.pattern.permute.xlu0 %v6791_v16 }
  0xf0   :  { %1421 = vperm.xlu0 %4127, %v4517_v20   ;;  %v4861_v20 = vrot.slane %v112_v46, %v4848_v5  ;;  %v4879_v5 = vld [vmem:[%s6733_s2] ss:$0 sm:$0xff] }
  0xf1   :  { %v4846_v6 = vpop.permute.xlu0 %236 }
  0xf2   :  { %6797 = vst [vmem:[#allocation34_spill] sm:$0xff] %v4846_v6  ;;  %4074 = vset.pattern.permute.xlu1 %v6799_v17  ;;  %v4851_v18 = vpop.permute.xlu1 %601  ;;  %v4863_v6 = vsub.s32 1, %v435_v42  ;;  %v438_v36 = vmul.f32 %v4861_v20, %v4736_v14  ;;  %v439_v26 = vmul.f32 %v4861_v20, %v4748_v39  ;;  %v441_v39 = vmul.f32 %v4861_v20, %v4639_v53 }
  0xf3   :  { %276 = vperm.xlu1 %4074, %v4698_v9  }
  0xf4   :  { %1481 = vperm.xlu0 %4127, %v4529_v22   ;;  %6801 = vst [vmem:[#allocation37_spill] sm:$0xff] %v4863_v6  ;;  %v4874_v3 = vrot.slane %v112_v46, %v4863_v6  ;;  %v508_v14 = vadd.f32 %v4879_v5, %v438_v36 }
  0xf5   :  { %v4858_v8 = vpop.permute.xlu0 %246 }
  0xf6   :  { %6800 = vst [vmem:[#allocation36_spill] sm:$0xff] %v4858_v8  ;;  %v1218_v8 = vsub.s32 2, %v435_v42  ;;  %v832_v48 = vmul.f32 %v4874_v3, %v4634_v51  ;;  %v509_v42 = vadd.f32 %v4879_v5, %v439_v26 }
  0xf7   :  { %281 = vperm.xlu1 %4074, %v4529_v22   ;;  %v4866_v7 = vpop.permute.xlu1 %985 }
  0xf8   :  { %1429 = vperm.xlu0 %4127, %v4579_v28   ;;  %v896_v33 = vadd.f32 %v832_v48, %v508_v14  ;;  %v833_v48 = vmul.f32 %v4874_v3, %v4715_v30  ;;  %v834_v30 = vmul.f32 %v4874_v3, %v4641_v54  ;;  %v443_v54 = vmul.f32 %v4861_v20, %v4645_v55 }
  0xf9   :  { %v4871_v4 = vpop.permute.xlu0 %256 }
  0xfa   :  { %6802 = vst [vmem:[#allocation38_spill] sm:$0xff] %v4871_v4  ;;  %v4891_v4 = vrot.slane %v112_v46, %v1218_v8  ;;  %v4904_v8 = vrot.slane %v112_v46, %v1606_v63  ;;  %v897_v46 = vadd.f32 %v833_v48, %v509_v42 }
  0xfb   :  { %4075 = vset.pattern.permute.xlu1 %v6791_v16 }
  0xfc   :  { %1425 = vperm.xlu1 %4075, %v4510_v19   ;;  %v4886_v2 = vpop.permute.xlu1 %1373  ;;  %1489 = vperm.xlu0 %4127, %v4536_v23   ;;  %v1220_v36 = vmul.f32 %v4891_v4, %v4728_v34  ;;  %v440_v34 = vmul.f32 %v4861_v20, %v4632_v50  ;;  %v1608_v63 = vmul.f32 %v4904_v8, %v4740_v37  ;;  %v4932_v37 = vld [vmem:[%s6731_s0 + $0x138] sm:$0xff] }
  0xfd   :  { %v4889_v6 = vpop.permute.xlu0 %266  ;;  %v1609_v50 = vmul.f32 %v4904_v8, %v4751_v40  ;;  %v1222_v48 = vmul.f32 %v4891_v4, %v4781_v49  ;;  %v1611_v55 = vmul.f32 %v4904_v8, %v4804_v12 }
  0xfe   :  { %6803 = vst [vmem:[#allocation39_spill] sm:$0xff] %v4889_v6  ;;  %v1284_v6 = vadd.f32 %v1220_v36, %v896_v33  ;;  %v835_v33 = vmul.f32 %v4874_v3, %v4764_v45  ;;  %v510_v45 = vadd.f32 %v4879_v5, %v440_v34  ;;  %v1610_v34 = vmul.f32 %v4904_v8, %v4795_v27 }
 0x100   :  { %4076 = vset.pattern.permute.xlu1 %v6794_v0  ;;  %v4896_v51 = vpop.permute.xlu1 %1377  ;;  %1437 = vperm.xlu0 %4127, %v4587_v29   ;;  %v1672_v36 = vadd.f32 %v1608_v63, %v1284_v6  ;;  %v442_v6 = vmul.f32 %v4861_v20, %v4760_v43  ;;  %v837_v43 = vmul.f32 %v4874_v3, %v4813_v10 }
 0x101   :  { %701 = vperm.xlu1 %4076, %v4698_v9   ;;  %v4900_v19 = vpop.permute.xlu0 %346 }
 0x102   :  { %6804 = vst [vmem:[#allocation40_spill] sm:$0xff] %v4900_v19  ;;  %v511_v19 = vadd.f32 %v4879_v5, %v441_v39 }
 0x104   :  { %1497 = vperm.xlu0 %4127, %v4549_v25   ;;  %v899_v40 = vadd.f32 %v835_v33, %v511_v19  ;;  %v836_v33 = vmul.f32 %v4874_v3, %v4648_v56  ;;  %v4964_v56 = vld [vmem:[%s6731_s0 + $0x148] sm:$0xff] }
 0x105   :  { %653 = vperm.xlu1 %4076, %v4579_v28   ;;  %v4913_v14 = vpop.permute.xlu1 %609 }
 0x106   :  { %v966_v26 = vpop.permute.xlu0 %965 }
 0x107   :  { %v1221_v53 = vmul.f32 %v4891_v4, %v966_v26 }
 0x108   :  { %1445 = vperm.xlu0 %4127, %v4594_v32  }
 0x109   :  { %v1285_v25 = vadd.f32 %v1221_v53, %v897_v46  ;;  %657 = vperm.xlu1 %4076, %v4524_v21   ;;  %v898_v46 = vadd.f32 %v834_v30, %v510_v45  ;;  %v1736_v53 = vmax.f32 %v1672_v36, 0.0  ;;  %v512_v30 = vadd.f32 %v4879_v5, %v442_v6 }
 0x10a   :  { %v4939_v42 = vpop.permute.xlu1 %993  ;;  %v974_v39 = vpop.permute.xlu0 %973 }
 0x10b   :  { %v1673_v63 = vadd.f32 %v1609_v50, %v1285_v25  ;;  %v1223_v26 = vmul.f32 %v4891_v4, %v974_v39  ;;  %v513_v25 = vadd.f32 %v4879_v5, %v443_v54  ;;  %v1286_v36 = vadd.f32 %v1222_v48, %v898_v46 }
 0x10c   :  { %1505 = vperm.xlu0 %4127, %v4932_v37   ;;  %v444_v54 = vmul.f32 %v4861_v20, %v4772_v47  ;;  %v1224_v48 = vmul.f32 %v4891_v4, %v4822_v15  ;;  %v839_v47 = vmul.f32 %v4874_v3, %v4851_v18  ;;  %v838_v15 = vmul.f32 %v4874_v3, %v4654_v58  ;;  %v4994_v58 = vld [vmem:[%s6731_s0 + $0x158] sm:$0xff] }
 0x10d   :  { %v1287_v19 = vadd.f32 %v1223_v26, %v899_v40  ;;  %4077 = vset.pattern.permute.xlu1 %v6789_v31  ;;  %v1737_v49 = vmax.f32 %v1673_v63, 0.0  ;;  %v1674_v39 = vadd.f32 %v1610_v34, %v1286_v36  ;;  %v901_v40 = vadd.f32 %v837_v43, %v513_v25 }
 0x10e   :  { %1093 = vperm.xlu1 %4077, %v4529_v22   ;;  %v982_v27 = vpop.permute.xlu0 %981  ;;  %v445_v22 = vmul.f32 %v4861_v20, %v4651_v57  ;;  %v1612_v57 = vmul.f32 %v4904_v8, %v4834_v11 }
 0x10f   :  { %v1675_v50 = vadd.f32 %v1611_v55, %v1287_v19  ;;  %v1225_v12 = vmul.f32 %v4891_v4, %v982_v27  ;;  %v4958_v45 = vpop.permute.xlu1 %1381  ;;  %v1800_v10 = vpack.c.bf16 %v1737_v49, %v1736_v53  ;;  %v1738_v53 = vmax.f32 %v1674_v39, 0.0 }
 0x110   :  { %1453 = vperm.xlu0 %4127, %v4602_v35   ;;  %v900_v35 = vadd.f32 %v836_v33, %v512_v30  ;;  %v515_v34 = vadd.f32 %v4879_v5, %v445_v22  ;;  %v514_v55 = vadd.f32 %v4879_v5, %v444_v54  ;;  %v447_v30 = vmul.f32 %v4861_v20, %v4657_v59 }
 0x111   :  { %1973 = vmatmul.mubr.bf16.vlgmr.msra.gmra.mxu0 %v1800_v10  ;;  %v1289_v63 = vadd.f32 %v1225_v12, %v901_v40  ;;  %v1739_v46 = vmax.f32 %v1675_v50, 0.0  ;;  %v446_v27 = vmul.f32 %v4861_v20, %v4783_v52  ;;  %v1614_v59 = vmul.f32 %v4904_v8, %v4886_v2 }
 0x112   :  { %1041 = vperm.xlu1 %4077, %v4579_v28   ;;  %v990_v6 = vpop.permute.xlu0 %989  ;;  %1982 = vmatprep.mubr.bf16.mxu0 %v6799_v17  ;;  %v1613_v28 = vmul.f32 %v4904_v8, %v4839_v13  ;;  %v1288_v19 = vadd.f32 %v1224_v48, %v900_v35  ;;  %v903_v33 = vadd.f32 %v839_v47, %v515_v34 }
 0x113   :  { %v4974_v26 = vpop.permute.xlu1 %1385  ;;  %v1227_v11 = vmul.f32 %v4891_v4, %v990_v6  ;;  %v1801_v13 = vpack.c.bf16 %v1739_v46, %v1738_v53  ;;  %v1615_v52 = vmul.f32 %v4904_v8, %v4896_v51  ;;  %v841_v39 = vmul.f32 %v4874_v3, %v4913_v14 }
 0x114   :  { %1513 = vperm.xlu0 %4127, %v4964_v56   ;;  %v1677_v49 = vadd.f32 %v1613_v28, %v1289_v63  ;;  %v1676_v18 = vadd.f32 %v1612_v57, %v1288_v19  ;;  %v840_v22 = vmul.f32 %v4874_v3, %v4660_v60  ;;  %v516_v54 = vadd.f32 %v4879_v5, %v446_v27 }
 0x115   :  { %v1291_v50 = vadd.f32 %v1227_v11, %v903_v33  ;;  %v449_v46 = vmul.f32 %v4861_v20, %v4664_v61  ;;  %v448_v60 = vmul.f32 %v4861_v20, %v4792_v1  ;;  %v1228_v47 = vmul.f32 %v4891_v4, %v4939_v42  ;;  %v5041_v42 = vld [vmem:[%s6731_s0 + $0x188] sm:$0xff] }
 0x116   :  { %4078 = vset.pattern.permute.xlu1 %v6791_v16  ;;  %v998_v43 = vpop.permute.xlu0 %997  ;;  %v1741_v12 = vmax.f32 %v1677_v49, 0.0  ;;  %v1740_v10 = vmax.f32 %v1676_v18, 0.0  ;;  %v904_v28 = vadd.f32 %v840_v22, %v516_v54  ;;  %v1616_v61 = vmul.f32 %v4904_v8, %v4958_v45  ;;  %v6805_v33 = vld [vmem:[#allocation21_spill] sm:$0xff] }
 0x117   :  { %1477 = vperm.xlu1 %4078, %v4698_v9   ;;  %v902_v9 = vadd.f32 %v838_v15, %v514_v55  ;;  %v1679_v48 = vadd.f32 %v1615_v52, %v1291_v50  ;;  %v1229_v2 = vmul.f32 %v4891_v4, %v998_v43  ;;  %v1617_v1 = vmul.f32 %v4904_v8, %v4974_v26 }
 0x118   :  { %v618_v25 = vpop.permute.xlu1 %617  ;;  %1461 = vperm.xlu0 %4127, %v4609_v38   ;;  %v1226_v38 = vmul.f32 %v4891_v4, %v4866_v7  ;;  %v517_v7 = vadd.f32 %v4879_v5, %v447_v30  ;;  %v1802_v63 = vpack.c.bf16 %v1741_v12, %v1740_v10  ;;  %v519_v43 = vadd.f32 %v4879_v5, %v449_v46  ;;  %v6806_v12 = vld [vmem:[#allocation28_spill] sm:$0xff] }
 0x119   :  { %1983 = vmatmul.mubr.bf16.gmra.mxu0 %v1801_v13  ;;  %v843_v55 = vmul.f32 %v4874_v3, %v618_v25  ;;  %v518_v45 = vadd.f32 %v4879_v5, %v448_v60  ;;  %v1292_v26 = vadd.f32 %v1228_v47, %v904_v28  ;;  %v450_v10 = vmul.f32 %v4861_v20, %v6806_v12 }
 0x11a   :  { %v1006_v36 = vpop.permute.xlu0 %1005  ;;  %1992 = vmatprep.mubr.bf16.mxu0 %v6799_v17  ;;  %v1290_v35 = vadd.f32 %v1226_v38, %v902_v9  ;;  %v905_v14 = vadd.f32 %v841_v39, %v517_v7  ;;  %v5070_v7 = vld [vmem:[%s6731_s0 + $0x1b8] sm:$0xff] }
 0x11b   :  { %4079 = vset.pattern.permute.xlu1 %v6799_v17  ;;  %v907_v25 = vadd.f32 %v843_v55, %v519_v43  ;;  %v1231_v18 = vmul.f32 %v4891_v4, %v1006_v36 }
 0x11c   :  { %286 = vperm.xlu1 %4079, %v4713_v24   ;;  %1521 = vperm.xlu0 %4127, %v4994_v58   ;;  %v1678_v51 = vadd.f32 %v1614_v59, %v1290_v35  ;;  %v1293_v34 = vadd.f32 %v1229_v2, %v905_v14  ;;  %v520_v14 = vadd.f32 %v4879_v5, %v450_v10 }
 0x11d   :  { %v1002_v40 = vpop.permute.xlu1 %1001  ;;  %v1295_v52 = vadd.f32 %v1231_v18, %v907_v25 }
 0x11e   :  { %v5016_v6 = vpop.permute.xlu0 %1013  ;;  %v1742_v15 = vmax.f32 %v1678_v51, 0.0  ;;  %v1681_v11 = vadd.f32 %v1617_v1, %v1293_v34  ;;  %v1230_v9 = vmul.f32 %v4891_v4, %v1002_v40 }
 0x11f   :  { %v1233_v55 = vmul.f32 %v4891_v4, %v5016_v6 }
 0x120   :  { %291 = vperm.xlu1 %4079, %v4536_v23   ;;  %1469 = vperm.xlu0 %4127, %v4616_v41   ;;  %v1743_v41 = vmax.f32 %v1679_v48, 0.0  ;;  %v1745_v50 = vmax.f32 %v1681_v11, 0.0  ;;  %v6807_v48 = vld [vmem:[#allocation9_spill] sm:$0xff] }
 0x121   :  { %1993 = vmatmul.mubr.bf16.gmra.mxu0 %v1802_v63  ;;  %v451_v2 = vmul.f32 %v4861_v20, %v6807_v48  ;;  %v6808_v63 = vld [vmem:[#allocation10_spill] sm:$0xff] }
 0x122   :  { %v1390_v53 = vpop.permute.xlu1 %1389  ;;  %v5025_v57 = vpop.permute.xlu0 %1021  ;;  %2002 = vmatprep.mubr.bf16.mxu0 %v6799_v17  ;;  %v1803_v13 = vpack.c.bf16 %v1743_v41, %v1742_v15  ;;  %v844_v51 = vmul.f32 %v4874_v3, %v6808_v63 }
 0x123   :  { %v1618_v39 = vmul.f32 %v4904_v8, %v1390_v53  ;;  %v521_v34 = vadd.f32 %v4879_v5, %v451_v2 }
 0x124   :  { %4080 = vset.pattern.permute.xlu1 %v6791_v16  ;;  %1533 = vperm.xlu0 %4127, %v4624_v44   ;;  %v842_v44 = vmul.f32 %v4874_v3, %v4666_v62  ;;  %v5055_v62 = vld [vmem:[%s6731_s0 + $0x1a0] sm:$0xff]  ;;  %v908_v41 = vadd.f32 %v844_v51, %v520_v14 }
 0x125   :  { %1433 = vperm.xlu1 %4080, %v4524_v21   ;;  %v1680_v21 = vadd.f32 %v1616_v61, %v1292_v26 }
 0x126   :  { %v1394_v19 = vpop.permute.xlu1 %1393  ;;  %v5046_v49 = vpop.permute.xlu0 %1029  ;;  %v906_v27 = vadd.f32 %v842_v44, %v518_v45 }
 0x127   :  { %v1619_v38 = vmul.f32 %v4904_v8, %v1394_v19  ;;  %v1744_v59 = vmax.f32 %v1680_v21, 0.0 }
 0x128   :  { %1545 = vperm.xlu0 %4127, %v5041_v42   ;;  %v1294_v22 = vadd.f32 %v1230_v9, %v906_v27 }
 0x129   :  { %4081 = vset.pattern.permute.xlu1 %v6799_v17  ;;  %2003 = vmatmul.mubr.bf16.gmra.mxu0 %v1803_v13  ;;  %v1683_v54 = vadd.f32 %v1619_v38, %v1295_v52  ;;  %v1804_v35 = vpack.c.bf16 %v1745_v50, %v1744_v59  ;;  %v6809_v50 = vld [vmem:[#allocation29_spill] sm:$0xff]  ;;  %v6810_v52 = vld [vmem:[#allocation11_spill] sm:$0xff] }
 0x12a   :  { %231 = vperm.xlu1 %4081, %v6805_v33   ;;  %v5058_v30 = vpop.permute.xlu0 %1037  ;;  %2012 = vmatprep.mubr.bf16.mxu0 %v6799_v17  ;;  %v1682_v60 = vadd.f32 %v1618_v39, %v1294_v22  ;;  %v452_v12 = vmul.f32 %v4861_v20, %v6809_v50  ;;  %v453_v39 = vmul.f32 %v4861_v20, %v6810_v52 }
 0x12b   :  { %v626_v36 = vpop.permute.xlu1 %625  ;;  %v1747_v47 = vmax.f32 %v1683_v54, 0.0 }
 0x12c   :  { %1557 = vperm.xlu0 %4127, %v5055_v62   ;;  %v845_v53 = vmul.f32 %v4874_v3, %v626_v36  ;;  %v1746_v61 = vmax.f32 %v1682_v60, 0.0  ;;  %v522_v54 = vadd.f32 %v4879_v5, %v452_v12  ;;  %v523_v2 = vadd.f32 %v4879_v5, %v453_v39 }
 0x12e   :  { %4082 = vset.pattern.permute.xlu1 %v6794_v0  ;;  %v5073_v40 = vpop.permute.xlu0 %1089  ;;  %v909_v43 = vadd.f32 %v845_v53, %v521_v34  ;;  %v1805_v45 = vpack.c.bf16 %v1747_v47, %v1746_v61  ;;  %v6812_v47 = vld [vmem:[#allocation22_spill] sm:$0xff] }
 0x12f   :  { %709 = vperm.xlu1 %4082, %v4713_v24  }
 0x130   :  { %v1010_v46 = vpop.permute.xlu1 %1009  ;;  %1569 = vperm.xlu0 %4127, %v5070_v7   ;;  %v1297_v21 = vadd.f32 %v1233_v55, %v909_v43  ;;  %v6813_v55 = vld [vmem:[#allocation8_spill] sm:$0xff] }
 0x131   :  { %2013 = vmatmul.mubr.bf16.gmra.mxu0 %v1804_v35  ;;  %v1232_v15 = vmul.f32 %v4891_v4, %v1010_v46  ;;  %v1235_v46 = vmul.f32 %v4891_v4, %v5025_v57 }
 0x132   :  { %v5083_v28 = vpop.permute.xlu0 %1045  ;;  %2022 = vmatprep.mubr.bf16.mxu0 %v6799_v17 }
 0x133   :  { %661 = vperm.xlu1 %4082, %v4587_v29   ;;  %v1296_v26 = vadd.f32 %v1232_v15, %v908_v41 }
 0x134   :  { %4137 = vset.pattern.permute.xlu0 %v6794_v0 }
 0x135   :  { %v1398_v1 = vpop.permute.xlu1 %1397  ;;  %729 = vperm.xlu0 %4137, %v4932_v37  }
 0x136   :  { %v1620_v44 = vmul.f32 %v4904_v8, %v1398_v1  ;;  %v5094_v19 = vpop.permute.xlu0 %1097 }
 0x137   :  { %665 = vperm.xlu1 %4082, %v6805_v33  }
 0x138   :  { %v1684_v13 = vadd.f32 %v1620_v44, %v1296_v26 }
 0x139   :  { %v1402_v11 = vpop.permute.xlu1 %1401  ;;  %2023 = vmatmul.mubr.bf16.gmra.mxu0 %v1805_v45  ;;  %737 = vperm.xlu0 %4137, %v4964_v56  }
 0x13a   :  { %v1621_v25 = vmul.f32 %v4904_v8, %v1402_v11  ;;  %v5099_v18 = vpop.permute.xlu0 %1053  ;;  %2032 = vmatprep.mubr.bf16.mxu0 %v6799_v17  ;;  %v1748_v27 = vmax.f32 %v1684_v13, 0.0  ;;  %v6814_v11 = vld [vmem:[#allocation30_spill] sm:$0xff] }
 0x13b   :  { %4083 = vset.pattern.permute.xlu1 %v6789_v31  ;;  %v454_v13 = vmul.f32 %v4861_v20, %v6814_v11  ;;  %v6819_v11 = vld [vmem:[#allocation16_spill] sm:$0xff] }
 0x13c   :  { %v1685_v6 = vadd.f32 %v1621_v25, %v1297_v21  ;;  %1101 = vperm.xlu1 %4083, %v4536_v23   ;;  %v6811_v23 = vld [vmem:[#allocation12_spill] sm:$0xff] }
 0x13d   :  { %745 = vperm.xlu0 %4137, %v4994_v58   ;;  %v846_v22 = vmul.f32 %v4874_v3, %v6811_v23  ;;  %v524_v50 = vadd.f32 %v4879_v5, %v454_v13  ;;  %v850_v13 = vmul.f32 %v4874_v3, %v6819_v11 }
 0x13e   :  { %v1749_v9 = vmax.f32 %v1685_v6, 0.0  ;;  %v634_v38 = vpop.permute.xlu1 %633  ;;  %v5105_v36 = vpop.permute.xlu0 %1105  ;;  %v6815_v6 = vld [vmem:[#allocation13_spill] sm:$0xff] }
 0x13f   :  { %v847_v48 = vmul.f32 %v4874_v3, %v634_v38  ;;  %v910_v63 = vadd.f32 %v846_v22, %v522_v54 }
 0x140   :  { %1049 = vperm.xlu1 %4083, %v4587_v29   ;;  %v1806_v10 = vpack.c.bf16 %v1749_v9, %v1748_v27  ;;  %v455_v27 = vmul.f32 %v4861_v20, %v6815_v6  ;;  %v6816_v9 = vld [vmem:[#allocation14_spill] sm:$0xff]  ;;  %v6820_v6 = vld [vmem:[#allocation15_spill] sm:$0xff] }
 0x141   :  { %v911_v60 = vadd.f32 %v847_v48, %v523_v2  ;;  %v848_v38 = vmul.f32 %v4874_v3, %v6816_v9  ;;  %v1237_v48 = vmul.f32 %v4891_v4, %v5046_v49  ;;  %v4281_v9 = vld [vmem:[%s6731_s0 + $0xc0] sm:$0xff] }
 0x142   :  { %2033 = vmatmul.mubr.bf16.gmra.mxu0 %v1806_v10  ;;  %v5110_v59 = vpop.permute.xlu0 %1061  ;;  %v525_v39 = vadd.f32 %v4879_v5, %v455_v27  ;;  %v457_v27 = vmul.f32 %v4861_v20, %v6820_v6 }
 0x143   :  { %v1018_v35 = vpop.permute.xlu1 %1017  ;;  %2042 = vmatprep.mubr.bf16.mxu0 %v6799_v17  ;;  %v1299_v61 = vadd.f32 %v1235_v46, %v911_v60  ;;  %v912_v23 = vadd.f32 %v848_v38, %v524_v50 }
 0x144   :  { %4084 = vset.pattern.permute.xlu1 %v6791_v16  ;;  %v1234_v51 = vmul.f32 %v4891_v4, %v1018_v35 }
 0x145   :  { %1485 = vperm.xlu1 %4084, %v4713_v24  }
 0x146   :  { %v5121_v29 = vpop.permute.xlu0 %1113  ;;  %v1298_v24 = vadd.f32 %v1234_v51, %v910_v63 }
 0x148   :  { %v1406_v14 = vpop.permute.xlu1 %1405 }
 0x149   :  { %v1622_v53 = vmul.f32 %v4904_v8, %v1406_v14  ;;  %4085 = vset.pattern.permute.xlu1 %v6799_v17 }
 0x14a   :  { %296 = vperm.xlu1 %4085, %v6812_v47   ;;  %v5130_v34 = vpop.permute.xlu0 %1069 }
 0x14b   :  { %v1686_v15 = vadd.f32 %v1622_v53, %v1298_v24 }
 0x14c   :  { %v1410_v41 = vpop.permute.xlu1 %1409 }
 0x14d   :  { %v1623_v1 = vmul.f32 %v4904_v8, %v1410_v41  ;;  %v1750_v44 = vmax.f32 %v1686_v15, 0.0 }
 0x14e   :  { %301 = vperm.xlu1 %4085, %v6813_v55   ;;  %v5134_v43 = vpop.permute.xlu0 %1121 }
 0x14f   :  { %v1687_v57 = vadd.f32 %v1623_v1, %v1299_v61 }
 0x151   :  { %v1751_v45 = vmax.f32 %v1687_v57, 0.0  ;;  %v642_v26 = vpop.permute.xlu1 %641  ;;  %v6818_v57 = vld [vmem:[#allocation31_spill] sm:$0xff] }
 0x152   :  { %4086 = vset.pattern.permute.xlu1 %v6791_v16  ;;  %v5139_v21 = vpop.permute.xlu0 %1077  ;;  %v849_v52 = vmul.f32 %v4874_v3, %v642_v26 }
 0x153   :  { %1441 = vperm.xlu1 %4086, %v6805_v33   ;;  %v1807_v25 = vpack.c.bf16 %v1751_v45, %v1750_v44  ;;  %v6817_v33 = vld [vmem:[#allocation23_spill] sm:$0xff]  ;;  %v456_v44 = vmul.f32 %v4861_v20, %v6818_v57 }
 0x154   :  { %v913_v2 = vadd.f32 %v849_v52, %v525_v39 }
 0x155   :  { %2043 = vmatmul.mubr.bf16.gmra.mxu0 %v1807_v25  ;;  %v526_v25 = vadd.f32 %v4879_v5, %v456_v44 }
 0x156   :  { %v1026_v12 = vpop.permute.xlu1 %1025  ;;  %v5147_v10 = vpop.permute.xlu0 %1129  ;;  %2052 = vmatprep.mubr.bf16.mxu0 %v6799_v17  ;;  %v1301_v53 = vadd.f32 %v1237_v48, %v913_v2 }
 0x157   :  { %4087 = vset.pattern.permute.xlu1 %v6799_v17  ;;  %v1236_v22 = vmul.f32 %v4891_v4, %v1026_v12  ;;  %v914_v12 = vadd.f32 %v850_v13, %v526_v25 }
 0x158   :  { %241 = vperm.xlu1 %4087, %v6817_v33  }
 0x159   :  { %v1300_v51 = vadd.f32 %v1236_v22, %v912_v23  ;;  %v527_v23 = vadd.f32 %v4879_v5, %v457_v27 }
 0x15a   :  { %v5155_v54 = vpop.permute.xlu0 %1085 }
 0x15b   :  { %v1414_v35 = vpop.permute.xlu1 %1413 }
 0x15c   :  { %v1624_v63 = vmul.f32 %v4904_v8, %v1414_v35  ;;  %4088 = vset.pattern.permute.xlu1 %v6794_v0  ;;  %v1239_v35 = vmul.f32 %v4891_v4, %v5058_v30 }
 0x15d   :  { %717 = vperm.xlu1 %4088, %v6812_v47  }
 0x15e   :  { %v5162_v46 = vpop.permute.xlu0 %1141  ;;  %v1688_v60 = vadd.f32 %v1624_v63, %v1300_v51 }
 0x15f   :  { %v1418_v14 = vpop.permute.xlu1 %1417 }
 0x160   :  { %v1625_v24 = vmul.f32 %v4904_v8, %v1418_v14  ;;  %v1752_v15 = vmax.f32 %v1688_v60, 0.0 }
 0x161   :  { %669 = vperm.xlu1 %4088, %v4594_v32   ;;  %v4280_v32 = vld [vmem:[%s6731_s0 + $0x128] sm:$0xff] }
 0x162   :  { %v1689_v41 = vadd.f32 %v1625_v24, %v1301_v53  ;;  %v5166_v1 = vpop.permute.xlu0 %1153  ;;  %v6821_v24 = vld [vmem:[#allocation24_spill] sm:$0xff] }
 0x164   :  { %v1753_v49 = vmax.f32 %v1689_v41, 0.0  ;;  %v650_v61 = vpop.permute.xlu1 %649 }
 0x165   :  { %673 = vperm.xlu1 %4088, %v6817_v33   ;;  %v851_v50 = vmul.f32 %v4874_v3, %v650_v61 }
 0x166   :  { %v1808_v55 = vpack.c.bf16 %v1753_v49, %v1752_v15  ;;  %v5176_v26 = vpop.permute.xlu0 %1165 }
 0x167   :  { %v915_v48 = vadd.f32 %v851_v50, %v527_v23 }
 0x168   :  { %2053 = vmatmul.mubr.bf16.gmra.mxu0 %v1808_v55  ;;  %v5204_v55 = vld [vmem:[%s6731_s0 + $0x160] sm:$0xff] }
 0x169   :  { %4090 = vset.pattern.permute.xlu1 %v6789_v31  ;;  %v1034_v45 = vpop.permute.xlu1 %1033  ;;  %2062 = vmatprep.mubr.bf16.mxu0 %v6799_v17  ;;  %v1303_v60 = vadd.f32 %v1239_v35, %v915_v48  ;;  %v4282_v35 = vld [vmem:[%s6731_s0 + $0xd0] sm:$0xff] }
 0x16a   :  { %1109 = vperm.xlu1 %4090, %v4280_v32   ;;  %v1238_v52 = vmul.f32 %v4891_v4, %v1034_v45  ;;  %749 = vperm.xlu0 %4137, %v5204_v55   ;;  %v6822_v45 = vld [vmem:[#allocation25_spill] sm:$0xff]  ;;  %v6823_v32 = vld [vmem:[#allocation18_spill] sm:$0xff] }
 0x16b   :  { %v1422_v39 = vpop.permute.xlu0 %1421  ;;  %v865_v11 = vmul.f32 %v4874_v3, %v6823_v32 }
 0x16c   :  { %v1302_v2 = vadd.f32 %v1238_v52, %v914_v12  ;;  %v1626_v63 = vmul.f32 %v4904_v8, %v1422_v39  ;;  %v1252_v39 = vmul.f32 %v4891_v4, %v5073_v40 }
 0x16e   :  { %1057 = vperm.xlu1 %4090, %v4281_v9   ;;  %v277_v38 = vpop.permute.xlu1 %276  ;;  %v1690_v14 = vadd.f32 %v1626_v63, %v1302_v2  ;;  %v6824_v2 = vld [vmem:[#allocation32_spill] sm:$0xff] }
 0x16f   :  { %v1482_v9 = vpop.permute.xlu0 %1481  ;;  %v458_v63 = vmul.f32 %v4861_v20, %v6824_v2 }
 0x170   :  { %v1754_v15 = vmax.f32 %v1690_v14, 0.0 }
 0x172   :  { %4091 = vset.pattern.permute.xlu1 %v6791_v16  ;;  %v282_v22 = vpop.permute.xlu1 %281 }
 0x173   :  { %1493 = vperm.xlu1 %4091, %v6812_v47   ;;  %v471_v44 = vmul.f32 %v4861_v20, %v282_v22  ;;  %v1641_v22 = vmul.f32 %v4904_v8, %v1482_v9 }
 0x175   :  { %v541_v13 = vadd.f32 %v4879_v5, %v471_v44 }
 0x177   :  { %4092 = vset.pattern.permute.xlu1 %v6799_v17  ;;  %v1426_v51 = vpop.permute.xlu1 %1425  ;;  %v929_v12 = vadd.f32 %v865_v11, %v541_v13  ;;  %v1430_v13 = vpop.permute.xlu0 %1429 }
 0x178   :  { %v1627_v53 = vmul.f32 %v4904_v8, %v1426_v51  ;;  %306 = vperm.xlu1 %4092, %v6821_v24  }
 0x17a   :  { %v1691_v41 = vadd.f32 %v1627_v53, %v1303_v60  ;;  %v6825_v53 = vld [vmem:[#allocation17_spill] sm:$0xff] }
 0x17c   :  { %v1755_v49 = vmax.f32 %v1691_v41, 0.0  ;;  %311 = vperm.xlu1 %4092, %v4932_v37   ;;  %v702_v47 = vpop.permute.xlu1 %701  ;;  %v459_v41 = vmul.f32 %v4861_v20, %v6825_v53  ;;  %v5269_v53 = vld [vmem:[%s6731_s0 + $0x1a8] sm:$0xff] }
 0x17d   :  { %v864_v6 = vmul.f32 %v4874_v3, %v702_v47 }
 0x17e   :  { %v1809_v30 = vpack.c.bf16 %v1755_v49, %v1754_v15  ;;  %v528_v15 = vadd.f32 %v4879_v5, %v458_v63 }
 0x180   :  { %4093 = vset.pattern.permute.xlu1 %v6791_v16  ;;  %v654_v61 = vpop.permute.xlu1 %653  ;;  %2063 = vmatmul.mubr.bf16.gmra.mxu0 %v1809_v30 }
 0x181   :  { %1449 = vperm.xlu1 %4093, %v6817_v33   ;;  %2072 = vmatprep.mubr.bf16.mxu0 %v6799_v17  ;;  %v470_v33 = vmul.f32 %v4861_v20, %v277_v38  ;;  %v852_v49 = vmul.f32 %v4874_v3, %v654_v61  ;;  %v1241_v61 = vmul.f32 %v4891_v4, %v5083_v28 }
 0x183   :  { %v540_v50 = vadd.f32 %v4879_v5, %v470_v33 }
 0x184   :  { %v658_v57 = vpop.permute.xlu1 %657 }
 0x185   :  { %4094 = vset.pattern.permute.xlu1 %v6799_v17  ;;  %v928_v38 = vadd.f32 %v864_v6, %v540_v50  ;;  %v853_v32 = vmul.f32 %v4874_v3, %v658_v57  ;;  %v916_v6 = vadd.f32 %v852_v49, %v528_v15 }
 0x186   :  { %251 = vperm.xlu1 %4094, %v6822_v45  }
 0x187   :  { %v1316_v14 = vadd.f32 %v1252_v39, %v928_v38 }
 0x189   :  { %v1094_v25 = vpop.permute.xlu1 %1093 }
 0x18a   :  { %4095 = vset.pattern.permute.xlu1 %v6794_v0  ;;  %v1253_v27 = vmul.f32 %v4891_v4, %v1094_v25  ;;  %v529_v25 = vadd.f32 %v4879_v5, %v459_v41 }
 0x18b   :  { %725 = vperm.xlu1 %4095, %v6821_v24  }
 0x18c   :  { %v1317_v23 = vadd.f32 %v1253_v27, %v929_v12  ;;  %v917_v9 = vadd.f32 %v853_v32, %v529_v25 }
 0x18d   :  { %v1042_v52 = vpop.permute.xlu1 %1041 }
 0x18e   :  { %v1705_v51 = vadd.f32 %v1641_v22, %v1317_v23  ;;  %v1240_v11 = vmul.f32 %v4891_v4, %v1042_v52  ;;  %v1305_v52 = vadd.f32 %v1241_v61, %v917_v9  ;;  %v5248_v23 = vld [vmem:[%s6731_s0 + $0x178] sm:$0xff] }
 0x18f   :  { %677 = vperm.xlu1 %4095, %v4282_v35   ;;  %761 = vperm.xlu0 %4137, %v5248_v23  }
 0x190   :  { %v1769_v47 = vmax.f32 %v1705_v51, 0.0  ;;  %v1304_v50 = vadd.f32 %v1240_v11, %v916_v6  ;;  %v5260_v51 = vld [vmem:[%s6731_s0 + $0x190] sm:$0xff]  ;;  %v5283_v11 = vld [vmem:[%s6731_s0 + $0x1c0] sm:$0xff]  ;;  %v1254_v6 = vmul.f32 %v4891_v4, %v5094_v19 }
 0x192   :  { %v1478_v48 = vpop.permute.xlu1 %1477 }
 0x193   :  { %v1640_v60 = vmul.f32 %v4904_v8, %v1478_v48  ;;  %681 = vperm.xlu1 %4095, %v6822_v45   ;;  %v6826_v48 = vld [vmem:[#allocation26_spill] sm:$0xff]  ;;  %773 = vperm.xlu0 %4137, %v5260_v51  }
 0x195   :  { %v1704_v40 = vadd.f32 %v1640_v60, %v1316_v14 }
 0x197   :  { %v1768_v30 = vmax.f32 %v1704_v40, 0.0  ;;  %4096 = vset.pattern.permute.xlu1 %v6789_v31  ;;  %v287_v44 = vpop.permute.xlu1 %286  ;;  %v6827_v40 = vld [vmem:[#allocation27_spill] sm:$0xff]  ;;  %785 = vperm.xlu0 %4137, %v5269_v53  }
 0x198   :  { %1117 = vperm.xlu1 %4096, %v4932_v37   ;;  %v1628_v37 = vmul.f32 %v4904_v8, %v1430_v13  ;;  %v472_v15 = vmul.f32 %v4861_v20, %v287_v44 }
 0x199   :  { %v1816_v33 = vpack.c.bf16 %v1769_v47, %v1768_v30 }
 0x19a   :  { %v1692_v12 = vadd.f32 %v1628_v37, %v1304_v50  ;;  %v542_v44 = vadd.f32 %v4879_v5, %v472_v15  ;;  %v4283_v50 = vld [vmem:[%s6731_s0 + $0xe0] sm:$0xff]  ;;  %v5296_v37 = vld [vmem:[%s6731_s0 + $0x1d8] sm:$0xff] }
 0x19b   :  { %v292_v27 = vpop.permute.xlu1 %291  ;;  %2133 = vmatmul.mubr.bf16.vlgmr.msra.gmra.mxu1 %v1816_v33  ;;  %v1490_v33 = vpop.permute.xlu0 %1489  ;;  %797 = vperm.xlu0 %4137, %v5283_v11  }
 0x19c   :  { %1065 = vperm.xlu1 %4096, %v4282_v35   ;;  %2142 = vmatprep.mubr.bf16.mxu1 %v6799_v17  ;;  %v1756_v28 = vmax.f32 %v1692_v12, 0.0  ;;  %v473_v60 = vmul.f32 %v4861_v20, %v292_v27  ;;  %v1643_v9 = vmul.f32 %v4904_v8, %v1490_v33 }
 0x19e   :  { %v543_v49 = vadd.f32 %v4879_v5, %v473_v60 }
 0x19f   :  { %809 = vperm.xlu0 %4137, %v5296_v37  }
 0x1a0   :  { %4097 = vset.pattern.permute.xlu1 %v6791_v16  ;;  %v1434_v57 = vpop.permute.xlu1 %1433 }
 0x1a1   :  { %v1629_v39 = vmul.f32 %v4904_v8, %v1434_v57  ;;  %1501 = vperm.xlu1 %4097, %v6821_v24   ;;  %v6829_v57 = vld [vmem:[#allocation33_spill] sm:$0xff] }
 0x1a2   :  { %v460_v12 = vmul.f32 %v4861_v20, %v6829_v57 }
 0x1a3   :  { %v1693_v38 = vadd.f32 %v1629_v39, %v1305_v52  ;;  %4144 = vset.pattern.permute.xlu0 %v6799_v17 }
 0x1a4   :  { %361 = vperm.xlu0 %4144, %v5041_v42  }
 0x1a5   :  { %v1757_v22 = vmax.f32 %v1693_v38, 0.0  ;;  %4098 = vset.pattern.permute.xlu1 %v6799_v17  ;;  %v232_v35 = vpop.permute.xlu1 %231 }
 0x1a6   :  { %316 = vperm.xlu1 %4098, %v6826_v48  }
 0x1a7   :  { %v1810_v2 = vpack.c.bf16 %v1757_v22, %v1756_v28  ;;  %v530_v22 = vadd.f32 %v4879_v5, %v460_v12 }
 0x1a8   :  { %376 = vperm.xlu0 %4144, %v5055_v62  }
 0x1a9   :  { %2073 = vmatmul.mubr.bf16.gmra.mxu0 %v1810_v2  ;;  %v461_v2 = vmul.f32 %v4861_v20, %v232_v35 }
 0x1aa   :  { %321 = vperm.xlu1 %4098, %v4964_v56   ;;  %v710_v24 = vpop.permute.xlu1 %709  ;;  %2082 = vmatprep.mubr.bf16.mxu0 %v6799_v17 }
 0x1ab   :  { %v866_v30 = vmul.f32 %v4874_v3, %v710_v24 }
 0x1ac   :  { %391 = vperm.xlu0 %4144, %v5070_v7  }
 0x1ad   :  { %v930_v27 = vadd.f32 %v866_v30, %v542_v44 }
 0x1ae   :  { %4099 = vset.pattern.permute.xlu1 %v6791_v16  ;;  %v662_v63 = vpop.permute.xlu1 %661 }
 0x1af   :  { %1457 = vperm.xlu1 %4099, %v6822_v45   ;;  %v6828_v45 = vld [vmem:[#allocation19_spill] sm:$0xff]  ;;  %v1318_v39 = vadd.f32 %v1254_v6, %v930_v27  ;;  %v854_v24 = vmul.f32 %v4874_v3, %v662_v63  ;;  %v1243_v63 = vmul.f32 %v4891_v4, %v5099_v18  ;;  %v4284_v6 = vld [vmem:[%s6731_s0 + $0x140] sm:$0xff] }
 0x1b0   :  { %v867_v41 = vmul.f32 %v4874_v3, %v6828_v45 }
 0x1b1   :  { %v918_v35 = vadd.f32 %v854_v24, %v530_v22 }
 0x1b2   :  { %v666_v14 = vpop.permute.xlu1 %665  ;;  %v931_v13 = vadd.f32 %v867_v41, %v543_v49 }
 0x1b3   :  { %4100 = vset.pattern.permute.xlu1 %v6799_v17 }
 0x1b4   :  { %261 = vperm.xlu1 %4100, %v6827_v40  }
 0x1b7   :  { %v1102_v47 = vpop.permute.xlu1 %1101 }
 0x1b8   :  { %4101 = vset.pattern.permute.xlu1 %v6794_v0  ;;  %v1255_v32 = vmul.f32 %v4891_v4, %v1102_v47  ;;  %v531_v47 = vadd.f32 %v4879_v5, %v461_v2  ;;  %v6830_v2 = vld [vmem:[#allocation20_spill] sm:$0xff] }
 0x1b9   :  { %733 = vperm.xlu1 %4101, %v6826_v48   ;;  %v1438_v48 = vpop.permute.xlu0 %1437  ;;  %v869_v24 = vmul.f32 %v4874_v3, %v6830_v2 }
 0x1ba   :  { %v1319_v61 = vadd.f32 %v1255_v32, %v931_v13 }
 0x1bb   :  { %v1050_v25 = vpop.permute.xlu1 %1049 }
 0x1bc   :  { %v1707_v52 = vadd.f32 %v1643_v9, %v1319_v61  ;;  %v1242_v15 = vmul.f32 %v4891_v4, %v1050_v25 }
 0x1bd   :  { %685 = vperm.xlu1 %4101, %v4283_v50   ;;  %v1498_v42 = vpop.permute.xlu0 %1497 }
 0x1be   :  { %v1771_v60 = vmax.f32 %v1707_v52, 0.0  ;;  %v1306_v32 = vadd.f32 %v1242_v15, %v918_v35  ;;  %v5366_v35 = vld [vmem:[%s6733_s2] ss:$0 sm:$0xff] }
 0x1c0   :  { %v1486_v19 = vpop.permute.xlu1 %1485 }
 0x1c1   :  { %v1642_v38 = vmul.f32 %v4904_v8, %v1486_v19  ;;  %689 = vperm.xlu1 %4101, %v6827_v40   ;;  %v855_v40 = vmul.f32 %v4874_v3, %v666_v14  ;;  %v1630_v14 = vmul.f32 %v4904_v8, %v1438_v48  ;;  %v5319_v33 = vpop.permute.xlu0 %1445  ;;  %v5350_v48 = vld [vmem:[%s6731_s0 + $0xf8] sm:$0xff] }
 0x1c3   :  { %v1706_v28 = vadd.f32 %v1642_v38, %v1318_v39  ;;  %v1694_v44 = vadd.f32 %v1630_v14, %v1306_v32  ;;  %v4286_v39 = vld [vmem:[%s6731_s0 + $0xe8] sm:$0xff] }
 0x1c5   :  { %v1770_v45 = vmax.f32 %v1706_v28, 0.0  ;;  %4102 = vset.pattern.permute.xlu1 %v6789_v31  ;;  %v297_v41 = vpop.permute.xlu1 %296  ;;  %v1758_v27 = vmax.f32 %v1694_v44, 0.0  ;;  %v5327_v9 = vpop.permute.xlu0 %1505 }
 0x1c6   :  { %1125 = vperm.xlu1 %4102, %v4964_v56   ;;  %v919_v56 = vadd.f32 %v855_v40, %v531_v47 }
 0x1c7   :  { %v1817_v49 = vpack.c.bf16 %v1771_v60, %v1770_v45  ;;  %v474_v60 = vmul.f32 %v4861_v20, %v297_v41 }
 0x1c8   :  { %v1307_v13 = vadd.f32 %v1243_v63, %v919_v56  ;;  %v1256_v63 = vmul.f32 %v4891_v4, %v5105_v36  ;;  %v1645_v56 = vmul.f32 %v4904_v8, %v1498_v42 }
 0x1c9   :  { %v302_v30 = vpop.permute.xlu1 %301  ;;  %2143 = vmatmul.mubr.bf16.gmra.mxu1 %v1817_v49  ;;  %v5337_v19 = vpop.permute.xlu0 %1453  ;;  %v544_v41 = vadd.f32 %v5366_v35, %v474_v60 }
 0x1ca   :  { %1073 = vperm.xlu1 %4102, %v4283_v50   ;;  %2152 = vmatprep.mubr.bf16.mxu1 %v6799_v17  ;;  %v5332_v50 = vld [vmem:[%s6731_s0 + $0x150] sm:$0xff]  ;;  %v475_v22 = vmul.f32 %v4861_v20, %v302_v30 }
 0x1cc   :  { %v545_v45 = vadd.f32 %v4879_v5, %v475_v22 }
 0x1cd   :  { %v5343_v38 = vpop.permute.xlu0 %1513 }
 0x1ce   :  { %4103 = vset.pattern.permute.xlu1 %v6791_v16  ;;  %v1442_v62 = vpop.permute.xlu1 %1441  ;;  %v933_v30 = vadd.f32 %v869_v24, %v545_v45 }
 0x1cf   :  { %v1631_v25 = vmul.f32 %v4904_v8, %v1442_v62  ;;  %1509 = vperm.xlu1 %4103, %v4284_v6   ;;  %v4289_v62 = vld [vmem:[%s6731_s0 + $0xf0] sm:$0xff] }
 0x1d1   :  { %v1695_v18 = vadd.f32 %v1631_v25, %v1307_v13  ;;  %v5357_v15 = vpop.permute.xlu0 %1461  ;;  %v6831_v13 = vld [vmem:[#allocation34_spill] sm:$0xff] }
 0x1d2   :  { %v462_v25 = vmul.f32 %v4861_v20, %v6831_v13 }
 0x1d3   :  { %v1759_v61 = vmax.f32 %v1695_v18, 0.0  ;;  %4104 = vset.pattern.permute.xlu1 %v6799_v17  ;;  %v242_v7 = vpop.permute.xlu1 %241 }
 0x1d4   :  { %326 = vperm.xlu1 %4104, %v5332_v50   ;;  %v532_v42 = vadd.f32 %v5366_v35, %v462_v25 }
 0x1d5   :  { %v1811_v57 = vpack.c.bf16 %v1759_v61, %v1758_v27  ;;  %v5375_v44 = vpop.permute.xlu0 %1521 }
 0x1d7   :  { %2083 = vmatmul.mubr.bf16.gmra.mxu0 %v1811_v57 }
 0x1d8   :  { %331 = vperm.xlu1 %4104, %v4994_v58   ;;  %v718_v12 = vpop.permute.xlu1 %717  ;;  %2092 = vmatprep.mubr.bf16.mxu0 %v6799_v17 }
 0x1d9   :  { %v868_v49 = vmul.f32 %v4874_v3, %v718_v12  ;;  %v5382_v57 = vpop.permute.xlu0 %1469  ;;  %v463_v12 = vmul.f32 %v4861_v20, %v242_v7 }
 0x1db   :  { %v932_v32 = vadd.f32 %v868_v49, %v544_v41  ;;  %v533_v49 = vadd.f32 %v5366_v35, %v463_v12 }
 0x1dc   :  { %4105 = vset.pattern.permute.xlu1 %v6791_v16  ;;  %v670_v52 = vpop.permute.xlu1 %669 }
 0x1dd   :  { %1465 = vperm.xlu1 %4105, %v4286_v39   ;;  %v1320_v27 = vadd.f32 %v1256_v63, %v932_v32  ;;  %v856_v39 = vmul.f32 %v4874_v3, %v670_v52  ;;  %v5391_v7 = vpop.permute.xlu0 %1533  ;;  %v1245_v52 = vmul.f32 %v4891_v4, %v5110_v59 }
 0x1e0   :  { %v674_v28 = vpop.permute.xlu1 %673 }
 0x1e1   :  { %4106 = vset.pattern.permute.xlu1 %v6799_v17  ;;  %v857_v60 = vmul.f32 %v4874_v3, %v674_v28 }
 0x1e2   :  { %271 = vperm.xlu1 %4106, %v5350_v48  }
 0x1e3   :  { %v921_v28 = vadd.f32 %v857_v60, %v533_v49 }
 0x1e5   :  { %v1110_v40 = vpop.permute.xlu1 %1109 }
 0x1e6   :  { %4107 = vset.pattern.permute.xlu1 %v6794_v0  ;;  %v1257_v47 = vmul.f32 %v4891_v4, %v1110_v40 }
 0x1e7   :  { %741 = vperm.xlu1 %4107, %v5332_v50  }
 0x1e8   :  { %v1321_v14 = vadd.f32 %v1257_v47, %v933_v30  ;;  %v920_v47 = vadd.f32 %v856_v39, %v532_v42  ;;  %v5430_v39 = vld [vmem:[%s6731_s0 + $0x1b0] sm:$0xff] }
 0x1e9   :  { %v1058_v5 = vpop.permute.xlu1 %1057 }
 0x1ea   :  { %v1709_v18 = vadd.f32 %v1645_v56, %v1321_v14  ;;  %v1244_v45 = vmul.f32 %v4891_v4, %v1058_v5  ;;  %v1309_v56 = vadd.f32 %v1245_v52, %v921_v28  ;;  %v5401_v14 = vpop.permute.xlu0 %1545  ;;  %v1647_v28 = vmul.f32 %v4904_v8, %v5327_v9 }
 0x1eb   :  { %693 = vperm.xlu1 %4107, %v4289_v62  }
 0x1ec   :  { %v1773_v24 = vmax.f32 %v1709_v18, 0.0  ;;  %v1308_v30 = vadd.f32 %v1244_v45, %v920_v47  ;;  %v5410_v18 = vld [vmem:[%s6731_s0 + $0x1d0] sm:$0xff] }
 0x1ed   :  { %406 = vperm.xlu0 %4144, %v5410_v18  }
 0x1ee   :  { %v1494_v6 = vpop.permute.xlu1 %1493 }
 0x1ef   :  { %v1644_v61 = vmul.f32 %v4904_v8, %v1494_v6  ;;  %697 = vperm.xlu1 %4107, %v5350_v48   ;;  %v5405_v6 = vpop.permute.xlu0 %1557 }
 0x1f1   :  { %v1708_v36 = vadd.f32 %v1644_v61, %v1320_v27  ;;  %v5420_v61 = vld [vmem:[%s6731_s0 + $0x1e8] sm:$0xff] }
 0x1f2   :  { %421 = vperm.xlu0 %4144, %v5420_v61  }
 0x1f3   :  { %v1772_v22 = vmax.f32 %v1708_v36, 0.0  ;;  %4108 = vset.pattern.permute.xlu1 %v6789_v31  ;;  %v307_v2 = vpop.permute.xlu1 %306  ;;  %v5422_v36 = vpop.permute.xlu0 %1569 }
 0x1f4   :  { %1133 = vperm.xlu1 %4108, %v4994_v58   ;;  %v1632_v58 = vmul.f32 %v4904_v8, %v5319_v33  ;;  %v476_v60 = vmul.f32 %v4861_v20, %v307_v2  ;;  %v1258_v2 = vmul.f32 %v4891_v4, %v5121_v29 }
 0x1f5   :  { %v1818_v40 = vpack.c.bf16 %v1773_v24, %v1772_v22 }
 0x1f6   :  { %v1696_v63 = vadd.f32 %v1632_v58, %v1308_v30  ;;  %4148 = vset.pattern.permute.xlu0 %v6789_v31 }
 0x1f7   :  { %v312_v41 = vpop.permute.xlu1 %311  ;;  %2153 = vmatmul.mubr.bf16.gmra.mxu1 %v1818_v40  ;;  %1177 = vperm.xlu0 %4148, %v5430_v39   ;;  %v730_v24 = vpop.permute.xlu0 %729 }
 0x1f8   :  { %1081 = vperm.xlu1 %4108, %v4289_v62   ;;  %2162 = vmatprep.mubr.bf16.mxu1 %v6799_v17  ;;  %v1760_v25 = vmax.f32 %v1696_v63, 0.0  ;;  %v477_v22 = vmul.f32 %v4861_v20, %v312_v41  ;;  %v871_v45 = vmul.f32 %v4874_v3, %v730_v24  ;;  %v546_v41 = vadd.f32 %v5366_v35, %v476_v60  ;;  %v6832_v63 = vld [vmem:[#allocation36_spill] sm:$0xff] }
 0x1fc   :  { %4109 = vset.pattern.permute.xlu1 %v6791_v16  ;;  %v1450_v5 = vpop.permute.xlu1 %1449 }
 0x1fd   :  { %v1633_v32 = vmul.f32 %v4904_v8, %v1450_v5  ;;  %1517 = vperm.xlu1 %4109, %v5332_v50   ;;  %v4290_v50 = vld [vmem:[%s6731_s0 + $0x168] sm:$0xff] }
 0x1ff   :  { %v1697_v62 = vadd.f32 %v1633_v32, %v1309_v56  ;;  %v464_v56 = vmul.f32 %v4861_v20, %v6832_v63 }
 0x201   :  { %v1761_v13 = vmax.f32 %v1697_v62, 0.0  ;;  %4110 = vset.pattern.permute.xlu1 %v6799_v17  ;;  %v252_v59 = vpop.permute.xlu1 %251  ;;  %v534_v29 = vadd.f32 %v5366_v35, %v464_v56 }
 0x202   :  { %336 = vperm.xlu1 %4110, %v5204_v55   ;;  %v465_v9 = vmul.f32 %v4861_v20, %v252_v59 }
 0x203   :  { %v1812_v33 = vpack.c.bf16 %v1761_v13, %v1760_v25 }
 0x204   :  { %v535_v59 = vadd.f32 %v5366_v35, %v465_v9 }
 0x205   :  { %2093 = vmatmul.mubr.bf16.gmra.mxu0 %v1812_v33 }
 0x206   :  { %341 = vperm.xlu1 %4110, %v4290_v50   ;;  %v726_v27 = vpop.permute.xlu1 %725  ;;  %2102 = vmatprep.mubr.bf16.mxu0 %v6799_v17 }
 0x207   :  { %v870_v49 = vmul.f32 %v4874_v3, %v726_v27 }
 0x209   :  { %v934_v30 = vadd.f32 %v870_v49, %v546_v41  ;;  %v1634_v49 = vmul.f32 %v4904_v8, %v5337_v19 }
 0x20a   :  { %4111 = vset.pattern.permute.xlu1 %v6791_v16  ;;  %v678_v42 = vpop.permute.xlu1 %677 }
 0x20b   :  { %1473 = vperm.xlu1 %4111, %v5350_v48   ;;  %v547_v48 = vadd.f32 %v5366_v35, %v477_v22  ;;  %v1322_v13 = vadd.f32 %v1258_v2, %v934_v30  ;;  %v858_v27 = vmul.f32 %v4874_v3, %v678_v42 }
 0x20d   :  { %v935_v52 = vadd.f32 %v871_v45, %v547_v48  ;;  %v922_v42 = vadd.f32 %v858_v27, %v534_v29  ;;  %v738_v29 = vpop.permute.xlu0 %737 }
 0x20e   :  { %v682_v12 = vpop.permute.xlu1 %681 }
 0x20f   :  { %4112 = vset.pattern.permute.xlu1 %v6794_v0 }
 0x210   :  { %753 = vperm.xlu1 %4112, %v4290_v50  }
 0x213   :  { %v1118_v40 = vpop.permute.xlu1 %1117 }
 0x214   :  { %4113 = vset.pattern.permute.xlu1 %v6789_v31  ;;  %v1259_v47 = vmul.f32 %v4891_v4, %v1118_v40 }
 0x215   :  { %1137 = vperm.xlu1 %4113, %v5204_v55  }
 0x216   :  { %v1323_v5 = vadd.f32 %v1259_v47, %v935_v52  ;;  %v4291_v52 = vld [vmem:[%s6731_s0 + $0x170] sm:$0xff] }
 0x217   :  { %v1066_v58 = vpop.permute.xlu1 %1065 }
 0x218   :  { %v1711_v62 = vadd.f32 %v1647_v28, %v1323_v5  ;;  %v1246_v48 = vmul.f32 %v4891_v4, %v1066_v58 }
 0x219   :  { %4114 = vset.pattern.permute.xlu1 %v6791_v16 }
 0x21a   :  { %1525 = vperm.xlu1 %4114, %v5204_v55   ;;  %v1775_v60 = vmax.f32 %v1711_v62, 0.0  ;;  %v859_v55 = vmul.f32 %v4874_v3, %v682_v12  ;;  %v1247_v12 = vmul.f32 %v4891_v4, %v5130_v34  ;;  %v1310_v41 = vadd.f32 %v1246_v48, %v922_v42 }
 0x21c   :  { %v1502_v32 = vpop.permute.xlu1 %1501  ;;  %v923_v47 = vadd.f32 %v859_v55, %v535_v59  ;;  %v1698_v2 = vadd.f32 %v1634_v49, %v1310_v41 }
 0x21d   :  { %v1646_v25 = vmul.f32 %v4904_v8, %v1502_v32 }
 0x21e   :  { %1529 = vperm.xlu1 %4114, %v4290_v50   ;;  %v5463_v50 = vld [vmem:[%s6731_s0 + $0x1c8] sm:$0xff]  ;;  %v1311_v28 = vadd.f32 %v1247_v12, %v923_v47  ;;  %v1762_v63 = vmax.f32 %v1698_v2, 0.0  ;;  %v1649_v12 = vmul.f32 %v4904_v8, %v5343_v38 }
 0x21f   :  { %v1710_v33 = vadd.f32 %v1646_v25, %v1322_v13  ;;  %1189 = vperm.xlu0 %4148, %v5463_v50   ;;  %v4292_v13 = vld [vmem:[%s6731_s0 + $0x180] sm:$0xff] }
 0x221   :  { %v1774_v22 = vmax.f32 %v1710_v33, 0.0  ;;  %v317_v24 = vpop.permute.xlu1 %316 }
 0x222   :  { %4116 = vset.pattern.permute.xlu1 %v6799_v17  ;;  %v478_v9 = vmul.f32 %v4861_v20, %v317_v24  ;;  %v4293_v24 = vld [vmem:[%s6731_s0 + $0x188] sm:$0xff] }
 0x223   :  { %351 = vperm.xlu1 %4116, %v5248_v23   ;;  %v1819_v45 = vpack.c.bf16 %v1775_v60, %v1774_v22  ;;  %v5494_v60 = vld [vmem:[%s6731_s0 + $0x1e0] sm:$0xff] }
 0x224   :  { %1201 = vperm.xlu0 %4148, %v5494_v60  }
 0x225   :  { %v322_v40 = vpop.permute.xlu1 %321  ;;  %2163 = vmatmul.mubr.bf16.gmra.mxu1 %v1819_v45  ;;  %v548_v45 = vadd.f32 %v5366_v35, %v478_v9 }
 0x226   :  { %2172 = vmatprep.mubr.bf16.mxu1 %v6799_v17  ;;  %v479_v33 = vmul.f32 %v4861_v20, %v322_v40  ;;  %v1260_v40 = vmul.f32 %v4891_v4, %v5134_v43  ;;  %v6833_v43 = vld [vmem:[#allocation38_spill] sm:$0xff] }
 0x227   :  { %4117 = vset.pattern.permute.xlu1 %v6794_v0 }
 0x228   :  { %757 = vperm.xlu1 %4117, %v4291_v52   ;;  %v549_v27 = vadd.f32 %v5366_v35, %v479_v33  ;;  %4150 = vset.pattern.permute.xlu0 %v6791_v16 }
 0x229   :  { %1581 = vperm.xlu0 %4150, %v5410_v18  }
 0x22a   :  { %v1458_v58 = vpop.permute.xlu1 %1457 }
 0x22b   :  { %v1635_v30 = vmul.f32 %v4904_v8, %v1458_v58 }
 0x22c   :  { %4118 = vset.pattern.permute.xlu1 %v6789_v31 }
 0x22d   :  { %v1699_v34 = vadd.f32 %v1635_v30, %v1311_v28  ;;  %1145 = vperm.xlu1 %4118, %v4291_v52   ;;  %1593 = vperm.xlu0 %4150, %v5420_v61   ;;  %v466_v28 = vmul.f32 %v4861_v20, %v6833_v43 }
 0x22f   :  { %v1763_v5 = vmax.f32 %v1699_v34, 0.0  ;;  %v262_v19 = vpop.permute.xlu1 %261 }
 0x230   :  { %v467_v30 = vmul.f32 %v4861_v20, %v262_v19 }
 0x231   :  { %1149 = vperm.xlu1 %4118, %v5248_v23   ;;  %v1813_v56 = vpack.c.bf16 %v1763_v5, %v1762_v63  ;;  %4154 = vset.pattern.permute.xlu0 %v6794_v0 }
 0x233   :  { %2103 = vmatmul.mubr.bf16.gmra.mxu0 %v1813_v56 }
 0x234   :  { %v734_v32 = vpop.permute.xlu1 %733  ;;  %2112 = vmatprep.mubr.bf16.mxu0 %v6799_v17 }
 0x235   :  { %4119 = vset.pattern.permute.xlu1 %v6791_v16  ;;  %v872_v55 = vmul.f32 %v4874_v3, %v734_v32  ;;  %v536_v32 = vadd.f32 %v5366_v35, %v466_v28 }
 0x236   :  { %1537 = vperm.xlu1 %4119, %v5248_v23   ;;  %v873_v23 = vmul.f32 %v4874_v3, %v738_v29 }
 0x237   :  { %v936_v49 = vadd.f32 %v872_v55, %v548_v45  ;;  %v4294_v55 = vld [vmem:[%s6731_s0 + $0x198] sm:$0xff] }
 0x238   :  { %v686_v62 = vpop.permute.xlu1 %685  ;;  %v937_v59 = vadd.f32 %v873_v23, %v549_v27 }
 0x239   :  { %v1324_v58 = vadd.f32 %v1260_v40, %v936_v49  ;;  %v860_v34 = vmul.f32 %v4874_v3, %v686_v62  ;;  %v1249_v62 = vmul.f32 %v4891_v4, %v5139_v21 }
 0x23a   :  { %4120 = vset.pattern.permute.xlu1 %v6799_v17 }
 0x23b   :  { %356 = vperm.xlu1 %4120, %v4292_v13   ;;  %v924_v27 = vadd.f32 %v860_v34, %v536_v32 }
 0x23c   :  { %v690_v25 = vpop.permute.xlu1 %689 }
 0x23d   :  { %v861_v33 = vmul.f32 %v4874_v3, %v690_v25  ;;  %v1636_v25 = vmul.f32 %v4904_v8, %v5357_v15 }
 0x23f   :  { %4121 = vset.pattern.permute.xlu1 %v6794_v0 }
 0x240   :  { %765 = vperm.xlu1 %4121, %v4292_v13  }
 0x241   :  { %v1126_v22 = vpop.permute.xlu1 %1125 }
 0x242   :  { %v1261_v48 = vmul.f32 %v4891_v4, %v1126_v22 }
 0x244   :  { %769 = vperm.xlu1 %4121, %v4293_v24   ;;  %v1325_v47 = vadd.f32 %v1261_v48, %v937_v59 }
 0x245   :  { %v1074_v42 = vpop.permute.xlu1 %1073 }
 0x246   :  { %v1713_v52 = vadd.f32 %v1649_v12, %v1325_v47  ;;  %v1248_v29 = vmul.f32 %v4891_v4, %v1074_v42 }
 0x248   :  { %4122 = vset.pattern.permute.xlu1 %v6789_v31  ;;  %v1777_v56 = vmax.f32 %v1713_v52, 0.0  ;;  %v1312_v22 = vadd.f32 %v1248_v29, %v924_v27  ;;  %v1262_v29 = vmul.f32 %v4891_v4, %v5147_v10 }
 0x249   :  { %1157 = vperm.xlu1 %4122, %v4293_v24  }
 0x24a   :  { %v1510_v41 = vpop.permute.xlu1 %1509  ;;  %v1700_v24 = vadd.f32 %v1636_v25, %v1312_v22  ;;  %v6834_v22 = vld [vmem:[#allocation39_spill] sm:$0xff] }
 0x24b   :  { %v1648_v2 = vmul.f32 %v4904_v8, %v1510_v41 }
 0x24c   :  { %v1764_v12 = vmax.f32 %v1700_v24, 0.0 }
 0x24d   :  { %v1712_v38 = vadd.f32 %v1648_v2, %v1324_v58  ;;  %4123 = vset.pattern.permute.xlu1 %v6791_v16  ;;  %v5543_v58 = vld [vmem:[%s6731_s0 + $0x1f0] sm:$0xff]  ;;  %v746_v2 = vpop.permute.xlu0 %745 }
 0x24e   :  { %1541 = vperm.xlu1 %4123, %v4292_v13   ;;  %v537_v13 = vadd.f32 %v5366_v35, %v467_v30  ;;  %821 = vperm.xlu0 %4154, %v5543_v58   ;;  %v5554_v30 = vld [vmem:[%s6731_s0 + $0x1f8] sm:$0xff] }
 0x24f   :  { %v1776_v5 = vmax.f32 %v1712_v38, 0.0  ;;  %v327_v63 = vpop.permute.xlu1 %326 }
 0x250   :  { %v925_v23 = vadd.f32 %v861_v33, %v537_v13  ;;  %v480_v43 = vmul.f32 %v4861_v20, %v327_v63  ;;  %v4295_v33 = vld [vmem:[%s6731_s0 + $0x1a0] sm:$0xff] }
 0x251   :  { %v1820_v9 = vpack.c.bf16 %v1777_v56, %v1776_v5 }
 0x252   :  { %4124 = vset.pattern.permute.xlu1 %v6799_v17  ;;  %v1313_v45 = vadd.f32 %v1249_v62, %v925_v23  ;;  %4157 = vset.pattern.permute.xlu0 %v6789_v31  ;;  %v550_v63 = vadd.f32 %v5366_v35, %v480_v43 }
 0x253   :  { %366 = vperm.xlu1 %4124, %v5260_v51   ;;  %v332_v19 = vpop.permute.xlu1 %331  ;;  %2173 = vmatmul.mubr.bf16.gmra.mxu1 %v1820_v9  ;;  %v1651_v9 = vmul.f32 %v4904_v8, %v5375_v44 }
 0x254   :  { %2182 = vmatprep.mubr.bf16.mxu1 %v6799_v17  ;;  %v481_v52 = vmul.f32 %v4861_v20, %v332_v19  ;;  %1213 = vperm.xlu0 %4157, %v5554_v30  }
 0x256   :  { %v551_v28 = vadd.f32 %v5366_v35, %v481_v52 }
 0x257   :  { %371 = vperm.xlu1 %4124, %v4294_v55  }
 0x258   :  { %v1466_v48 = vpop.permute.xlu1 %1465  ;;  %4159 = vset.pattern.permute.xlu0 %v6791_v16 }
 0x259   :  { %v1637_v59 = vmul.f32 %v4904_v8, %v1466_v48 }
 0x25b   :  { %v1701_v42 = vadd.f32 %v1637_v59, %v1313_v45  ;;  %4125 = vset.pattern.permute.xlu1 %v6794_v0 }
 0x25c   :  { %777 = vperm.xlu1 %4125, %v4294_v55  }
 0x25d   :  { %v1765_v21 = vmax.f32 %v1701_v42, 0.0  ;;  %v272_v40 = vpop.permute.xlu1 %271 }
 0x25e   :  { %v469_v10 = vmul.f32 %v4861_v20, %v272_v40 }
 0x25f   :  { %v1814_v15 = vpack.c.bf16 %v1765_v21, %v1764_v12 }
 0x260   :  { %4126 = vset.pattern.permute.xlu1 %v6789_v31 }
 0x261   :  { %1161 = vperm.xlu1 %4126, %v5260_v51   ;;  %2113 = vmatmul.mubr.bf16.gmra.mxu0 %v1814_v15 }
 0x262   :  { %v742_v49 = vpop.permute.xlu1 %741  ;;  %2122 = vmatprep.mubr.bf16.mxu0 %v6799_v17 }
 0x263   :  { %v874_v34 = vmul.f32 %v4874_v3, %v742_v49  ;;  %v539_v49 = vadd.f32 %v5366_v35, %v469_v10 }
 0x265   :  { %4128 = vset.pattern.permute.xlu1 %v6791_v16  ;;  %v938_v13 = vadd.f32 %v874_v34, %v550_v63 }
 0x266   :  { %1549 = vperm.xlu1 %4128, %v5260_v51   ;;  %v694_v47 = vpop.permute.xlu1 %693  ;;  %v875_v51 = vmul.f32 %v4874_v3, %v746_v2 }
 0x267   :  { %v1326_v25 = vadd.f32 %v1262_v29, %v938_v13  ;;  %v862_v44 = vmul.f32 %v4874_v3, %v694_v47  ;;  %v1251_v47 = vmul.f32 %v4891_v4, %v5155_v54  ;;  %v750_v29 = vpop.permute.xlu0 %749  ;;  %v4296_v13 = vld [vmem:[%s6731_s0 + $0x1b8] sm:$0xff] }
 0x268   :  { %v939_v56 = vadd.f32 %v875_v51, %v551_v28 }
 0x26a   :  { %1553 = vperm.xlu1 %4128, %v4294_v55   ;;  %v698_v41 = vpop.permute.xlu1 %697  ;;  %v468_v55 = vmul.f32 %v4861_v20, %v6834_v22 }
 0x26b   :  { %v863_v21 = vmul.f32 %v4874_v3, %v698_v41  ;;  %v1638_v41 = vmul.f32 %v4904_v8, %v5382_v57 }
 0x26c   :  { %v538_v42 = vadd.f32 %v5366_v35, %v468_v55 }
 0x26d   :  { %v927_v2 = vadd.f32 %v863_v21, %v539_v49  ;;  %v4189_v49 = vld [vmem:[%s6736_s5 + $0x64] ss:$8 sps:$4 sm:$0xff]  }
 0x26e   :  { %4129 = vset.pattern.permute.xlu1 %v6799_v17  ;;  %v926_v52 = vadd.f32 %v862_v44, %v538_v42 }
 0x26f   :  { %381 = vperm.xlu1 %4129, %v5269_v53   ;;  %v1134_v38 = vpop.permute.xlu1 %1133 }
 0x270   :  { %v1263_v5 = vmul.f32 %v4891_v4, %v1134_v38  ;;  %v1315_v38 = vadd.f32 %v1251_v47, %v927_v2  ;;  %v762_v2 = vpop.permute.xlu0 %761 }
 0x272   :  { %v1327_v27 = vadd.f32 %v1263_v5, %v939_v56 }
 0x273   :  { %4130 = vset.pattern.permute.xlu1 %v6794_v0  ;;  %v1082_v32 = vpop.permute.xlu1 %1081 }
 0x274   :  { %781 = vperm.xlu1 %4130, %v4295_v33   ;;  %v1715_v62 = vadd.f32 %v1651_v9, %v1327_v27  ;;  %v1250_v12 = vmul.f32 %v4891_v4, %v1082_v32  ;;  %v4184_v32 = vld [vmem:[%s6736_s5 + $0x70] ss:$8 sps:$4 sm:$0xff]  }
 0x276   :  { %v1779_v59 = vmax.f32 %v1715_v62, 0.0  ;;  %v1314_v43 = vadd.f32 %v1250_v12, %v926_v52  ;;  %v876_v62 = vmul.f32 %v4874_v3, %v750_v29 }
 0x278   :  { %4131 = vset.pattern.permute.xlu1 %v6789_v31  ;;  %v1518_v19 = vpop.permute.xlu1 %1517  ;;  %v1702_v51 = vadd.f32 %v1638_v41, %v1314_v43 }
 0x279   :  { %v1650_v23 = vmul.f32 %v4904_v8, %v1518_v19  ;;  %1169 = vperm.xlu1 %4131, %v4295_v33   ;;  %v4186_v33 = vld [vmem:[%s6736_s5 + $0x74] ss:$8 sps:$4 sm:$0xff]  }
 0x27a   :  { %v1766_v54 = vmax.f32 %v1702_v51, 0.0  ;;  %2689 = vmatprep.subr.bf16.mxu1 %v4186_v33  ;;  %v4195_v33 = vld [vmem:[%s6736_s5 + $0x44] ss:$8 sps:$4 sm:$0xff]  }
 0x27b   :  { %v1714_v48 = vadd.f32 %v1650_v23, %v1326_v25  ;;  %2690 = vmatpush1.bf16.msra.mxu1 %v4184_v32  ;;  %v4193_v32 = vld [vmem:[%s6736_s5 + $0x40] ss:$8 sps:$4 sm:$0xff]  }
 0x27c   :  { %2691 = vmatprep.subr.bf16.mxu1 %v4189_v49 }
 0x27d   :  { %v1778_v24 = vmax.f32 %v1714_v48, 0.0  ;;  %1173 = vperm.xlu1 %4131, %v5269_v53   ;;  %v337_v45 = vpop.permute.xlu1 %336 }
 0x27e   :  { %v482_v56 = vmul.f32 %v4861_v20, %v337_v45 }
 0x27f   :  { %v1821_v15 = vpack.c.bf16 %v1779_v59, %v1778_v24  ;;  %v1265_v24 = vmul.f32 %v4891_v4, %v5162_v46  ;;  %v4190_v46 = vld [vmem:[%s6736_s5 + $0x50] ss:$8 sps:$4 sm:$0xff]  }
 0x280   :  { %v552_v19 = vadd.f32 %v5366_v35, %v482_v56 }
 0x281   :  { %4132 = vset.pattern.permute.xlu1 %v6791_v16  ;;  %v342_v40 = vpop.permute.xlu1 %341  ;;  %2183 = vmatmul.mubr.bf16.gmra.mxu1 %v1821_v15  ;;  %v4187_v15 = vld [vmem:[%s6736_s5 + $0x60] ss:$8 sps:$4 sm:$0xff]  }
 0x282   :  { %1561 = vperm.xlu1 %4132, %v5269_v53   ;;  %2192 = vmatprep.mubr.bf16.mxu1 %v6799_v17  ;;  %v483_v9 = vmul.f32 %v4861_v20, %v342_v40  ;;  %v940_v48 = vadd.f32 %v876_v62, %v552_v19  ;;  %v4192_v40 = vld [vmem:[%s6736_s5 + $0x54] ss:$8 sps:$4 sm:$0xff]   ;;  %v1654_v19 = vmul.f32 %v4904_v8, %v5391_v7 }
 0x283   :  { %2692 = vmatpush1.bf16.msra.mxu1 %v4187_v15  ;;  %v4198_v7 = vld [vmem:[%s6736_s5 + $0x34] ss:$8 sps:$4 sm:$0xff]   ;;  %v4201_v15 = vld [vmem:[%s6736_s5 + $0x24] ss:$8 sps:$4 sm:$0xff]  }
 0x284   :  { %v553_v23 = vadd.f32 %v5366_v35, %v483_v9  ;;  %2693 = vmatprep.subr.bf16.mxu1 %v4192_v40  ;;  %v879_v9 = vmul.f32 %v4874_v3, %v762_v2  ;;  %v4202_v40 = vld [vmem:[%s6736_s5 + $0x10] ss:$8 sps:$4 sm:$0xff]  }
 0x286   :  { %4133 = vset.pattern.permute.xlu1 %v6799_v17  ;;  %v1474_v28 = vpop.permute.xlu1 %1473 }
 0x287   :  { %v1639_v34 = vmul.f32 %v4904_v8, %v1474_v28  ;;  %386 = vperm.xlu1 %4133, %v5430_v39   ;;  %2694 = vmatpush1.bf16.msra.mxu1 %v4190_v46  ;;  %v5630_v28 = vpop.permute.xlu0 %773 }
 0x288   :  { %2695 = vmatprep.subr.bf16.mxu1 %v4195_v33 }
 0x289   :  { %v1703_v53 = vadd.f32 %v1639_v34, %v1315_v38  ;;  %v6835_v38 = vld [vmem:[#allocation40_spill] sm:$0xff] }
 0x28a   :  { %v484_v34 = vmul.f32 %v4861_v20, %v6835_v38 }
 0x28b   :  { %v1767_v5 = vmax.f32 %v1703_v53, 0.0  ;;  %4134 = vset.pattern.permute.xlu1 %v6794_v0  ;;  %v754_v63 = vpop.permute.xlu1 %753  ;;  %2696 = vmatpush1.bf16.msra.mxu1 %v4193_v32  ;;  %v1268_v32 = vmul.f32 %v4891_v4, %v5166_v1 }
 0x28c   :  { %789 = vperm.xlu1 %4134, %v5430_v39   ;;  %v877_v25 = vmul.f32 %v4874_v3, %v754_v63  ;;  %2697 = vmatprep.subr.bf16.mxu1 %v4198_v7 }
 0x28d   :  { %v1815_v57 = vpack.c.bf16 %v1767_v5, %v1766_v54  ;;  %v5640_v54 = vpop.permute.xlu0 %785 }
 0x28e   :  { %v941_v10 = vadd.f32 %v877_v25, %v553_v23 }
 0x28f   :  { %2123 = vmatmul.mubr.bf16.gmra.mxu0 %v1815_v57  ;;  %v554_v57 = vadd.f32 %v5366_v35, %v484_v34 }
 0x290   :  { %793 = vperm.xlu1 %4134, %v4296_v13   ;;  %v1138_v27 = vpop.permute.xlu1 %1137  ;;  %v1329_v21 = vadd.f32 %v1265_v24, %v941_v10  ;;  %v4196_v24 = vld [vmem:[%s6736_s5 + $0x30] ss:$8 sps:$4 sm:$0xff]  }
 0x291   :  { %v1264_v22 = vmul.f32 %v4891_v4, %v1138_v27  ;;  %v5657_v23 = vpop.permute.xlu0 %797  ;;  %2698 = vmatpush1.bf16.msra.mxu1 %v4196_v24 }
 0x292   :  { %2699 = vmatprep.subr.bf16.mxu1 %v4201_v15  ;;  %v4216_v15 = vld [vmem:[%s6736_s5 + $0xd4] ss:$8 sps:$4 sm:$0xff]  }
 0x293   :  { %v1328_v45 = vadd.f32 %v1264_v22, %v940_v48 }
 0x294   :  { %4135 = vset.pattern.permute.xlu1 %v6789_v31 }
 0x295   :  { %1181 = vperm.xlu1 %4135, %v4296_v13   ;;  %v1526_v55 = vpop.permute.xlu1 %1525 }
 0x296   :  { %v1652_v44 = vmul.f32 %v4904_v8, %v1526_v55 }
 0x298   :  { %v1716_v42 = vadd.f32 %v1652_v44, %v1328_v45 }
 0x299   :  { %4136 = vset.pattern.permute.xlu1 %v6791_v16  ;;  %v1530_v59 = vpop.permute.xlu1 %1529 }
 0x29a   :  { %v1653_v12 = vmul.f32 %v4904_v8, %v1530_v59  ;;  %1565 = vperm.xlu1 %4136, %v5430_v39   ;;  %v1780_v39 = vmax.f32 %v1716_v42, 0.0  ;;  %v5668_v59 = vpop.permute.xlu0 %809 }
 0x29c   :  { %v1717_v52 = vadd.f32 %v1653_v12, %v1329_v21 }
 0x29e   :  { %v1781_v47 = vmax.f32 %v1717_v52, 0.0  ;;  %4138 = vset.pattern.permute.xlu1 %v6799_v17  ;;  %v352_v41 = vpop.permute.xlu1 %351  ;;  %v362_v52 = vpop.permute.xlu0 %361 }
 0x29f   :  { %396 = vperm.xlu1 %4138, %v5283_v11   ;;  %v485_v53 = vmul.f32 %v4861_v20, %v352_v41 }
 0x2a0   :  { %v1822_v43 = vpack.c.bf16 %v1781_v47, %v1780_v39  ;;  %v4204_v39 = vld [vmem:[%s6736_s5 + $0x14] ss:$8 sps:$4 sm:$0xff]  }
 0x2a1   :  { %v555_v29 = vadd.f32 %v5366_v35, %v485_v53 }
 0x2a2   :  { %2193 = vmatmul.mubr.bf16.gmra.mxu1 %v1822_v43 }
 0x2a3   :  { %401 = vperm.xlu1 %4138, %v5463_v50   ;;  %v758_v51 = vpop.permute.xlu1 %757  ;;  %2202 = vmatprep.mubr.bf16.mxu1 %v6799_v17  ;;  %v943_v22 = vadd.f32 %v879_v9, %v555_v29 }
 0x2a4   :  { %v878_v5 = vmul.f32 %v4874_v3, %v758_v51 }
 0x2a6   :  { %v942_v13 = vadd.f32 %v878_v5, %v554_v57 }
 0x2a7   :  { %4139 = vset.pattern.permute.xlu1 %v6794_v0 }
 0x2a8   :  { %801 = vperm.xlu1 %4139, %v5463_v50   ;;  %v1146_v63 = vpop.permute.xlu1 %1145 }
 0x2a9   :  { %v1266_v56 = vmul.f32 %v4891_v4, %v1146_v63  ;;  %v1657_v63 = vmul.f32 %v4904_v8, %v5401_v14  ;;  %v4207_v14 = vld [vmem:[%s6736_s5 + $0x4] ss:$8 sps:$4 sm:$0xff]  }
 0x2ab   :  { %v1330_v62 = vadd.f32 %v1266_v56, %v942_v13 }
 0x2ac   :  { %4140 = vset.pattern.permute.xlu1 %v6789_v31  ;;  %v1150_v27 = vpop.permute.xlu1 %1149 }
 0x2ad   :  { %1185 = vperm.xlu1 %4140, %v5283_v11   ;;  %v1267_v25 = vmul.f32 %v4891_v4, %v1150_v27  ;;  %v1718_v48 = vadd.f32 %v1654_v19, %v1330_v62  ;;  %v4205_v27 = vld [vmem:[%s6736_s5] ss:$8 sps:$4 sm:$0xff]  }
 0x2af   :  { %v1331_v10 = vadd.f32 %v1267_v25, %v943_v22  ;;  %v1782_v42 = vmax.f32 %v1718_v48, 0.0  ;;  %v4208_v25 = vld [vmem:[%s6736_s5 + $0xf0] ss:$8 sps:$4 sm:$0xff]   ;;  %v4210_v22 = vld [vmem:[%s6736_s5 + $0xf4] ss:$8 sps:$4 sm:$0xff]  }
 0x2b1   :  { %4141 = vset.pattern.permute.xlu1 %v6791_v16  ;;  %v1538_v55 = vpop.permute.xlu1 %1537 }
 0x2b2   :  { %v1655_v44 = vmul.f32 %v4904_v8, %v1538_v55  ;;  %1573 = vperm.xlu1 %4141, %v5283_v11   ;;  %v4199_v11 = vld [vmem:[%s6736_s5 + $0x20] ss:$8 sps:$4 sm:$0xff]  }
 0x2b3   :  { %2700 = vmatpush1.bf16.msra.mxu1 %v4199_v11  ;;  %v4214_v11 = vld [vmem:[%s6736_s5 + $0xd0] ss:$8 sps:$4 sm:$0xff]  }
 0x2b4   :  { %v1719_v45 = vadd.f32 %v1655_v44, %v1331_v10  ;;  %2701 = vmatprep.subr.bf16.mxu1 %v4204_v39  ;;  %v4211_v10 = vld [vmem:[%s6736_s5 + $0xe0] ss:$8 sps:$4 sm:$0xff]   ;;  %v4213_v44 = vld [vmem:[%s6736_s5 + $0xe4] ss:$8 sps:$4 sm:$0xff]   ;;  %v1271_v39 = vmul.f32 %v4891_v4, %v5176_v26 }
 0x2b6   :  { %v1783_v21 = vmax.f32 %v1719_v45, 0.0  ;;  %1577 = vperm.xlu1 %4141, %v5463_v50   ;;  %v357_v12 = vpop.permute.xlu1 %356  ;;  %v487_v50 = vmul.f32 %v4861_v20, %v362_v52 }
 0x2b7   :  { %v486_v41 = vmul.f32 %v4861_v20, %v357_v12  ;;  %2702 = vmatpush1.bf16.msra.mxu1 %v4202_v40 }
 0x2b8   :  { %v1823_v49 = vpack.c.bf16 %v1783_v21, %v1782_v42  ;;  %v557_v2 = vadd.f32 %v5366_v35, %v487_v50  ;;  %2703 = vmatprep.subr.bf16.mxu1 %v4207_v14  ;;  %v882_v42 = vmul.f32 %v4874_v3, %v5630_v28 }
 0x2b9   :  { %v556_v38 = vadd.f32 %v5366_v35, %v486_v41 }
 0x2ba   :  { %4142 = vset.pattern.permute.xlu1 %v6799_v17  ;;  %2203 = vmatmul.mubr.bf16.gmra.mxu1 %v1823_v49 }
 0x2bb   :  { %411 = vperm.xlu1 %4142, %v5296_v37   ;;  %v766_v46 = vpop.permute.xlu1 %765  ;;  %2212 = vmatprep.mubr.bf16.mxu1 %v6799_v17 }
 0x2bc   :  { %v880_v51 = vmul.f32 %v4874_v3, %v766_v46  ;;  %2704 = vmatpush1.bf16.msra.mxu1 %v4205_v27 }
 0x2bd   :  { %2705 = vmatprep.subr.bf16.mxu1 %v4210_v22 }
 0x2be   :  { %v944_v57 = vadd.f32 %v880_v51, %v556_v38  ;;  %v4219_v38 = vld [vmem:[%s6736_s5 + $0xc4] ss:$8 sps:$4 sm:$0xff]  }
 0x2bf   :  { %4143 = vset.pattern.permute.xlu1 %v6794_v0  ;;  %v770_v47 = vpop.permute.xlu1 %769 }
 0x2c0   :  { %805 = vperm.xlu1 %4143, %v5410_v18   ;;  %v881_v43 = vmul.f32 %v4874_v3, %v770_v47  ;;  %v1332_v9 = vadd.f32 %v1268_v32, %v944_v57  ;;  %2706 = vmatpush2.bf16.msra.mxu1 %v4208_v25  ;;  %v4220_v57 = vld [vmem:[%s6736_s5 + $0xb0] ss:$8 sps:$4 sm:$0xff]  }
 0x2c1   :  { %2707 = vmatprep.subr.bf16.mxu1 %v4213_v44 }
 0x2c2   :  { %v945_v53 = vadd.f32 %v881_v43, %v557_v2 }
 0x2c4   :  { %4145 = vset.pattern.permute.xlu1 %v6789_v31  ;;  %v1158_v34 = vpop.permute.xlu1 %1157  ;;  %2708 = vmatpush2.bf16.msra.mxu1 %v4211_v10 }
 0x2c5   :  { %v1269_v5 = vmul.f32 %v4891_v4, %v1158_v34  ;;  %1193 = vperm.xlu1 %4145, %v5410_v18   ;;  %2709 = vmatprep.subr.bf16.mxu1 %v4216_v15 }
 0x2c7   :  { %v1333_v56 = vadd.f32 %v1269_v5, %v945_v53 }
 0x2c8   :  { %2710 = vmatpush2.bf16.msra.mxu1 %v4214_v11  ;;  %v5806_v11 = vpop.f32.mrf.mxu0 }
 0x2c9   :  { %1197 = vperm.xlu1 %4145, %v5296_v37   ;;  %v1542_v33 = vpop.permute.xlu1 %1541  ;;  %v1721_v29 = vadd.f32 %v1657_v63, %v1333_v56  ;;  %2711 = vmatprep.subr.bf16.mxu1 %v4219_v38  ;;  %v4222_v56 = vld [vmem:[%s6736_s5 + $0xb4] ss:$8 sps:$4 sm:$0xff]  }
 0x2ca   :  { %v1656_v13 = vmul.f32 %v4904_v8, %v1542_v33 }
 0x2cb   :  { %v1785_v1 = vmax.f32 %v1721_v29, 0.0 }
 0x2cc   :  { %v1720_v18 = vadd.f32 %v1656_v13, %v1332_v9 }
 0x2cd   :  { %4146 = vset.pattern.permute.xlu1 %v6791_v16 }
 0x2ce   :  { %v1784_v19 = vmax.f32 %v1720_v18, 0.0  ;;  %1585 = vperm.xlu1 %4146, %v5296_v37   ;;  %v367_v62 = vpop.permute.xlu1 %366  ;;  %v4223_v18 = vld [vmem:[%s6736_s5 + $0xa0] ss:$8 sps:$4 sm:$0xff]  }
 0x2cf   :  { %v488_v24 = vmul.f32 %v4861_v20, %v367_v62 }
 0x2d0   :  { %v1824_v55 = vpack.c.bf16 %v1785_v1, %v1784_v19  ;;  %v4225_v1 = vld [vmem:[%s6736_s5 + $0xa4] ss:$8 sps:$4 sm:$0xff]  }
 0x2d1   :  { %v558_v21 = vadd.f32 %v5366_v35, %v488_v24 }
 0x2d2   :  { %4147 = vset.pattern.permute.xlu1 %v6799_v17  ;;  %v372_v48 = vpop.permute.xlu1 %371  ;;  %2213 = vmatmul.mubr.bf16.gmra.mxu1 %v1824_v55 }
 0x2d3   :  { %416 = vperm.xlu1 %4147, %v5494_v60   ;;  %2222 = vmatprep.mubr.bf16.mxu1 %v6799_v17  ;;  %v489_v7 = vmul.f32 %v4861_v20, %v372_v48  ;;  %v946_v50 = vadd.f32 %v882_v42, %v558_v21  ;;  %v1660_v48 = vmul.f32 %v4904_v8, %v5405_v6  ;;  %v4226_v6 = vld [vmem:[%s6736_s5 + $0x90] ss:$8 sps:$4 sm:$0xff]  }
 0x2d5   :  { %v559_v49 = vadd.f32 %v5366_v35, %v489_v7 }
 0x2d7   :  { %4149 = vset.pattern.permute.xlu1 %v6794_v0  ;;  %v778_v37 = vpop.permute.xlu1 %777 }
 0x2d8   :  { %813 = vperm.xlu1 %4149, %v5494_v60   ;;  %v883_v12 = vmul.f32 %v4874_v3, %v778_v37 }
 0x2da   :  { %v947_v46 = vadd.f32 %v883_v12, %v559_v49 }
 0x2dc   :  { %817 = vperm.xlu1 %4149, %v5420_v61   ;;  %v1162_v45 = vpop.permute.xlu1 %1161  ;;  %v1335_v43 = vadd.f32 %v1271_v39, %v947_v46 }
 0x2dd   :  { %v1270_v52 = vmul.f32 %v4891_v4, %v1162_v45 }
 0x2df   :  { %v1334_v47 = vadd.f32 %v1270_v52, %v946_v50 }
 0x2e0   :  { %4151 = vset.pattern.permute.xlu1 %v6789_v31 }
 0x2e1   :  { %1205 = vperm.xlu1 %4151, %v5420_v61   ;;  %v1550_v28 = vpop.permute.xlu1 %1549  ;;  %v4217_v61 = vld [vmem:[%s6736_s5 + $0xc0] ss:$8 sps:$4 sm:$0xff]  }
 0x2e2   :  { %v1658_v40 = vmul.f32 %v4904_v8, %v1550_v28  ;;  %2712 = vmatpush2.bf16.msra.mxu1 %v4217_v61  ;;  %v5812_v28 = vpop.f32.mrf.mxu0 }
 0x2e3   :  { %2713 = vmatprep.subr.bf16.mxu1 %v4222_v56 }
 0x2e4   :  { %v1722_v2 = vadd.f32 %v1658_v40, %v1334_v47  ;;  %v5818_v40 = vld [vmem:[%s6733_s2] ss:$0 sm:$0xff] }
 0x2e5   :  { %4152 = vset.pattern.permute.xlu1 %v6791_v16  ;;  %v1554_v41 = vpop.permute.xlu1 %1553 }
 0x2e6   :  { %v1659_v51 = vmul.f32 %v4904_v8, %v1554_v41  ;;  %1589 = vperm.xlu1 %4152, %v5494_v60   ;;  %v1786_v26 = vmax.f32 %v1722_v2, 0.0  ;;  %v377_v60 = vpop.permute.xlu0 %376  ;;  %2714 = vmatpush2.bf16.msra.mxu1 %v4220_v57  ;;  %v5823_v2 = vpop.f32.mrf.mxu0 }
 0x2e7   :  { %v490_v33 = vmul.f32 %v4861_v20, %v377_v60  ;;  %2715 = vmatprep.subr.bf16.mxu1 %v4225_v1  ;;  %v1663_v60 = vmul.f32 %v4904_v8, %v5422_v36 }
 0x2e8   :  { %v1723_v34 = vadd.f32 %v1659_v51, %v1335_v43 }
 0x2e9   :  { %v560_v9 = vadd.f32 %v5366_v35, %v490_v33 }
 0x2ea   :  { %v1787_v53 = vmax.f32 %v1723_v34, 0.0  ;;  %4153 = vset.pattern.permute.xlu1 %v6799_v17  ;;  %v382_v5 = vpop.permute.xlu1 %381  ;;  %2716 = vmatpush2.bf16.msra.mxu1 %v4223_v18  ;;  %v392_v10 = vpop.permute.xlu0 %391 }
 0x2eb   :  { %426 = vperm.xlu1 %4153, %v5543_v58   ;;  %v491_v29 = vmul.f32 %v4861_v20, %v382_v5  ;;  %v493_v49 = vmul.f32 %v4861_v20, %v392_v10  ;;  %v5828_v5 = vpop.f32.mrf.mxu0 }
 0x2ec   :  { %v1825_v63 = vpack.c.bf16 %v1787_v53, %v1786_v26 }
 0x2ed   :  { %v561_v19 = vadd.f32 %v5366_v35, %v491_v29  ;;  %v563_v39 = vadd.f32 %v5818_v40, %v493_v49  ;;  %v5833_v29 = vpop.f32.mrf.mxu0 }
 0x2ee   :  { %2223 = vmatmul.mubr.bf16.gmra.mxu1 %v1825_v63  ;;  %v5798_v21 = vpop.permute.xlu0 %406 }
 0x2ef   :  { %431 = vperm.xlu1 %4153, %v5554_v30   ;;  %v782_v32 = vpop.permute.xlu1 %781  ;;  %2232 = vmatprep.mubr.bf16.mxu1 %v6799_v17  ;;  %v5835_v18 = vpop.f32.mrf.mxu0 }
 0x2f0   :  { %v884_v13 = vmul.f32 %v4874_v3, %v782_v32 }
 0x2f2   :  { %v948_v62 = vadd.f32 %v884_v13, %v560_v9  ;;  %v5810_v52 = vpop.permute.xlu0 %421 }
 0x2f3   :  { %4155 = vset.pattern.permute.xlu1 %v6794_v0  ;;  %v885_v0 = vmul.f32 %v4874_v3, %v5640_v54 }
 0x2f4   :  { %825 = vperm.xlu1 %4155, %v5554_v30   ;;  %v1170_v27 = vpop.permute.xlu1 %1169 }
 0x2f5   :  { %v1272_v14 = vmul.f32 %v4891_v4, %v1170_v27  ;;  %v949_v37 = vadd.f32 %v885_v0, %v561_v19  ;;  %v5837_v19 = vpop.f32.mrf.mxu0 }
 0x2f6   :  { %v1178_v43 = vpop.permute.xlu0 %1177 }
 0x2f7   :  { %v1336_v22 = vadd.f32 %v1272_v14, %v948_v62  ;;  %v1274_v53 = vmul.f32 %v4891_v4, %v1178_v43  ;;  %v5840_v36 = vpop.f32.mrf.mxu0 }
 0x2f8   :  { %4156 = vset.pattern.permute.xlu1 %v6789_v31  ;;  %v1174_v25 = vpop.permute.xlu1 %1173 }
 0x2f9   :  { %1209 = vperm.xlu1 %4156, %v5543_v58   ;;  %v1273_v55 = vmul.f32 %v4891_v4, %v1174_v25  ;;  %v1724_v35 = vadd.f32 %v1660_v48, %v1336_v22  ;;  %v5843_v22 = vpop.f32.mrf.mxu0 }
 0x2fb   :  { %v1337_v44 = vadd.f32 %v1273_v55, %v949_v37  ;;  %v1788_v7 = vmax.f32 %v1724_v35, 0.0  ;;  %v5848_v10 = vpop.f32.mrf.mxu0  ;;  %v1190_v35 = vpop.permute.xlu0 %1189 }
 0x2fd   :  { %4158 = vset.pattern.permute.xlu1 %v6791_v16  ;;  %v1562_v54 = vpop.permute.xlu1 %1561  ;;  %v4228_v16 = vld [vmem:[%s6736_s5 + $0x94] ss:$8 sps:$4 sm:$0xff]  }
 0x2fe   :  { %v1661_v31 = vmul.f32 %v4904_v8, %v1562_v54  ;;  %1597 = vperm.xlu1 %4158, %v5543_v58   ;;  %v4231_v58 = vld [vmem:[%s6736_s5 + $0x84] ss:$8 sps:$4 sm:$0xff]   ;;  %2717 = vmatprep.subr.bf16.mxu1 %v4228_v16 }
 0x2ff   :  { %2718 = vmatpush2.bf16.msra.mxu1 %v4226_v6 }
 0x300   :  { %v1725_v24 = vadd.f32 %v1661_v31, %v1337_v44  ;;  %2719 = vmatprep.subr.bf16.mxu1 %v4231_v58  ;;  %v888_v44 = vmul.f32 %v4874_v3, %v5657_v23  ;;  %v5856_v58 = vpop.f32.mrf.mxu0 }
 0x302   :  { %v1789_v45 = vmax.f32 %v1725_v24, 0.0  ;;  %1601 = vperm.xlu1 %4158, %v5554_v30   ;;  %v387_v42 = vpop.permute.xlu1 %386  ;;  %v4229_v30 = vld [vmem:[%s6736_s5 + $0x80] ss:$8 sps:$4 sm:$0xff]   ;;  %v5859_v23 = vpop.f32.mrf.mxu0 }
 0x303   :  { %2720 = vmatpush2.bf16.msra.mxu1 %v4229_v30  ;;  %v492_v50 = vmul.f32 %v4861_v20, %v387_v42  ;;  %v1277_v42 = vmul.f32 %v4891_v4, %v1190_v35 }
 0x304   :  { %v1826_v12 = vpack.c.bf16 %v1789_v45, %v1788_v7  ;;  %v5861_v43 = vpop.f32.mrf.mxu0 }
 0x305   :  { %v562_v51 = vadd.f32 %v5818_v40, %v492_v50 }
 0x306   :  { %2233 = vmatmul.mubr.bf16.gmra.mxu1 %v1826_v12 }
 0x307   :  { %v790_v15 = vpop.permute.xlu1 %789  ;;  %2242 = vmatprep.mubr.bf16.mxu1 %v6799_v17 }
 0x308   :  { %v886_v41 = vmul.f32 %v4874_v3, %v790_v15 }
 0x30a   :  { %v950_v26 = vadd.f32 %v886_v41, %v562_v51 }
 0x30b   :  { %v794_v46 = vpop.permute.xlu1 %793 }
 0x30c   :  { %v887_v47 = vmul.f32 %v4874_v3, %v794_v46  ;;  %v1338_v56 = vadd.f32 %v1274_v53, %v950_v26  ;;  %v1202_v26 = vpop.permute.xlu0 %1201 }
 0x30e   :  { %v951_v38 = vadd.f32 %v887_v47, %v563_v39 }
 0x310   :  { %v1182_v61 = vpop.permute.xlu1 %1181 }
 0x311   :  { %v1275_v34 = vmul.f32 %v4891_v4, %v1182_v61  ;;  %v5863_v61 = vpop.f32.mrf.mxu0 }
 0x313   :  { %v1339_v63 = vadd.f32 %v1275_v34, %v951_v38  ;;  %v496_v34 = vmul.f32 %v4861_v20, %v5798_v21  ;;  %v5868_v53 = vpop.f32.mrf.mxu0  ;;  %v891_v21 = vmul.f32 %v4874_v3, %v5668_v59 }
 0x315   :  { %v1566_v57 = vpop.permute.xlu1 %1565  ;;  %v1727_v32 = vadd.f32 %v1663_v60, %v1339_v63  ;;  %v566_v63 = vadd.f32 %v5818_v40, %v496_v34 }
 0x316   :  { %v1662_v33 = vmul.f32 %v4904_v8, %v1566_v57 }
 0x317   :  { %v1791_v13 = vmax.f32 %v1727_v32, 0.0 }
 0x318   :  { %v1726_v9 = vadd.f32 %v1662_v33, %v1338_v56  ;;  %v5874_v33 = vpop.f32.mrf.mxu0 }
 0x31a   :  { %v1790_v27 = vmax.f32 %v1726_v9, 0.0  ;;  %v397_v14 = vpop.permute.xlu1 %396  ;;  %v1582_v9 = vpop.permute.xlu0 %1581 }
 0x31b   :  { %v494_v25 = vmul.f32 %v4861_v20, %v397_v14 }
 0x31c   :  { %v1827_v1 = vpack.c.bf16 %v1791_v13, %v1790_v27 }
 0x31d   :  { %v564_v37 = vadd.f32 %v5818_v40, %v494_v25  ;;  %v5881_v25 = vpop.f32.mrf.mxu0 }
 0x31e   :  { %v402_v0 = vpop.permute.xlu1 %401  ;;  %2243 = vmatmul.mubr.bf16.gmra.mxu1 %v1827_v1 }
 0x31f   :  { %2252 = vmatprep.mubr.bf16.mxu1 %v6799_v17  ;;  %v495_v55 = vmul.f32 %v4861_v20, %v402_v0  ;;  %v952_v6 = vadd.f32 %v888_v44, %v564_v37  ;;  %v1666_v0 = vmul.f32 %v4904_v8, %v1582_v9  ;;  %v5884_v44 = vpop.f32.mrf.mxu0 }
 0x321   :  { %v565_v31 = vadd.f32 %v5818_v40, %v495_v55  ;;  %v5886_v59 = vpop.f32.mrf.mxu0 }
 0x323   :  { %v802_v62 = vpop.permute.xlu1 %801 }
 0x324   :  { %v889_v54 = vmul.f32 %v4874_v3, %v802_v62 }
 0x326   :  { %v953_v45 = vadd.f32 %v889_v54, %v565_v31 }
 0x328   :  { %v1186_v48 = vpop.permute.xlu1 %1185  ;;  %v1341_v15 = vadd.f32 %v1277_v42, %v953_v45 }
 0x329   :  { %v1276_v24 = vmul.f32 %v4891_v4, %v1186_v48 }
 0x32b   :  { %v1340_v12 = vadd.f32 %v1276_v24, %v952_v6  ;;  %v5888_v6 = vpop.f32.mrf.mxu0 }
 0x32d   :  { %v1574_v7 = vpop.permute.xlu1 %1573 }
 0x32e   :  { %v1664_v16 = vmul.f32 %v4904_v8, %v1574_v7 }
 0x330   :  { %v1728_v49 = vadd.f32 %v1664_v16, %v1340_v12  ;;  %v5891_v12 = vpop.f32.mrf.mxu0 }
 0x331   :  { %v1578_v30 = vpop.permute.xlu1 %1577 }
 0x332   :  { %v1665_v46 = vmul.f32 %v4904_v8, %v1578_v30  ;;  %v1792_v39 = vmax.f32 %v1728_v49, 0.0  ;;  %v499_v30 = vmul.f32 %v4861_v20, %v5810_v52  ;;  %v4232_v49 = vld [vmem:[%s6738_s7 + $0x70] ss:$8 sps:$4 sm:$0xff]  }
 0x334   :  { %v1729_v50 = vadd.f32 %v1665_v46, %v1341_v15  ;;  %v4234_v46 = vld [vmem:[%s6738_s7 + $0x74] ss:$8 sps:$4 sm:$0xff]   ;;  %v569_v52 = vadd.f32 %v5818_v40, %v499_v30 }
 0x335   :  { %3438 = vmatprep.subr.bf16.mxu0 %v4234_v46 }
 0x336   :  { %v1793_v47 = vmax.f32 %v1729_v50, 0.0  ;;  %v412_v41 = vpop.permute.xlu1 %411  ;;  %3439 = vmatpush1.bf16.msra.mxu0 %v4232_v49  ;;  %v4243_v49 = vld [vmem:[%s6738_s7 + $0x44] ss:$8 sps:$4 sm:$0xff]  }
 0x337   :  { %v497_v60 = vmul.f32 %v4861_v20, %v412_v41  ;;  %v5904_v41 = vpop.f32.mrf.mxu0 }
 0x338   :  { %v1828_v51 = vpack.c.bf16 %v1793_v47, %v1792_v39 }
 0x339   :  { %v567_v13 = vadd.f32 %v5818_v40, %v497_v60  ;;  %v5911_v9 = vpop.f32.mrf.mxu0 }
 0x33a   :  { %2253 = vmatmul.mubr.bf16.gmra.mxu1 %v1828_v51  ;;  %v1594_v51 = vpop.permute.xlu0 %1593 }
 0x33b   :  { %v806_v38 = vpop.permute.xlu1 %805  ;;  %2262 = vmatprep.mubr.bf16.mxu1 %v6799_v17  ;;  %v955_v55 = vadd.f32 %v891_v21, %v567_v13 }
 0x33c   :  { %v890_v57 = vmul.f32 %v4874_v3, %v806_v38 }
 0x33e   :  { %v954_v27 = vadd.f32 %v890_v57, %v566_v63  ;;  %v1280_v57 = vmul.f32 %v4891_v4, %v1202_v26  ;;  %v4235_v26 = vld [vmem:[%s6738_s7 + $0x60] ss:$8 sps:$4 sm:$0xff]  }
 0x340   :  { %v1194_v56 = vpop.permute.xlu1 %1193 }
 0x341   :  { %v1278_v32 = vmul.f32 %v4891_v4, %v1194_v56 }
 0x343   :  { %v1342_v1 = vadd.f32 %v1278_v32, %v954_v27  ;;  %v1669_v32 = vmul.f32 %v4904_v8, %v1594_v51 }
 0x344   :  { %v1198_v14 = vpop.permute.xlu1 %1197 }
 0x345   :  { %v1279_v62 = vmul.f32 %v4891_v4, %v1198_v14  ;;  %v1730_v37 = vadd.f32 %v1666_v0, %v1342_v1  ;;  %v5914_v0 = vpop.f32.mrf.mxu0 }
 0x347   :  { %v1343_v54 = vadd.f32 %v1279_v62, %v955_v55  ;;  %v1794_v24 = vmax.f32 %v1730_v37, 0.0 }
 0x349   :  { %v1586_v48 = vpop.permute.xlu1 %1585 }
 0x34a   :  { %v1667_v35 = vmul.f32 %v4904_v8, %v1586_v48 }
 0x34c   :  { %v1731_v31 = vadd.f32 %v1667_v35, %v1343_v54  ;;  %v5916_v54 = vpop.f32.mrf.mxu0  ;;  %v4237_v35 = vld [vmem:[%s6738_s7 + $0x64] ss:$8 sps:$4 sm:$0xff]  }
 0x34d   :  { %3440 = vmatprep.subr.bf16.mxu0 %v4237_v35  ;;  %v4244_v35 = vld [vmem:[%s6738_s7 + $0x30] ss:$8 sps:$4 sm:$0xff]  }
 0x34e   :  { %v1795_v7 = vmax.f32 %v1731_v31, 0.0  ;;  %v417_v45 = vpop.permute.xlu1 %416  ;;  %3441 = vmatpush1.bf16.msra.mxu0 %v4235_v26 }
 0x34f   :  { %v498_v50 = vmul.f32 %v4861_v20, %v417_v45  ;;  %v4238_v45 = vld [vmem:[%s6738_s7 + $0x50] ss:$8 sps:$4 sm:$0xff]  }
 0x350   :  { %v1829_v42 = vpack.c.bf16 %v1795_v7, %v1794_v24  ;;  %v4240_v24 = vld [vmem:[%s6738_s7 + $0x54] ss:$8 sps:$4 sm:$0xff]  }
 0x351   :  { %v568_v38 = vadd.f32 %v5818_v40, %v498_v50  ;;  %3442 = vmatprep.subr.bf16.mxu0 %v4240_v24 }
 0x352   :  { %2263 = vmatmul.mubr.bf16.gmra.mxu1 %v1829_v42  ;;  %v5930_v42 = vpop.f32.mrf.mxu0  ;;  %3443 = vmatpush1.bf16.msra.mxu0 %v4238_v45 }
 0x353   :  { %v814_v16 = vpop.permute.xlu1 %813  ;;  %2272 = vmatprep.mubr.bf16.mxu1 %v6799_v17  ;;  %3444 = vmatprep.subr.bf16.mxu0 %v4243_v49 }
 0x354   :  { %v892_v47 = vmul.f32 %v4874_v3, %v814_v16  ;;  %v5933_v16 = vpop.f32.mrf.mxu0 }
 0x356   :  { %v956_v56 = vadd.f32 %v892_v47, %v568_v38  ;;  %v5942_v50 = vpop.f32.mrf.mxu0 }
 0x357   :  { %v818_v15 = vpop.permute.xlu1 %817 }
 0x358   :  { %v893_v39 = vmul.f32 %v4874_v3, %v818_v15  ;;  %v1344_v21 = vadd.f32 %v1280_v57, %v956_v56  ;;  %v4241_v15 = vld [vmem:[%s6738_s7 + $0x40] ss:$8 sps:$4 sm:$0xff]   ;;  %v5947_v51 = vpop.f32.mrf.mxu0 }
 0x359   :  { %3445 = vmatpush1.bf16.msra.mxu0 %v4241_v15 }
 0x35a   :  { %v957_v63 = vadd.f32 %v893_v39, %v569_v52  ;;  %v5944_v39 = vpop.f32.mrf.mxu1 }
 0x35c   :  { %v1206_v34 = vpop.permute.xlu1 %1205  ;;  %v5952_v57 = vpop.f32.mrf.mxu1 }
 0x35d   :  { %v1281_v60 = vmul.f32 %v4891_v4, %v1206_v34 }
 0x35f   :  { %v1345_v13 = vadd.f32 %v1281_v60, %v957_v63 }
 0x361   :  { %v1590_v27 = vpop.permute.xlu1 %1589  ;;  %v1733_v14 = vadd.f32 %v1669_v32, %v1345_v13 }
 0x362   :  { %v1668_v1 = vmul.f32 %v4904_v8, %v1590_v27  ;;  %v5959_v27 = vpop.f32.mrf.mxu0 }
 0x363   :  { %v1797_v55 = vmax.f32 %v1733_v14, 0.0 }
 0x364   :  { %v1732_v62 = vadd.f32 %v1668_v1, %v1344_v21 }
 0x366   :  { %v1796_v48 = vmax.f32 %v1732_v62, 0.0  ;;  %v427_v37 = vpop.permute.xlu1 %426  ;;  %v6836_v62 = vld [vmem:[#allocation37_spill] sm:$0xff] }
 0x367   :  { %v500_v46 = vmul.f32 %v4861_v20, %v427_v37 }
 0x368   :  { %v1830_v31 = vpack.c.bf16 %v1797_v55, %v1796_v48  ;;  %v5966_v48 = vpop.f32.mrf.mxu1 }
 0x369   :  { %v570_v38 = vadd.f32 %v5818_v40, %v500_v46  ;;  %v6837_v46 = vld [vmem:[#allocation35_spill] sm:$0xff] }
 0x36a   :  { %v432_v7 = vpop.permute.xlu1 %431  ;;  %2273 = vmatmul.mubr.bf16.gmra.mxu1 %v1830_v31  ;;  %v5976_v31 = vpop.f32.mrf.mxu0 }
 0x36b   :  { %2282 = vmatprep.mubr.bf16.mxu1 %v6799_v17  ;;  %v822_v17 = vpop.permute.xlu0 %821  ;;  %v501_v47 = vmul.f32 %v4861_v20, %v432_v7  ;;  %v1848_v20 = vld [vmem:[%s6735_s4] sm:$0x3] }
 0x36c   :  { %v894_v34 = vmul.f32 %v4874_v3, %v822_v17  ;;  %v5964_v55 = vrot.slane %v1848_v20, %v6836_v62  ;;  %v5984_v17 = vrot.slane %v1848_v20, %v6837_v46 }
 0x36d   :  { %v571_v56 = vadd.f32 %v5818_v40, %v501_v47  ;;  %v5986_v47 = vpop.f32.mrf.mxu0 }
 0x36e   :  { %v958_v14 = vadd.f32 %v894_v34, %v570_v38  ;;  %v1981_v37 = vadd.f32 %v5828_v5, %v5964_v55  ;;  %v5981_v5 = vpop.f32.mrf.mxu1 }
 0x36f   :  { %v826_v30 = vpop.permute.xlu1 %825  ;;  %v1214_v60 = vpop.permute.xlu0 %1213 }
 0x370   :  { %v895_v63 = vmul.f32 %v4874_v3, %v826_v30  ;;  %v1283_v1 = vmul.f32 %v4891_v4, %v1214_v60  ;;  %v1977_v30 = vadd.f32 %v5812_v28, %v5964_v55  ;;  %v2296_v49 = vmax.f32 %v1981_v37, 0.0  ;;  %v4249_v28 = vld [vmem:[%s6738_s7 + $0x24] ss:$8 sps:$4 sm:$0xff]  }
 0x371   :  { %v1979_v60 = vadd.f32 %v5823_v2, %v5984_v17  ;;  %v4250_v2 = vld [vmem:[%s6738_s7 + $0x10] ss:$8 sps:$4 sm:$0xff]  }
 0x372   :  { %v959_v21 = vadd.f32 %v895_v63, %v571_v56  ;;  %v2294_v63 = vmax.f32 %v1977_v30, 0.0  ;;  %v5998_v56 = vpop.f32.mrf.mxu0  ;;  %v1985_v30 = vadd.f32 %v5833_v29, %v5984_v17  ;;  %v1999_v29 = vadd.f32 %v5856_v58, %v5984_v17 }
 0x373   :  { %v2007_v58 = vadd.f32 %v5863_v61, %v5964_v55 }
 0x374   :  { %v1210_v52 = vpop.permute.xlu1 %1209  ;;  %v1347_v24 = vadd.f32 %v1283_v1, %v959_v21  ;;  %v2422_v20 = vpack.c.bf16 %v2296_v49, %v2294_v63  ;;  %v1987_v1 = vadd.f32 %v5835_v18, %v5964_v55  ;;  %v1997_v49 = vadd.f32 %v5848_v10, %v5964_v55 }
 0x375   :  { %v1282_v32 = vmul.f32 %v4891_v4, %v1210_v52  ;;  %v4246_v4 = vld [vmem:[%s6738_s7 + $0x34] ss:$8 sps:$4 sm:$0xff]   ;;  %v5988_v52 = vpop.f32.mrf.mxu1  ;;  %v2011_v10 = vadd.f32 %v5874_v33, %v5964_v55  ;;  %v2303_v33 = vmax.f32 %v1999_v29, 0.0 }
 0x376   :  { %3446 = vmatprep.subr.bf16.mxu0 %v4246_v4  ;;  %v1989_v4 = vadd.f32 %v5837_v19, %v5984_v17 }
 0x377   :  { %v1346_v40 = vadd.f32 %v1282_v32, %v958_v14  ;;  %3447 = vmatpush1.bf16.msra.mxu0 %v4244_v35  ;;  %v1975_v14 = vadd.f32 %v5806_v11, %v5984_v17  ;;  %v6004_v21 = vpop.f32.mrf.mxu1  ;;  %v2298_v35 = vmax.f32 %v1987_v1, 0.0  ;;  %v1995_v1 = vadd.f32 %v5843_v22, %v5984_v17  ;;  %v4256_v22 = vld [vmem:[%s6738_s7 + $0xf0] ss:$8 sps:$4 sm:$0xff]  }
 0x378   :  { %3448 = vmatprep.subr.bf16.mxu0 %v4249_v28 }
 0x379   :  { %v1598_v13 = vpop.permute.xlu1 %1597  ;;  %v2293_v37 = vmax.f32 %v1975_v14, 0.0  ;;  %v4255_v14 = vld [vmem:[%s6738_s7 + $0x4] ss:$8 sps:$4 sm:$0xff]  }
 0x37a   :  { %v1670_v3 = vmul.f32 %v4904_v8, %v1598_v13  ;;  %v1991_v13 = vadd.f32 %v5840_v36, %v5964_v55  ;;  %v4252_v36 = vld [vmem:[%s6738_s7 + $0x14] ss:$8 sps:$4 sm:$0xff]  }
 0x37c   :  { %v1734_v7 = vadd.f32 %v1670_v3, %v1346_v40  ;;  %v2295_v3 = vmax.f32 %v1979_v60, 0.0  ;;  %v6014_v40 = vpop.f32.mrf.mxu0  ;;  %v2300_v11 = vmax.f32 %v1991_v13, 0.0 }
 0x37d   :  { %v1602_v26 = vpop.permute.xlu1 %1601 }
 0x37e   :  { %v1671_v45 = vmul.f32 %v4904_v8, %v1602_v26  ;;  %v1798_v38 = vmax.f32 %v1734_v7, 0.0  ;;  %v4247_v8 = vld [vmem:[%s6738_s7 + $0x20] ss:$8 sps:$4 sm:$0xff]   ;;  %v6016_v26 = vpop.f32.mrf.mxu1  ;;  %v2421_v18 = vpack.c.bf16 %v2295_v3, %v2293_v37  ;;  %v2001_v7 = vadd.f32 %v5859_v23, %v5964_v55 }
 0x37f   :  { %3449 = vmatpush1.bf16.msra.mxu0 %v4247_v8  ;;  %v2297_v8 = vmax.f32 %v1985_v30, 0.0  ;;  %v2302_v23 = vmax.f32 %v1997_v49, 0.0  ;;  %v2308_v3 = vmax.f32 %v2011_v10, 0.0  ;;  %v2005_v49 = vadd.f32 %v5861_v43, %v5984_v17 }
 0x380   :  { %v1735_v15 = vadd.f32 %v1671_v45, %v1347_v24  ;;  %3450 = vmatprep.subr.bf16.mxu0 %v4252_v36  ;;  %v6020_v24 = vpop.f32.mrf.mxu0  ;;  %v2424_v45 = vpack.c.bf16 %v2300_v11, %v2298_v35  ;;  %v2304_v63 = vmax.f32 %v2001_v7, 0.0  ;;  %v2301_v11 = vmax.f32 %v1995_v1, 0.0 }
 0x381   :  { %v2306_v35 = vmax.f32 %v2007_v58, 0.0  ;;  %v2305_v29 = vmax.f32 %v2005_v49, 0.0  ;;  %v2031_v1 = vadd.f32 %v5914_v0, %v5964_v55 }
 0x382   :  { %v1799_v34 = vmax.f32 %v1735_v15, 0.0  ;;  %v6026_v15 = vpop.f32.mrf.mxu1  ;;  %v2426_v13 = vpack.c.bf16 %v2304_v63, %v2302_v23  ;;  %v2425_v61 = vpack.c.bf16 %v2303_v33, %v2301_v11  ;;  %v2015_v33 = vadd.f32 %v5881_v25, %v5984_v17 }
 0x383   :  { %3451 = vmatpush1.bf16.msra.mxu0 %v4250_v2  ;;  %v2428_v30 = vpack.c.bf16 %v2308_v3, %v2306_v35  ;;  %v2027_v11 = vadd.f32 %v5904_v41, %v5964_v55  ;;  %v2041_v41 = vadd.f32 %v5942_v50, %v5964_v55 }
 0x384   :  { %v1831_v32 = vpack.c.bf16 %v1799_v34, %v1798_v38  ;;  %v2299_v38 = vmax.f32 %v1989_v4, 0.0  ;;  %v6030_v34 = vpop.f32.mrf.mxu0  ;;  %v6032_v19 = vpop.f32.mrf.mxu1  ;;  %3452 = vmatprep.subr.bf16.mxu0 %v4255_v14  ;;  %v2009_v4 = vadd.f32 %v5868_v53, %v5984_v17  ;;  %v4259_v53 = vld [vmem:[%s6738_s7 + $0xe0] ss:$8 sps:$4 sm:$0xff]  }
 0x386   :  { %2283 = vmatmul.mubr.bf16.gmra.mxu1 %v1831_v32  ;;  %v6034_v28 = vpop.f32.mrf.mxu0  ;;  %v2423_v60 = vpack.c.bf16 %v2299_v38, %v2297_v8  ;;  %v6038_v32 = vpop.f32.mrf.mxu1  ;;  %v2017_v8 = vadd.f32 %v5884_v44, %v5964_v55  ;;  %v2307_v23 = vmax.f32 %v2009_v4, 0.0  ;;  %v2314_v4 = vmax.f32 %v2027_v11, 0.0 }
 0x387   :  { %2721 = vmatprep.mubr.bf16.mxu1 %v2422_v20  ;;  %v4253_v20 = vld [vmem:[%s6738_s7] ss:$8 sps:$4 sm:$0xff]   ;;  %v2051_v11 = vadd.f32 %v5986_v47, %v5964_v55  ;;  %v4270_v47 = vld [vmem:[%s6738_s7 + $0xb4] ss:$8 sps:$4 sm:$0xff]  }
 0x388   :  { %v6050_v2 = vpop.f32.mrf.mxu0  ;;  %v6054_v36 = vpop.f32.mrf.mxu1  ;;  %3453 = vmatpush1.bf16.msra.mxu0 %v4253_v20  ;;  %v2427_v44 = vpack.c.bf16 %v2307_v23, %v2305_v29  ;;  %v2019_v20 = vadd.f32 %v5886_v59, %v5984_v17  ;;  %v2316_v59 = vmax.f32 %v2031_v1, 0.0  ;;  %v2037_v23 = vadd.f32 %v5930_v42, %v5964_v55  ;;  %v4267_v1 = vld [vmem:[%s6738_s7 + $0xc4] ss:$8 sps:$4 sm:$0xff]  }
 0x389   :  { %v2320_v29 = vmax.f32 %v2041_v41, 0.0 }
 0x38a   :  { %v6056_v37 = vpop.f32.mrf.mxu0  ;;  %v6066_v7 = vpop.f32.mrf.mxu1  ;;  %v2311_v35 = vmax.f32 %v2019_v20, 0.0  ;;  %v2432_v49 = vpack.c.bf16 %v2316_v59, %v2314_v4  ;;  %v2318_v20 = vmax.f32 %v2037_v23, 0.0  ;;  %v2035_v59 = vadd.f32 %v5916_v54, %v5984_v17 }
 0x38b   :  { %v2047_v4 = vadd.f32 %v5959_v27, %v5964_v55  ;;  %v2324_v54 = vmax.f32 %v2051_v11, 0.0 }
 0x38c   :  { %v6072_v38 = vpop.f32.mrf.mxu0  ;;  %v6074_v63 = vpop.f32.mrf.mxu1  ;;  %v2317_v41 = vmax.f32 %v2035_v59, 0.0  ;;  %v2059_v59 = vadd.f32 %v6020_v24, %v5984_v17 }
 0x38d   :  { %v2322_v27 = vmax.f32 %v2047_v4, 0.0 }
 0x38e   :  { %2722 = vmatmul.mubr.bf16.vlgmr.msra.gmra.mxu1 %v2421_v18  ;;  %v4258_v18 = vld [vmem:[%s6738_s7 + $0xf4] ss:$8 sps:$4 sm:$0xff]   ;;  %v6084_v43 = vpop.f32.mrf.mxu0  ;;  %v6086_v10 = vpop.f32.mrf.mxu1 }
 0x38f   :  { %2731 = vmatprep.mubr.bf16.mxu1 %v2424_v45  ;;  %v2021_v45 = vadd.f32 %v5888_v6, %v5964_v55  ;;  %3454 = vmatprep.subr.bf16.mxu0 %v4258_v18  ;;  %v4261_v6 = vld [vmem:[%s6738_s7 + $0xe4] ss:$8 sps:$4 sm:$0xff]   ;;  %v2309_v18 = vmax.f32 %v2015_v33, 0.0 }
 0x390   :  { %3455 = vmatpush2.bf16.msra.mxu0 %v4256_v22  ;;  %v6090_v14 = vpop.f32.mrf.mxu0  ;;  %v6096_v3 = vpop.f32.mrf.mxu1 }
 0x391   :  { %3456 = vmatprep.subr.bf16.mxu0 %v4261_v6  ;;  %v2429_v0 = vpack.c.bf16 %v2311_v35, %v2309_v18  ;;  %v2025_v6 = vadd.f32 %v5891_v12, %v5984_v17  ;;  %v4265_v12 = vld [vmem:[%s6738_s7 + $0xc0] ss:$8 sps:$4 sm:$0xff]   ;;  %v2434_v35 = vpack.c.bf16 %v2320_v29, %v2318_v20  ;;  %v2436_v29 = vpack.c.bf16 %v2324_v54, %v2322_v27 }
 0x392   :  { %v6100_v22 = vpop.f32.mrf.mxu0  ;;  %v2327_v27 = vmax.f32 %v2059_v59, 0.0 }
 0x394   :  { %3457 = vmatpush2.bf16.msra.mxu0 %v4259_v53  ;;  %v6106_v25 = vpop.f32.mrf.mxu0  ;;  %v4264_v53 = vld [vmem:[%s6738_s7 + $0xd4] ss:$8 sps:$4 sm:$0xff]  }
 0x395   :  { %3458 = vmatprep.subr.bf16.mxu0 %v4264_v53 }
 0x396   :  { %2732 = vmatmul.mubr.bf16.gmra.mxu1 %v2423_v60  ;;  %v2312_v60 = vmax.f32 %v2021_v45, 0.0  ;;  %v2029_v45 = vadd.f32 %v5911_v9, %v5984_v17  ;;  %v6120_v9 = vpop.f32.mrf.mxu0 }
 0x397   :  { %2741 = vmatprep.mubr.bf16.mxu1 %v2426_v13  ;;  %v2310_v13 = vmax.f32 %v2017_v8, 0.0  ;;  %v4262_v8 = vld [vmem:[%s6738_s7 + $0xd0] ss:$8 sps:$4 sm:$0xff]  }
 0x398   :  { %v2315_v50 = vmax.f32 %v2029_v45, 0.0  ;;  %3459 = vmatpush2.bf16.msra.mxu0 %v4262_v8 }
 0x399   :  { %v2430_v58 = vpack.c.bf16 %v2312_v60, %v2310_v13  ;;  %v2313_v13 = vmax.f32 %v2025_v6, 0.0  ;;  %3460 = vmatprep.subr.bf16.mxu0 %v4267_v1  ;;  %v2049_v6 = vadd.f32 %v5976_v31, %v5984_v17  ;;  %v4271_v31 = vld [vmem:[%s6738_s7 + $0xa0] ss:$8 sps:$4 sm:$0xff]   ;;  %v4273_v1 = vld [vmem:[%s6738_s7 + $0xa4] ss:$8 sps:$4 sm:$0xff]  }
 0x39b   :  { %v2431_v42 = vpack.c.bf16 %v2315_v50, %v2313_v13  ;;  %v2061_v50 = vadd.f32 %v6030_v34, %v5964_v55  ;;  %v2045_v13 = vadd.f32 %v5947_v51, %v5984_v17  ;;  %v2323_v34 = vmax.f32 %v2049_v6, 0.0 }
 0x39c   :  { %3461 = vmatpush2.bf16.msra.mxu0 %v4265_v12  ;;  %v2057_v12 = vadd.f32 %v6014_v40, %v5964_v55 }
 0x39d   :  { %3462 = vmatprep.subr.bf16.mxu0 %v4270_v47  ;;  %v2321_v51 = vmax.f32 %v2045_v13, 0.0 }
 0x39e   :  { %2742 = vmatmul.mubr.bf16.gmra.mxu1 %v2425_v61  ;;  %v6102_v61 = vpop.f32.mrf.mxu1 }
 0x39f   :  { %2751 = vmatprep.mubr.bf16.mxu1 %v2428_v30  ;;  %v2435_v40 = vpack.c.bf16 %v2323_v34, %v2321_v51  ;;  %v4274_v51 = vld [vmem:[%s6738_s7 + $0x90] ss:$8 sps:$4 sm:$0xff]  }
 0x3a0   :  { %v6108_v30 = vpop.f32.mrf.mxu1 }
 0x3a2   :  { %v6124_v60 = vpop.f32.mrf.mxu1 }
 0x3a4   :  { %v6136_v33 = vpop.f32.mrf.mxu1 }
 0x3a6   :  { %2752 = vmatmul.mubr.bf16.gmra.mxu1 %v2427_v44  ;;  %v6126_v44 = vpop.f32.mrf.mxu0  ;;  %v6152_v45 = vpop.f32.mrf.mxu1 }
 0x3a7   :  { %2761 = vmatprep.mubr.bf16.mxu1 %v2430_v58  ;;  %v2039_v58 = vadd.f32 %v5933_v16, %v5984_v17  ;;  %v4268_v16 = vld [vmem:[%s6738_s7 + $0xb0] ss:$8 sps:$4 sm:$0xff]  }
 0x3a8   :  { %v6142_v18 = vpop.f32.mrf.mxu0  ;;  %v6156_v8 = vpop.f32.mrf.mxu1  ;;  %3463 = vmatpush2.bf16.msra.mxu0 %v4268_v16  ;;  %v2071_v16 = vadd.f32 %v6072_v38, %v5964_v55 }
 0x3a9   :  { %3464 = vmatprep.subr.bf16.mxu0 %v4273_v1  ;;  %v2065_v1 = vadd.f32 %v6034_v28, %v5984_v17 }
 0x3aa   :  { %v6166_v20 = vpop.f32.mrf.mxu1  ;;  %v2332_v24 = vmax.f32 %v2071_v16, 0.0 }
 0x3ab   :  { %v2329_v28 = vmax.f32 %v2065_v1, 0.0 }
 0x3ac   :  { %v6178_v11 = vpop.f32.mrf.mxu1  ;;  %3465 = vmatpush2.bf16.msra.mxu0 %v4271_v31  ;;  %v2081_v31 = vadd.f32 %v6106_v25, %v5964_v55 }
 0x3ae   :  { %2762 = vmatmul.mubr.bf16.gmra.mxu1 %v2429_v0  ;;  %v2319_v0 = vmax.f32 %v2039_v58, 0.0  ;;  %v2328_v58 = vmax.f32 %v2061_v50, 0.0  ;;  %v6188_v54 = vpop.f32.mrf.mxu1 }
 0x3af   :  { %2771 = vmatprep.mubr.bf16.mxu1 %v2432_v49  ;;  %v6154_v49 = vpop.f32.mrf.mxu0 }
 0x3b0   :  { %v2433_v53 = vpack.c.bf16 %v2319_v0, %v2317_v41  ;;  %v2055_v0 = vadd.f32 %v5998_v56, %v5984_v17  ;;  %v2067_v41 = vadd.f32 %v6050_v2, %v5964_v55  ;;  %v6192_v6 = vpop.f32.mrf.mxu1  ;;  %v2069_v56 = vadd.f32 %v6056_v37, %v5984_v17  ;;  %v4276_v37 = vld [vmem:[%s6738_s7 + $0x94] ss:$8 sps:$4 sm:$0xff]  }
 0x3b1   :  { %v6160_v23 = vpop.f32.mrf.mxu0  ;;  %3466 = vmatprep.subr.bf16.mxu0 %v4276_v37 }
 0x3b2   :  { %v2325_v50 = vmax.f32 %v2055_v0, 0.0  ;;  %v2330_v38 = vmax.f32 %v2067_v41, 0.0  ;;  %3467 = vmatpush2.bf16.msra.mxu0 %v4274_v51  ;;  %v2091_v41 = vadd.f32 %v6154_v49, %v5964_v55  ;;  %v4279_v49 = vld [vmem:[%s6738_s7 + $0x84] ss:$8 sps:$4 sm:$0xff]  }
 0x3b3   :  { %3468 = vmatprep.subr.bf16.mxu0 %v4279_v49 }
 0x3b4   :  { %v2437_v13 = vpack.c.bf16 %v2327_v27, %v2325_v50  ;;  %v2440_v2 = vpack.c.bf16 %v2332_v24, %v2330_v38  ;;  %v2075_v24 = vadd.f32 %v6084_v43, %v5984_v17 }
 0x3b6   :  { %2772 = vmatmul.mubr.bf16.gmra.mxu1 %v2431_v42  ;;  %v6176_v42 = vpop.f32.mrf.mxu0  ;;  %v2333_v43 = vmax.f32 %v2075_v24, 0.0 }
 0x3b7   :  { %2781 = vmatprep.mubr.bf16.mxu1 %v2434_v35  ;;  %v2326_v35 = vmax.f32 %v2057_v12, 0.0  ;;  %v6198_v12 = vpop.f32.mrf.mxu1 }
 0x3b8   :  { %v6182_v4 = vpop.f32.mrf.mxu0 }
 0x3b9   :  { %v2438_v47 = vpack.c.bf16 %v2328_v58, %v2326_v35  ;;  %v2077_v58 = vadd.f32 %v6090_v14, %v5964_v55  ;;  %v2331_v35 = vmax.f32 %v2069_v56, 0.0  ;;  %v6212_v25 = vpop.f32.mrf.mxu1  ;;  %v2079_v14 = vadd.f32 %v6100_v22, %v5984_v17  ;;  %v4277_v22 = vld [vmem:[%s6738_s7 + $0x80] ss:$8 sps:$4 sm:$0xff]  }
 0x3ba   :  { %3469 = vmatpush2.bf16.msra.mxu0 %v4277_v22 }
 0x3bb   :  { %v2334_v16 = vmax.f32 %v2077_v58, 0.0  ;;  %v6216_v0 = vpop.f32.mrf.mxu1  ;;  %v2335_v56 = vmax.f32 %v2079_v14, 0.0 }
 0x3bd   :  { %v6222_v38 = vpop.f32.mrf.mxu1  ;;  %v2441_v51 = vpack.c.bf16 %v2335_v56, %v2333_v43 }
 0x3be   :  { %2782 = vmatmul.mubr.bf16.gmra.mxu1 %v2433_v53  ;;  %v2100_v53 = vpop.f32.mrf.mxu0 }
 0x3bf   :  { %2791 = vmatprep.mubr.bf16.mxu1 %v2436_v29  ;;  %v6232_v1 = vpop.f32.mrf.mxu1 }
 0x3c0   :  { %v6194_v29 = vpop.f32.mrf.mxu0 }
 0x3c2   :  { %v2106_v34 = vpop.f32.mrf.mxu0 }
 0x3c4   :  { %v2108_v59 = vpop.f32.mrf.mxu0 }
 0x3c6   :  { %2792 = vmatmul.mubr.bf16.gmra.mxu1 %v2435_v40  ;;  %v2336_v40 = vmax.f32 %v2081_v31, 0.0  ;;  %v2110_v50 = vpop.f32.mrf.mxu0 }
 0x3c7   :  { %2801 = vmatprep.mubr.bf16.mxu1 %v2438_v47  ;;  %v2439_v47 = vpack.c.bf16 %v2331_v35, %v2329_v28  ;;  %v2101_v35 = vadd.f32 %v2100_v53, %v5964_v55  ;;  %v2085_v28 = vadd.f32 %v6120_v9, %v5984_v17  ;;  %v2099_v53 = vadd.f32 %v6182_v4, %v5984_v17 }
 0x3c8   :  { %v2442_v27 = vpack.c.bf16 %v2336_v40, %v2334_v16  ;;  %v2114_v31 = vpop.f32.mrf.mxu0  ;;  %v6239_v16 = vpop.f32.mrf.mxu1  ;;  %v2111_v56 = vadd.f32 %v2110_v50, %v5964_v55 }
 0x3c9   :  { %v2337_v24 = vmax.f32 %v2085_v28, 0.0 }
 0x3ca   :  { %v2116_v37 = vpop.f32.mrf.mxu0 }
 0x3ce   :  { %2802 = vmatmul.mubr.bf16.gmra.mxu1 %v2437_v13  ;;  %v2087_v13 = vadd.f32 %v6126_v44, %v5964_v55  ;;  %v2089_v44 = vadd.f32 %v6142_v18, %v5984_v17 }
 0x3cf   :  { %2811 = vmatprep.mubr.bf16.mxu1 %v2440_v2  ;;  %v2340_v2 = vmax.f32 %v2091_v41, 0.0  ;;  %v2118_v41 = vpop.f32.mrf.mxu0 }
 0x3d0   :  { %v2338_v58 = vmax.f32 %v2087_v13, 0.0  ;;  %v2339_v14 = vmax.f32 %v2089_v44, 0.0  ;;  %v6243_v13 = vpop.f32.mrf.mxu1 }
 0x3d1   :  { %v2120_v49 = vpop.f32.mrf.mxu0 }
 0x3d2   :  { %v2444_v40 = vpack.c.bf16 %v2340_v2, %v2338_v58  ;;  %v2443_v22 = vpack.c.bf16 %v2339_v14, %v2337_v24  ;;  %v6247_v9 = vpop.f32.mrf.mxu1  ;;  %v2107_v58 = vadd.f32 %v2106_v34, %v5964_v55  ;;  %v2109_v14 = vadd.f32 %v2108_v59, %v5984_v17 }
 0x3d3   :  { %v2124_v43 = vpop.f32.mrf.mxu0  ;;  %v2105_v24 = vadd.f32 %v6194_v29, %v5984_v17 }
 0x3d4   :  { %v6253_v44 = vpop.f32.mrf.mxu1  ;;  %v2346_v28 = vmax.f32 %v2107_v58, 0.0 }
 0x3d5   :  { %v2126_v4 = vpop.f32.mrf.mxu0 }
 0x3d6   :  { %2812 = vmatmul.mubr.bf16.gmra.mxu1 %v2439_v47  ;;  %v2097_v47 = vadd.f32 %v6176_v42, %v5964_v55  ;;  %v2095_v42 = vadd.f32 %v6160_v23, %v5984_v17  ;;  %v6256_v50 = vpop.f32.mrf.mxu1 }
 0x3d7   :  { %2821 = vmatprep.mubr.bf16.mxu1 %v2442_v27  ;;  %v2344_v27 = vmax.f32 %v2101_v35, 0.0  ;;  %v2348_v35 = vmax.f32 %v2111_v56, 0.0  ;;  %v2128_v34 = vpop.f32.mrf.mxu0 }
 0x3d8   :  { %v2342_v18 = vmax.f32 %v2097_v47, 0.0 }
 0x3d9   :  { %v2448_v23 = vpack.c.bf16 %v2348_v35, %v2346_v28 }
 0x3da   :  { %v2446_v2 = vpack.c.bf16 %v2344_v27, %v2342_v18  ;;  %v2121_v27 = vadd.f32 %v2120_v49, %v5964_v55  ;;  %v2117_v18 = vadd.f32 %v2116_v37, %v5964_v55  ;;  %v2119_v49 = vadd.f32 %v2118_v41, %v5984_v17 }
 0x3db   :  { %v2127_v37 = vadd.f32 %v2126_v4, %v5964_v55  ;;  %v2129_v41 = vadd.f32 %v2128_v34, %v5984_v17  ;;  %v2137_v4 = vadd.f32 %v5952_v57, %v5964_v55  ;;  %v2139_v34 = vadd.f32 %v5966_v48, %v5984_v17 }
 0x3dc   :  { %v2352_v56 = vmax.f32 %v2121_v27, 0.0  ;;  %v2350_v58 = vmax.f32 %v2117_v18, 0.0  ;;  %v2135_v57 = vadd.f32 %v5944_v39, %v5984_v17  ;;  %v2161_v39 = vadd.f32 %v6066_v7, %v5964_v55 }
 0x3dd   :  { %v2159_v7 = vadd.f32 %v6054_v36, %v5984_v17 }
 0x3de   :  { %2822 = vmatmul.mubr.bf16.gmra.mxu1 %v2441_v51  ;;  %v2343_v51 = vmax.f32 %v2099_v53, 0.0  ;;  %v6262_v53 = vpop.f32.mrf.mxu1  ;;  %v2450_v29 = vpack.c.bf16 %v2352_v56, %v2350_v58  ;;  %v2357_v48 = vmax.f32 %v2135_v57, 0.0 }
 0x3df   :  { %2831 = vmatprep.mubr.bf16.mxu1 %v2444_v40  ;;  %v2341_v40 = vmax.f32 %v2095_v42, 0.0  ;;  %v2130_v42 = vpop.f32.mrf.mxu0 }
 0x3e0   :  { %v6264_v59 = vpop.f32.mrf.mxu1  ;;  %v2131_v35 = vadd.f32 %v2130_v42, %v5964_v55  ;;  %v2355_v42 = vmax.f32 %v2129_v41, 0.0  ;;  %v2149_v41 = vadd.f32 %v6016_v26, %v5984_v17 }
 0x3e1   :  { %v2445_v47 = vpack.c.bf16 %v2343_v51, %v2341_v40  ;;  %v2115_v40 = vadd.f32 %v2114_v31, %v5984_v17  ;;  %v2125_v31 = vadd.f32 %v2124_v43, %v5984_v17  ;;  %v2151_v43 = vadd.f32 %v6026_v15, %v5964_v55 }
 0x3e2   :  { %v6269_v28 = vpop.f32.mrf.mxu1 }
 0x3e3   :  { %v2349_v27 = vmax.f32 %v2115_v40, 0.0 }
 0x3e6   :  { %2832 = vmatmul.mubr.bf16.gmra.mxu1 %v2443_v22  ;;  %v2347_v22 = vmax.f32 %v2109_v14, 0.0  ;;  %v2356_v14 = vmax.f32 %v2131_v35, 0.0  ;;  %v2358_v35 = vmax.f32 %v2137_v4, 0.0  ;;  %v2363_v4 = vmax.f32 %v2149_v41, 0.0 }
 0x3e7   :  { %2841 = vmatprep.mubr.bf16.mxu1 %v2446_v2  ;;  %v2345_v2 = vmax.f32 %v2105_v24, 0.0  ;;  %v2354_v24 = vmax.f32 %v2127_v37, 0.0  ;;  %v2147_v37 = vadd.f32 %v6004_v21, %v5964_v55  ;;  %v2145_v21 = vadd.f32 %v5988_v52, %v5984_v17 }
 0x3e8   :  { %v2171_v52 = vadd.f32 %v6102_v61, %v5964_v55  ;;  %v2169_v61 = vadd.f32 %v6096_v3, %v5984_v17 }
 0x3e9   :  { %v2447_v51 = vpack.c.bf16 %v2347_v22, %v2345_v2  ;;  %v2141_v22 = vadd.f32 %v5981_v5, %v5964_v55  ;;  %v2452_v56 = vpack.c.bf16 %v2356_v14, %v2354_v24  ;;  %v2362_v24 = vmax.f32 %v2147_v37, 0.0 }
 0x3ea   :  { %v2372_v57 = vmax.f32 %v2171_v52, 0.0  ;;  %v2371_v41 = vmax.f32 %v2169_v61, 0.0 }
 0x3ee   :  { %2842 = vmatmul.mubr.bf16.gmra.mxu1 %v2445_v47  ;;  %v2351_v47 = vmax.f32 %v2119_v49, 0.0  ;;  %v2353_v49 = vmax.f32 %v2125_v31, 0.0  ;;  %v2157_v31 = vadd.f32 %v6038_v32, %v5964_v55  ;;  %v2167_v32 = vadd.f32 %v6086_v10, %v5964_v55 }
 0x3ef   :  { %2851 = vmatprep.mubr.bf16.mxu1 %v2448_v23  ;;  %v6272_v23 = vpop.f32.mrf.mxu1  ;;  %v2165_v10 = vadd.f32 %v6074_v63, %v5984_v17  ;;  %v2191_v63 = vadd.f32 %v6188_v54, %v5964_v55  ;;  %v2189_v54 = vadd.f32 %v6178_v11, %v5984_v17 }
 0x3f0   :  { %v2449_v18 = vpack.c.bf16 %v2351_v47, %v2349_v27  ;;  %v2451_v5 = vpack.c.bf16 %v2355_v42, %v2353_v49  ;;  %v2359_v47 = vmax.f32 %v2139_v34, 0.0  ;;  %v2364_v27 = vmax.f32 %v2151_v43, 0.0 }
 0x3f1   :  { %v6278_v2 = vpop.f32.mrf.mxu1  ;;  %v2368_v42 = vmax.f32 %v2161_v39, 0.0  ;;  %v2366_v49 = vmax.f32 %v2157_v31, 0.0  ;;  %v2370_v36 = vmax.f32 %v2167_v32, 0.0 }
 0x3f3   :  { %v6282_v58 = vpop.f32.mrf.mxu1  ;;  %v2458_v34 = vpack.c.bf16 %v2368_v42, %v2366_v49 }
 0x3f6   :  { %2852 = vmatmul.mubr.bf16.gmra.mxu1 %v2447_v51  ;;  %v2360_v51 = vmax.f32 %v2141_v22, 0.0  ;;  %v2456_v22 = vpack.c.bf16 %v2364_v27, %v2362_v24  ;;  %v2460_v24 = vpack.c.bf16 %v2372_v57, %v2370_v36  ;;  %v2197_v57 = vadd.f32 %v6198_v12, %v5964_v55 }
 0x3f7   :  { %2861 = vmatprep.mubr.bf16.mxu1 %v2450_v29  ;;  %v6286_v29 = vpop.f32.mrf.mxu1  ;;  %v2207_v12 = vadd.f32 %v6232_v1, %v5964_v55  ;;  %v2205_v1 = vadd.f32 %v6222_v38, %v5984_v17  ;;  %v2231_v38 = vadd.f32 %v6278_v2, %v5964_v55 }
 0x3f8   :  { %v2454_v40 = vpack.c.bf16 %v2360_v51, %v2358_v35  ;;  %v2361_v51 = vmax.f32 %v2145_v21, 0.0  ;;  %v2369_v21 = vmax.f32 %v2165_v10, 0.0  ;;  %v2382_v11 = vmax.f32 %v2197_v57, 0.0 }
 0x3f9   :  { %v6294_v14 = vpop.f32.mrf.mxu1  ;;  %v2195_v10 = vadd.f32 %v6192_v6, %v5984_v17  ;;  %v2221_v6 = vadd.f32 %v6262_v53, %v5964_v55 }
 0x3fa   :  { %v2455_v35 = vpack.c.bf16 %v2363_v4, %v2361_v51  ;;  %v2459_v31 = vpack.c.bf16 %v2371_v41, %v2369_v21  ;;  %v2179_v4 = vadd.f32 %v6136_v33, %v5984_v17  ;;  %v2187_v51 = vadd.f32 %v6166_v20, %v5964_v55 }
 0x3fb   :  { %v6298_v15 = vpop.f32.mrf.mxu1  ;;  %v2185_v20 = vadd.f32 %v6156_v8, %v5984_v17  ;;  %v2211_v8 = vadd.f32 %v6243_v13, %v5964_v55  ;;  %v2209_v13 = vadd.f32 %v6239_v16, %v5984_v17 }
 0x3fc   :  { %v2375_v49 = vmax.f32 %v2179_v4, 0.0 }
 0x3fd   :  { %v2388_v21 = vmax.f32 %v2211_v8, 0.0 }
 0x3fe   :  { %2862 = vmatmul.mubr.bf16.gmra.mxu1 %v2449_v18  ;;  %v2453_v18 = vpack.c.bf16 %v2359_v47, %v2357_v48 }
 0x3ff   :  { %2871 = vmatprep.mubr.bf16.mxu1 %v2452_v56  ;;  %v6304_v56 = vpop.f32.mrf.mxu1 }
 0x401   :  { %v6308_v26 = vpop.f32.mrf.mxu1 }
 0x403   :  { %v6316_v43 = vpop.f32.mrf.mxu1 }
 0x405   :  { %v6320_v47 = vpop.f32.mrf.mxu1 }
 0x406   :  { %2872 = vmatmul.mubr.bf16.gmra.mxu1 %v2451_v5  ;;  %v2155_v5 = vadd.f32 %v6032_v19, %v5984_v17  ;;  %v2181_v19 = vadd.f32 %v6152_v45, %v5964_v55 }
 0x407   :  { %2881 = vmatprep.mubr.bf16.mxu1 %v2454_v40  ;;  %v2367_v40 = vmax.f32 %v2159_v7, 0.0  ;;  %v6324_v48 = vpop.f32.mrf.mxu1  ;;  %v2380_v7 = vmax.f32 %v2191_v63, 0.0 }
 0x408   :  { %v2365_v37 = vmax.f32 %v2155_v5, 0.0 }
 0x409   :  { %v6332_v39 = vpop.f32.mrf.mxu1 }
 0x40a   :  { %v2457_v27 = vpack.c.bf16 %v2367_v40, %v2365_v37  ;;  %v2379_v37 = vmax.f32 %v2189_v54, 0.0 }
 0x40b   :  { %v6336_v45 = vpop.f32.mrf.mxu1 }
 0x40e   :  { %2882 = vmatmul.mubr.bf16.gmra.mxu1 %v2453_v18  ;;  %v2177_v18 = vadd.f32 %v6124_v60, %v5964_v55  ;;  %v2175_v60 = vadd.f32 %v6108_v30, %v5984_v17  ;;  %v2201_v30 = vadd.f32 %v6216_v0, %v5964_v55  ;;  %v2199_v0 = vadd.f32 %v6212_v25, %v5984_v17 }
 0x40f   :  { %2891 = vmatprep.mubr.bf16.mxu1 %v2456_v22  ;;  %v2376_v22 = vmax.f32 %v2181_v19, 0.0  ;;  %v2386_v25 = vmax.f32 %v2207_v12, 0.0 }
 0x410   :  { %v2374_v3 = vmax.f32 %v2177_v18, 0.0  ;;  %v2373_v52 = vmax.f32 %v2175_v60, 0.0  ;;  %v2384_v36 = vmax.f32 %v2201_v30, 0.0  ;;  %v2383_v41 = vmax.f32 %v2199_v0, 0.0 }
 0x411   :  { %v2468_v63 = vpack.c.bf16 %v2388_v21, %v2386_v25  ;;  %v2387_v60 = vmax.f32 %v2209_v13, 0.0  ;;  %v2227_v30 = vadd.f32 %v6269_v28, %v5964_v55  ;;  %v2517_v28 = vld [vmem:[%s6737_s6] sm:$0x3]  ;;  %v2225_v0 = vadd.f32 %v6264_v59, %v5984_v17 }
 0x412   :  { %v2462_v42 = vpack.c.bf16 %v2376_v22, %v2374_v3  ;;  %v2461_v5 = vpack.c.bf16 %v2375_v49, %v2373_v52  ;;  %v2381_v3 = vmax.f32 %v2195_v10, 0.0  ;;  %v2392_v49 = vmax.f32 %v2221_v6, 0.0 }
 0x413   :  { %v2393_v21 = vmax.f32 %v2225_v0, 0.0 }
 0x416   :  { %2892 = vmatmul.mubr.bf16.gmra.mxu1 %v2455_v35  ;;  %v6344_v35 = vpop.f32.mrf.mxu1 }
 0x417   :  { %2901 = vmatprep.mubr.bf16.mxu1 %v2458_v34  ;;  %v2378_v34 = vmax.f32 %v2187_v51, 0.0 }
 0x418   :  { %v6346_v33 = vpop.f32.mrf.mxu1 }
 0x419   :  { %v2464_v32 = vpack.c.bf16 %v2380_v7, %v2378_v34  ;;  %v2385_v7 = vmax.f32 %v2205_v1, 0.0  ;;  %v2219_v34 = vadd.f32 %v6256_v50, %v5984_v17  ;;  %v2396_v50 = vmax.f32 %v2231_v38, 0.0 }
 0x41a   :  { %v6354_v40 = vpop.f32.mrf.mxu1  ;;  %v2251_v1 = vadd.f32 %v6320_v47, %v5964_v55 }
 0x41b   :  { %v2467_v52 = vpack.c.bf16 %v2387_v60, %v2385_v7 }
 0x41c   :  { %v6358_v61 = vpop.f32.mrf.mxu1 }
 0x41e   :  { %2902 = vmatmul.mubr.bf16.gmra.mxu1 %v2457_v27  ;;  %v2377_v27 = vmax.f32 %v2185_v20, 0.0  ;;  %v6366_v18 = vpop.f32.mrf.mxu1 }
 0x41f   :  { %2911 = vmatprep.mubr.bf16.mxu1 %v2460_v24  ;;  %v2466_v24 = vpack.c.bf16 %v2384_v36, %v2382_v11  ;;  %v2394_v36 = vmax.f32 %v2227_v30, 0.0  ;;  %v2241_v11 = vadd.f32 %v6298_v15, %v5964_v55  ;;  %v6417_v15 = vrot.slane %v2517_v28, %v6837_v46 }
 0x420   :  { %v2463_v19 = vpack.c.bf16 %v2379_v37, %v2377_v27  ;;  %v2229_v27 = vadd.f32 %v6272_v23, %v5984_v17  ;;  %v6414_v23 = vrot.slane %v2517_v28, %v6836_v62  ;;  %v2404_v30 = vmax.f32 %v2251_v1, 0.0 }
 0x422   :  { %v2395_v10 = vmax.f32 %v2229_v27, 0.0 }
 0x424   :  { %v2471_v13 = vpack.c.bf16 %v2395_v10, %v2393_v21 }
 0x426   :  { %2912 = vmatmul.mubr.bf16.gmra.mxu1 %v2459_v31  ;;  %v2465_v31 = vpack.c.bf16 %v2383_v41, %v2381_v3  ;;  %v2400_v41 = vmax.f32 %v2241_v11, 0.0 }
 0x427   :  { %2921 = vmatprep.mubr.bf16.mxu1 %v2462_v42  ;;  %v2217_v42 = vadd.f32 %v6253_v44, %v5964_v55  ;;  %v2215_v44 = vadd.f32 %v6247_v9, %v5984_v17 }
 0x429   :  { %v2390_v16 = vmax.f32 %v2217_v42, 0.0  ;;  %v2389_v57 = vmax.f32 %v2215_v44, 0.0 }
 0x42a   :  { %v6370_v22 = vpop.f32.mrf.mxu1 }
 0x42c   :  { %v6374_v4 = vpop.f32.mrf.mxu1 }
 0x42e   :  { %2922 = vmatmul.mubr.bf16.gmra.mxu1 %v2461_v5  ;;  %v6382_v51 = vpop.f32.mrf.mxu1  ;;  %v2470_v5 = vpack.c.bf16 %v2392_v49, %v2390_v16  ;;  %v2235_v49 = vadd.f32 %v6282_v58, %v5984_v17 }
 0x42f   :  { %2931 = vmatprep.mubr.bf16.mxu1 %v2464_v32  ;;  %v2391_v32 = vmax.f32 %v2219_v34, 0.0 }
 0x430   :  { %v6386_v53 = vpop.f32.mrf.mxu1 }
 0x431   :  { %v2469_v2 = vpack.c.bf16 %v2391_v32, %v2389_v57  ;;  %v2397_v32 = vmax.f32 %v2235_v49, 0.0 }
 0x436   :  { %2932 = vmatmul.mubr.bf16.gmra.mxu1 %v2463_v19  ;;  %v2472_v19 = vpack.c.bf16 %v2396_v50, %v2394_v36 }
 0x437   :  { %2941 = vmatprep.mubr.bf16.mxu1 %v2466_v24  ;;  %v2237_v24 = vadd.f32 %v6286_v29, %v5964_v55  ;;  %v2239_v29 = vadd.f32 %v6294_v14, %v5984_v17 }
 0x439   :  { %v2398_v25 = vmax.f32 %v2237_v24, 0.0  ;;  %v2399_v38 = vmax.f32 %v2239_v29, 0.0  ;;  %v2245_v24 = vadd.f32 %v6304_v56, %v5984_v17 }
 0x43b   :  { %v2474_v60 = vpack.c.bf16 %v2400_v41, %v2398_v25  ;;  %v2473_v27 = vpack.c.bf16 %v2399_v38, %v2397_v32  ;;  %v2257_v41 = vadd.f32 %v6332_v39, %v5964_v55  ;;  %v2259_v39 = vadd.f32 %v6336_v45, %v5984_v17 }
 0x43e   :  { %2942 = vmatmul.mubr.bf16.gmra.mxu1 %v2465_v31 }
 0x43f   :  { %2951 = vmatprep.mubr.bf16.mxu1 %v2468_v63 }
 0x446   :  { %v6392_v54 = vpop.f32.mrf.mxu1  ;;  %2952 = vmatmul.mubr.bf16.gmra.mxu1 %v2467_v52  ;;  %v2247_v52 = vadd.f32 %v6308_v26, %v5964_v55  ;;  %v2249_v26 = vadd.f32 %v6316_v43, %v5984_v17 }
 0x447   :  { %2961 = vmatprep.mubr.bf16.mxu1 %v2470_v5 }
 0x448   :  { %v6396_v20 = vpop.f32.mrf.mxu1  ;;  %v2402_v36 = vmax.f32 %v2247_v52, 0.0 }
 0x44a   :  { %v6398_v37 = vpop.f32.mrf.mxu1 }
 0x44c   :  { %v6402_v9 = vpop.f32.mrf.mxu1 }
 0x44e   :  { %v2723_v8 = vpop.f32.mrf.mxu1  ;;  %2962 = vmatmul.mubr.bf16.gmra.mxu1 %v2469_v2 }
 0x44f   :  { %2971 = vmatprep.mubr.bf16.mxu1 %v2472_v19  ;;  %v2724_v6 = vadd.f32 %v2723_v8, %v6417_v15  ;;  %v2261_v19 = vadd.f32 %v6344_v35, %v5964_v55  ;;  %v2476_v8 = vpack.c.bf16 %v2404_v30, %v2402_v36  ;;  %v2407_v30 = vmax.f32 %v2259_v39, 0.0 }
 0x450   :  { %v2725_v12 = vpop.f32.mrf.mxu1 }
 0x451   :  { %v2726_v59 = vadd.f32 %v2725_v12, %v6414_v23  ;;  %v3042_v5 = vmax.f32 %v2724_v6, 0.0 }
 0x452   :  { %v2727_v3 = vpop.f32.mrf.mxu1 }
 0x453   :  { %v2728_v31 = vadd.f32 %v2727_v3, %v6417_v15  ;;  %v3043_v34 = vmax.f32 %v2726_v59, 0.0  ;;  %v2403_v3 = vmax.f32 %v2249_v26, 0.0 }
 0x454   :  { %v2729_v63 = vpop.f32.mrf.mxu1 }
 0x455   :  { %v2730_v42 = vadd.f32 %v2729_v63, %v6414_v23  ;;  %v3044_v7 = vmax.f32 %v2728_v31, 0.0  ;;  %v2408_v31 = vmax.f32 %v2261_v19, 0.0  ;;  %v2406_v63 = vmax.f32 %v2257_v41, 0.0 }
 0x456   :  { %v2733_v16 = vpop.f32.mrf.mxu1  ;;  %2972 = vmatmul.mubr.bf16.gmra.mxu1 %v2471_v13  ;;  %v2401_v13 = vmax.f32 %v2245_v24, 0.0  ;;  %v2281_v19 = vadd.f32 %v6386_v53, %v5964_v55  ;;  %v2265_v24 = vadd.f32 %v6346_v33, %v5984_v17  ;;  %v2277_v41 = vadd.f32 %v6374_v4, %v5964_v55 }
 0x457   :  { %v3045_v14 = vmax.f32 %v2730_v42, 0.0  ;;  %2981 = vmatprep.mubr.bf16.mxu1 %v2474_v60  ;;  %v3170_v50 = vpack.c.bf16 %v3044_v7, %v3042_v5  ;;  %v2734_v11 = vadd.f32 %v2733_v16, %v6417_v15  ;;  %v2271_v7 = vadd.f32 %v6366_v18, %v5964_v55 }
 0x458   :  { %v2735_v44 = vpop.f32.mrf.mxu1  ;;  %v2475_v42 = vpack.c.bf16 %v2403_v3, %v2401_v13  ;;  %v2478_v52 = vpack.c.bf16 %v2408_v31, %v2406_v63  ;;  %v2267_v5 = vadd.f32 %v6354_v40, %v5964_v55  ;;  %v2269_v40 = vadd.f32 %v6358_v61, %v5984_v17 }
 0x459   :  { %v3171_v47 = vpack.c.bf16 %v3045_v14, %v3043_v34  ;;  %v2736_v58 = vadd.f32 %v2735_v44, %v6414_v23  ;;  %v3046_v25 = vmax.f32 %v2734_v11, 0.0  ;;  %v2255_v34 = vadd.f32 %v6324_v48, %v5984_v17 }
 0x45a   :  { %v2737_v57 = vpop.f32.mrf.mxu1  ;;  %v2409_v31 = vmax.f32 %v2265_v24, 0.0  ;;  %v2279_v4 = vadd.f32 %v6382_v51, %v5984_v17 }
 0x45b   :  { %v2738_v2 = vadd.f32 %v2737_v57, %v6417_v15  ;;  %3470 = vmatprep.mubr.bf16.mxu0 %v3171_v47  ;;  %v3047_v43 = vmax.f32 %v2736_v58, 0.0  ;;  %v2405_v57 = vmax.f32 %v2255_v34, 0.0 }
 0x45c   :  { %v2739_v28 = vpop.f32.mrf.mxu1  ;;  %3471 = vmatmul.mubr.bf16.vlgmr.msra.gmra.mxu0 %v3170_v50  ;;  %v2412_v50 = vmax.f32 %v2271_v7, 0.0 }
 0x45d   :  { %v2740_v0 = vadd.f32 %v2739_v28, %v6414_v23  ;;  %v3048_v10 = vmax.f32 %v2738_v2, 0.0  ;;  %v2410_v2 = vmax.f32 %v2267_v5, 0.0  ;;  %v2477_v26 = vpack.c.bf16 %v2407_v30, %v2405_v57 }
 0x45e   :  { %v2743_v12 = vpop.f32.mrf.mxu1  ;;  %2982 = vmatmul.mubr.bf16.gmra.mxu1 %v2473_v27 }
 0x45f   :  { %v3049_v21 = vmax.f32 %v2740_v0, 0.0  ;;  %2991 = vmatprep.mubr.bf16.mxu1 %v2476_v8  ;;  %v3172_v29 = vpack.c.bf16 %v3048_v10, %v3046_v25  ;;  %v2744_v60 = vadd.f32 %v2743_v12, %v6417_v15  ;;  %v2480_v8 = vpack.c.bf16 %v2412_v50, %v2410_v2 }
 0x460   :  { %v2745_v59 = vpop.f32.mrf.mxu1  ;;  %v2285_v2 = vadd.f32 %v6392_v54, %v5984_v17 }
 0x461   :  { %v3173_v35 = vpack.c.bf16 %v3049_v21, %v3047_v43  ;;  %v2746_v56 = vadd.f32 %v2745_v59, %v6414_v23  ;;  %v3050_v47 = vmax.f32 %v2744_v60, 0.0  ;;  %v2411_v21 = vmax.f32 %v2269_v40, 0.0 }
 0x462   :  { %v2747_v6 = vpop.f32.mrf.mxu1  ;;  %v2416_v59 = vmax.f32 %v2281_v19, 0.0 }
 0x463   :  { %v2748_v1 = vadd.f32 %v2747_v6, %v6417_v15  ;;  %3480 = vmatprep.mubr.bf16.mxu0 %v3173_v35  ;;  %v3051_v45 = vmax.f32 %v2746_v56, 0.0  ;;  %v2479_v63 = vpack.c.bf16 %v2411_v21, %v2409_v31 }
 0x464   :  { %v2749_v49 = vpop.f32.mrf.mxu1  ;;  %3481 = vmatmul.mubr.bf16.gmra.mxu0 %v3172_v29  ;;  %v2414_v29 = vmax.f32 %v2277_v41, 0.0 }
 0x465   :  { %v2750_v16 = vadd.f32 %v2749_v49, %v6414_v23  ;;  %v3052_v14 = vmax.f32 %v2748_v1, 0.0  ;;  %v2275_v49 = vadd.f32 %v6370_v22, %v5984_v17 }
 0x466   :  { %v2753_v38 = vpop.f32.mrf.mxu1  ;;  %2992 = vmatmul.mubr.bf16.gmra.mxu1 %v2475_v42  ;;  %v2291_v42 = vadd.f32 %v6402_v9, %v5964_v55  ;;  %v2482_v60 = vpack.c.bf16 %v2416_v59, %v2414_v29 }
 0x467   :  { %v3053_v44 = vmax.f32 %v2750_v16, 0.0  ;;  %3001 = vmatprep.mubr.bf16.mxu1 %v2478_v52  ;;  %v3174_v36 = vpack.c.bf16 %v3052_v14, %v3050_v47  ;;  %v2754_v11 = vadd.f32 %v2753_v38, %v6417_v15  ;;  %v2287_v52 = vadd.f32 %v6396_v20, %v5964_v55 }
 0x468   :  { %v2755_v32 = vpop.f32.mrf.mxu1  ;;  %v2415_v14 = vmax.f32 %v2279_v4, 0.0  ;;  %v2289_v55 = vadd.f32 %v6398_v37, %v5984_v17 }
 0x469   :  { %v3175_v18 = vpack.c.bf16 %v3053_v44, %v3051_v45  ;;  %v2756_v48 = vadd.f32 %v2755_v32, %v6414_v23  ;;  %v3054_v3 = vmax.f32 %v2754_v11, 0.0  ;;  %v2420_v45 = vmax.f32 %v2291_v42, 0.0 }
 0x46a   :  { %v2757_v58 = vpop.f32.mrf.mxu1  ;;  %v2413_v44 = vmax.f32 %v2275_v49, 0.0  ;;  %v2418_v32 = vmax.f32 %v2287_v52, 0.0  ;;  %v2419_v11 = vmax.f32 %v2289_v55, 0.0 }
 0x46b   :  { %v2758_v27 = vadd.f32 %v2757_v58, %v6417_v15  ;;  %3490 = vmatprep.mubr.bf16.mxu0 %v3175_v18  ;;  %v3055_v61 = vmax.f32 %v2756_v48, 0.0 }
 0x46c   :  { %v2759_v28 = vpop.f32.mrf.mxu1  ;;  %3491 = vmatmul.mubr.bf16.gmra.mxu0 %v3174_v36  ;;  %v2481_v18 = vpack.c.bf16 %v2415_v14, %v2413_v44  ;;  %v2484_v58 = vpack.c.bf16 %v2420_v45, %v2418_v32 }
 0x46d   :  { %v2760_v0 = vadd.f32 %v2759_v28, %v6414_v23  ;;  %v3056_v10 = vmax.f32 %v2758_v27, 0.0 }
 0x46e   :  { %v2763_v12 = vpop.f32.mrf.mxu1  ;;  %3002 = vmatmul.mubr.bf16.gmra.mxu1 %v2477_v26 }
 0x46f   :  { %v3057_v43 = vmax.f32 %v2760_v0, 0.0  ;;  %3011 = vmatprep.mubr.bf16.mxu1 %v2480_v8  ;;  %v3176_v35 = vpack.c.bf16 %v3056_v10, %v3054_v3  ;;  %v2764_v56 = vadd.f32 %v2763_v12, %v6417_v15  ;;  %v2417_v0 = vmax.f32 %v2285_v2, 0.0 }
 0x470   :  { %v2765_v25 = vpop.f32.mrf.mxu1 }
 0x471   :  { %v3177_v53 = vpack.c.bf16 %v3057_v43, %v3055_v61  ;;  %v2766_v33 = vadd.f32 %v2765_v25, %v6414_v23  ;;  %v3058_v38 = vmax.f32 %v2764_v56, 0.0  ;;  %v2483_v41 = vpack.c.bf16 %v2419_v11, %v2417_v0 }
 0x472   :  { %v2767_v13 = vpop.f32.mrf.mxu1 }
 0x473   :  { %v2768_v6 = vadd.f32 %v2767_v13, %v6417_v15  ;;  %3500 = vmatprep.mubr.bf16.mxu0 %v3177_v53  ;;  %v3059_v51 = vmax.f32 %v2766_v33, 0.0 }
 0x474   :  { %v2769_v1 = vpop.f32.mrf.mxu1  ;;  %3501 = vmatmul.mubr.bf16.gmra.mxu0 %v3176_v35 }
 0x475   :  { %v2770_v39 = vadd.f32 %v2769_v1, %v6414_v23  ;;  %v3060_v7 = vmax.f32 %v2768_v6, 0.0 }
 0x476   :  { %v2773_v16 = vpop.f32.mrf.mxu1  ;;  %3012 = vmatmul.mubr.bf16.gmra.mxu1 %v2479_v63 }
 0x477   :  { %v3061_v34 = vmax.f32 %v2770_v39, 0.0  ;;  %3021 = vmatprep.mubr.bf16.mxu1 %v2482_v60  ;;  %v3178_v30 = vpack.c.bf16 %v3060_v7, %v3058_v38  ;;  %v2774_v20 = vadd.f32 %v2773_v16, %v6417_v15 }
 0x478   :  { %v2775_v5 = vpop.f32.mrf.mxu1 }
 0x479   :  { %v3179_v9 = vpack.c.bf16 %v3061_v34, %v3059_v51  ;;  %v2776_v22 = vadd.f32 %v2775_v5, %v6414_v23  ;;  %v3062_v28 = vmax.f32 %v2774_v20, 0.0 }
 0x47a   :  { %v2777_v47 = vpop.f32.mrf.mxu1 }
 0x47b   :  { %v2778_v50 = vadd.f32 %v2777_v47, %v6417_v15  ;;  %3510 = vmatprep.mubr.bf16.mxu0 %v3179_v9  ;;  %v3063_v26 = vmax.f32 %v2776_v22, 0.0 }
 0x47c   :  { %v2779_v57 = vpop.f32.mrf.mxu1  ;;  %3511 = vmatmul.mubr.bf16.gmra.mxu0 %v3178_v30 }
 0x47d   :  { %v2780_v36 = vadd.f32 %v2779_v57, %v6414_v23  ;;  %v3064_v48 = vmax.f32 %v2778_v50, 0.0 }
 0x47e   :  { %v2783_v27 = vpop.f32.mrf.mxu1  ;;  %3022 = vmatmul.mubr.bf16.gmra.mxu1 %v2481_v18 }
 0x47f   :  { %v3065_v40 = vmax.f32 %v2780_v36, 0.0  ;;  %3031 = vmatprep.mubr.bf16.mxu1 %v2484_v58  ;;  %v3180_v8 = vpack.c.bf16 %v3064_v48, %v3062_v28  ;;  %v2784_v17 = vadd.f32 %v2783_v27, %v6417_v15 }
 0x480   :  { %v2785_v19 = vpop.f32.mrf.mxu1 }
 0x481   :  { %v3181_v37 = vpack.c.bf16 %v3065_v40, %v3063_v26  ;;  %v2786_v10 = vadd.f32 %v2785_v19, %v6414_v23  ;;  %v3066_v59 = vmax.f32 %v2784_v17, 0.0 }
 0x482   :  { %v2787_v24 = vpop.f32.mrf.mxu1 }
 0x483   :  { %v2788_v12 = vadd.f32 %v2787_v24, %v6417_v15  ;;  %3520 = vmatprep.mubr.bf16.mxu0 %v3181_v37  ;;  %v3067_v3 = vmax.f32 %v2786_v10, 0.0 }
 0x484   :  { %v2789_v54 = vpop.f32.mrf.mxu1  ;;  %3521 = vmatmul.mubr.bf16.gmra.mxu0 %v3180_v8 }
 0x485   :  { %v2790_v61 = vadd.f32 %v2789_v54, %v6414_v23  ;;  %v3068_v43 = vmax.f32 %v2788_v12, 0.0 }
 0x486   :  { %v2793_v21 = vpop.f32.mrf.mxu1  ;;  %3032 = vmatmul.mubr.bf16.gmra.mxu1 %v2483_v41 }
 0x487   :  { %v3069_v25 = vmax.f32 %v2790_v61, 0.0  ;;  %v3182_v35 = vpack.c.bf16 %v3068_v43, %v3066_v59  ;;  %v2794_v6 = vadd.f32 %v2793_v21, %v6417_v15 }
 0x488   :  { %v2795_v53 = vpop.f32.mrf.mxu1 }
 0x489   :  { %v3183_v31 = vpack.c.bf16 %v3069_v25, %v3067_v3  ;;  %v2796_v29 = vadd.f32 %v2795_v53, %v6414_v23  ;;  %v3070_v60 = vmax.f32 %v2794_v6, 0.0 }
 0x48a   :  { %v2797_v13 = vpop.f32.mrf.mxu1 }
 0x48b   :  { %v2798_v33 = vadd.f32 %v2797_v13, %v6417_v15  ;;  %3530 = vmatprep.mubr.bf16.mxu0 %v3183_v31  ;;  %v3071_v42 = vmax.f32 %v2796_v29, 0.0 }
 0x48c   :  { %v2799_v63 = vpop.f32.mrf.mxu1  ;;  %3531 = vmatmul.mubr.bf16.gmra.mxu0 %v3182_v35 }
 0x48d   :  { %v2800_v4 = vadd.f32 %v2799_v63, %v6414_v23  ;;  %v3072_v56 = vmax.f32 %v2798_v33, 0.0 }
 0x48e   :  { %v2803_v1 = vpop.f32.mrf.mxu1 }
 0x48f   :  { %v3073_v39 = vmax.f32 %v2800_v4, 0.0  ;;  %v3184_v16 = vpack.c.bf16 %v3072_v56, %v3070_v60  ;;  %v2804_v14 = vadd.f32 %v2803_v1, %v6417_v15 }
 0x490   :  { %v2805_v49 = vpop.f32.mrf.mxu1 }
 0x491   :  { %v3185_v7 = vpack.c.bf16 %v3073_v39, %v3071_v42  ;;  %v2806_v51 = vadd.f32 %v2805_v49, %v6414_v23  ;;  %v3074_v47 = vmax.f32 %v2804_v14, 0.0 }
 0x492   :  { %v2807_v52 = vpop.f32.mrf.mxu1 }
 0x493   :  { %v2808_v34 = vadd.f32 %v2807_v52, %v6417_v15  ;;  %3540 = vmatprep.mubr.bf16.mxu0 %v3185_v7  ;;  %v3075_v44 = vmax.f32 %v2806_v51, 0.0 }
 0x494   :  { %v2809_v38 = vpop.f32.mrf.mxu1  ;;  %3541 = vmatmul.mubr.bf16.gmra.mxu0 %v3184_v16 }
 0x495   :  { %v2810_v5 = vadd.f32 %v2809_v38, %v6414_v23  ;;  %v3076_v45 = vmax.f32 %v2808_v34, 0.0 }
 0x496   :  { %v2813_v9 = vpop.f32.mrf.mxu1 }
 0x497   :  { %v3077_v30 = vmax.f32 %v2810_v5, 0.0  ;;  %v3186_v50 = vpack.c.bf16 %v3076_v45, %v3074_v47  ;;  %v2814_v57 = vadd.f32 %v2813_v9, %v6417_v15 }
 0x498   :  { %v2815_v32 = vpop.f32.mrf.mxu1 }
 0x499   :  { %v3187_v22 = vpack.c.bf16 %v3077_v30, %v3075_v44  ;;  %v2816_v55 = vadd.f32 %v2815_v32, %v6414_v23  ;;  %v3078_v40 = vmax.f32 %v2814_v57, 0.0 }
 0x49a   :  { %v2817_v18 = vpop.f32.mrf.mxu1 }
 0x49b   :  { %v2818_v20 = vadd.f32 %v2817_v18, %v6417_v15  ;;  %3550 = vmatprep.mubr.bf16.mxu0 %v3187_v22  ;;  %v3079_v27 = vmax.f32 %v2816_v55, 0.0 }
 0x49c   :  { %v2819_v36 = vpop.f32.mrf.mxu1  ;;  %3551 = vmatmul.mubr.bf16.gmra.mxu0 %v3186_v50 }
 0x49d   :  { %v2820_v58 = vadd.f32 %v2819_v36, %v6414_v23  ;;  %v3080_v2 = vmax.f32 %v2818_v20, 0.0 }
 0x49e   :  { %v2823_v48 = vpop.f32.mrf.mxu1 }
 0x49f   :  { %v3081_v26 = vmax.f32 %v2820_v58, 0.0  ;;  %v3188_v19 = vpack.c.bf16 %v3080_v2, %v3078_v40  ;;  %v2824_v24 = vadd.f32 %v2823_v48, %v6417_v15 }
 0x4a0   :  { %v2825_v11 = vpop.f32.mrf.mxu1 }
 0x4a1   :  { %v3189_v28 = vpack.c.bf16 %v3081_v26, %v3079_v27  ;;  %v2826_v0 = vadd.f32 %v2825_v11, %v6414_v23  ;;  %v3082_v43 = vmax.f32 %v2824_v24, 0.0 }
 0x4a2   :  { %v2827_v37 = vpop.f32.mrf.mxu1 }
 0x4a3   :  { %v2828_v8 = vadd.f32 %v2827_v37, %v6417_v15  ;;  %3560 = vmatprep.mubr.bf16.mxu0 %v3189_v28  ;;  %v3083_v54 = vmax.f32 %v2826_v0, 0.0 }
 0x4a4   :  { %v2829_v10 = vpop.f32.mrf.mxu1  ;;  %3561 = vmatmul.mubr.bf16.gmra.mxu0 %v3188_v19 }
 0x4a5   :  { %v2830_v12 = vadd.f32 %v2829_v10, %v6414_v23  ;;  %v3084_v41 = vmax.f32 %v2828_v8, 0.0 }
 0x4a6   :  { %v2833_v17 = vpop.f32.mrf.mxu1 }
 0x4a7   :  { %v3085_v61 = vmax.f32 %v2830_v12, 0.0  ;;  %v3190_v25 = vpack.c.bf16 %v3084_v41, %v3082_v43  ;;  %v2834_v35 = vadd.f32 %v2833_v17, %v6417_v15 }
 0x4a8   :  { %v2835_v21 = vpop.f32.mrf.mxu1 }
 0x4a9   :  { %v3191_v3 = vpack.c.bf16 %v3085_v61, %v3083_v54  ;;  %v2836_v53 = vadd.f32 %v2835_v21, %v6414_v23  ;;  %v3086_v56 = vmax.f32 %v2834_v35, 0.0 }
 0x4aa   :  { %v2837_v59 = vpop.f32.mrf.mxu1 }
 0x4ab   :  { %v2838_v31 = vadd.f32 %v2837_v59, %v6417_v15  ;;  %3570 = vmatprep.mubr.bf16.mxu0 %v3191_v3  ;;  %v3087_v63 = vmax.f32 %v2836_v53, 0.0 }
 0x4ac   :  { %v2839_v13 = vpop.f32.mrf.mxu1  ;;  %3571 = vmatmul.mubr.bf16.gmra.mxu0 %v3190_v25 }
 0x4ad   :  { %v2840_v29 = vadd.f32 %v2839_v13, %v6414_v23  ;;  %v3088_v33 = vmax.f32 %v2838_v31, 0.0 }
 0x4ae   :  { %v2843_v6 = vpop.f32.mrf.mxu1 }
 0x4af   :  { %v3089_v4 = vmax.f32 %v2840_v29, 0.0  ;;  %v3192_v39 = vpack.c.bf16 %v3088_v33, %v3086_v56  ;;  %v2844_v16 = vadd.f32 %v2843_v6, %v6417_v15 }
 0x4b0   :  { %v2845_v1 = vpop.f32.mrf.mxu1 }
 0x4b1   :  { %v3193_v42 = vpack.c.bf16 %v3089_v4, %v3087_v63  ;;  %v2846_v49 = vadd.f32 %v2845_v1, %v6414_v23  ;;  %v3090_v45 = vmax.f32 %v2844_v16, 0.0 }
 0x4b2   :  { %v2847_v60 = vpop.f32.mrf.mxu1 }
 0x4b3   :  { %v2848_v7 = vadd.f32 %v2847_v60, %v6417_v15  ;;  %3580 = vmatprep.mubr.bf16.mxu0 %v3193_v42  ;;  %v3091_v38 = vmax.f32 %v2846_v49, 0.0 }
 0x4b4   :  { %v2849_v52 = vpop.f32.mrf.mxu1  ;;  %3581 = vmatmul.mubr.bf16.gmra.mxu0 %v3192_v39 }
 0x4b5   :  { %v2850_v51 = vadd.f32 %v2849_v52, %v6414_v23  ;;  %v3092_v34 = vmax.f32 %v2848_v7, 0.0 }
 0x4b6   :  { %v2853_v14 = vpop.f32.mrf.mxu1 }
 0x4b7   :  { %v3093_v5 = vmax.f32 %v2850_v51, 0.0  ;;  %v3194_v30 = vpack.c.bf16 %v3092_v34, %v3090_v45  ;;  %v2854_v50 = vadd.f32 %v2853_v14, %v6417_v15 }
 0x4b8   :  { %v2855_v9 = vpop.f32.mrf.mxu1 }
 0x4b9   :  { %v3195_v44 = vpack.c.bf16 %v3093_v5, %v3091_v38  ;;  %v2856_v32 = vadd.f32 %v2855_v9, %v6414_v23  ;;  %v3094_v2 = vmax.f32 %v2854_v50, 0.0 }
 0x4ba   :  { %v2857_v47 = vpop.f32.mrf.mxu1 }
 0x4bb   :  { %v2858_v22 = vadd.f32 %v2857_v47, %v6417_v15  ;;  %3590 = vmatprep.mubr.bf16.mxu0 %v3195_v44  ;;  %v3095_v36 = vmax.f32 %v2856_v32, 0.0 }
 0x4bc   :  { %v2859_v18 = vpop.f32.mrf.mxu1  ;;  %3591 = vmatmul.mubr.bf16.gmra.mxu0 %v3194_v30 }
 0x4bd   :  { %v2860_v55 = vadd.f32 %v2859_v18, %v6414_v23  ;;  %v3096_v20 = vmax.f32 %v2858_v22, 0.0 }
 0x4be   :  { %v2863_v57 = vpop.f32.mrf.mxu1 }
 0x4bf   :  { %v3097_v58 = vmax.f32 %v2860_v55, 0.0  ;;  %v3196_v26 = vpack.c.bf16 %v3096_v20, %v3094_v2  ;;  %v2864_v19 = vadd.f32 %v2863_v57, %v6417_v15 }
 0x4c0   :  { %v2865_v48 = vpop.f32.mrf.mxu1 }
 0x4c1   :  { %v3197_v27 = vpack.c.bf16 %v3097_v58, %v3095_v36  ;;  %v2866_v11 = vadd.f32 %v2865_v48, %v6414_v23  ;;  %v3098_v41 = vmax.f32 %v2864_v19, 0.0 }
 0x4c2   :  { %v2867_v40 = vpop.f32.mrf.mxu1 }
 0x4c3   :  { %v2868_v28 = vadd.f32 %v2867_v40, %v6417_v15  ;;  %3600 = vmatprep.mubr.bf16.mxu0 %v3197_v27  ;;  %v3099_v10 = vmax.f32 %v2866_v11, 0.0 }
 0x4c4   :  { %v2869_v37 = vpop.f32.mrf.mxu1  ;;  %3601 = vmatmul.mubr.bf16.gmra.mxu0 %v3196_v26 }
 0x4c5   :  { %v2870_v0 = vadd.f32 %v2869_v37, %v6414_v23  ;;  %v3100_v8 = vmax.f32 %v2868_v28, 0.0 }
 0x4c6   :  { %v2873_v24 = vpop.f32.mrf.mxu1 }
 0x4c7   :  { %v3101_v12 = vmax.f32 %v2870_v0, 0.0  ;;  %v3198_v61 = vpack.c.bf16 %v3100_v8, %v3098_v41  ;;  %v2874_v25 = vadd.f32 %v2873_v24, %v6417_v15 }
 0x4c8   :  { %v2875_v17 = vpop.f32.mrf.mxu1 }
 0x4c9   :  { %v3199_v54 = vpack.c.bf16 %v3101_v12, %v3099_v10  ;;  %v2876_v21 = vadd.f32 %v2875_v17, %v6414_v23  ;;  %v3102_v33 = vmax.f32 %v2874_v25, 0.0 }
 0x4ca   :  { %v2877_v43 = vpop.f32.mrf.mxu1 }
 0x4cb   :  { %v2878_v3 = vadd.f32 %v2877_v43, %v6417_v15  ;;  %3610 = vmatprep.mubr.bf16.mxu0 %v3199_v54  ;;  %v3103_v13 = vmax.f32 %v2876_v21, 0.0 }
 0x4cc   :  { %v2879_v59 = vpop.f32.mrf.mxu1  ;;  %3611 = vmatmul.mubr.bf16.gmra.mxu0 %v3198_v61 }
 0x4cd   :  { %v2880_v53 = vadd.f32 %v2879_v59, %v6414_v23  ;;  %v3104_v31 = vmax.f32 %v2878_v3, 0.0 }
 0x4ce   :  { %v2883_v35 = vpop.f32.mrf.mxu1 }
 0x4cf   :  { %v3105_v29 = vmax.f32 %v2880_v53, 0.0  ;;  %v3200_v4 = vpack.c.bf16 %v3104_v31, %v3102_v33  ;;  %v2884_v39 = vadd.f32 %v2883_v35, %v6417_v15 }
 0x4d0   :  { %v2885_v6 = vpop.f32.mrf.mxu1 }
 0x4d1   :  { %v3201_v63 = vpack.c.bf16 %v3105_v29, %v3103_v13  ;;  %v2886_v1 = vadd.f32 %v2885_v6, %v6414_v23  ;;  %v3106_v34 = vmax.f32 %v2884_v39, 0.0 }
 0x4d2   :  { %v2887_v56 = vpop.f32.mrf.mxu1 }
 0x4d3   :  { %v2888_v42 = vadd.f32 %v2887_v56, %v6417_v15  ;;  %3620 = vmatprep.mubr.bf16.mxu0 %v3201_v63  ;;  %v3107_v52 = vmax.f32 %v2886_v1, 0.0 }
 0x4d4   :  { %v2889_v60 = vpop.f32.mrf.mxu1  ;;  %3621 = vmatmul.mubr.bf16.gmra.mxu0 %v3200_v4 }
 0x4d5   :  { %v2890_v49 = vadd.f32 %v2889_v60, %v6414_v23  ;;  %v3108_v7 = vmax.f32 %v2888_v42, 0.0 }
 0x4d6   :  { %v2893_v16 = vpop.f32.mrf.mxu1 }
 0x4d7   :  { %v3109_v51 = vmax.f32 %v2890_v49, 0.0  ;;  %v3202_v5 = vpack.c.bf16 %v3108_v7, %v3106_v34  ;;  %v2894_v30 = vadd.f32 %v2893_v16, %v6417_v15 }
 0x4d8   :  { %v2895_v14 = vpop.f32.mrf.mxu1 }
 0x4d9   :  { %v3203_v38 = vpack.c.bf16 %v3109_v51, %v3107_v52  ;;  %v2896_v9 = vadd.f32 %v2895_v14, %v6414_v23  ;;  %v3110_v20 = vmax.f32 %v2894_v30, 0.0 }
 0x4da   :  { %v2897_v45 = vpop.f32.mrf.mxu1 }
 0x4db   :  { %v2898_v44 = vadd.f32 %v2897_v45, %v6417_v15  ;;  %3630 = vmatprep.mubr.bf16.mxu0 %v3203_v38  ;;  %v3111_v18 = vmax.f32 %v2896_v9, 0.0 }
 0x4dc   :  { %v2899_v47 = vpop.f32.mrf.mxu1  ;;  %3631 = vmatmul.mubr.bf16.gmra.mxu0 %v3202_v5 }
 0x4dd   :  { %v2900_v32 = vadd.f32 %v2899_v47, %v6414_v23  ;;  %v3112_v22 = vmax.f32 %v2898_v44, 0.0 }
 0x4de   :  { %v2903_v50 = vpop.f32.mrf.mxu1 }
 0x4df   :  { %v3113_v55 = vmax.f32 %v2900_v32, 0.0  ;;  %v3204_v58 = vpack.c.bf16 %v3112_v22, %v3110_v20  ;;  %v2904_v26 = vadd.f32 %v2903_v50, %v6417_v15 }
 0x4e0   :  { %v2905_v57 = vpop.f32.mrf.mxu1 }
 0x4e1   :  { %v3205_v36 = vpack.c.bf16 %v3113_v55, %v3111_v18  ;;  %v2906_v48 = vadd.f32 %v2905_v57, %v6414_v23  ;;  %v3114_v8 = vmax.f32 %v2904_v26, 0.0 }
 0x4e2   :  { %v2907_v2 = vpop.f32.mrf.mxu1 }
 0x4e3   :  { %v2908_v27 = vadd.f32 %v2907_v2, %v6417_v15  ;;  %3640 = vmatprep.mubr.bf16.mxu0 %v3205_v36  ;;  %v3115_v37 = vmax.f32 %v2906_v48, 0.0 }
 0x4e4   :  { %v2909_v40 = vpop.f32.mrf.mxu1  ;;  %3641 = vmatmul.mubr.bf16.gmra.mxu0 %v3204_v58 }
 0x4e5   :  { %v2910_v11 = vadd.f32 %v2909_v40, %v6414_v23  ;;  %v3116_v28 = vmax.f32 %v2908_v27, 0.0 }
 0x4e6   :  { %v2913_v19 = vpop.f32.mrf.mxu1 }
 0x4e7   :  { %v3117_v0 = vmax.f32 %v2910_v11, 0.0  ;;  %v3206_v12 = vpack.c.bf16 %v3116_v28, %v3114_v8  ;;  %v2914_v61 = vadd.f32 %v2913_v19, %v6417_v15 }
 0x4e8   :  { %v2915_v24 = vpop.f32.mrf.mxu1 }
 0x4e9   :  { %v3207_v10 = vpack.c.bf16 %v3117_v0, %v3115_v37  ;;  %v2916_v17 = vadd.f32 %v2915_v24, %v6414_v23  ;;  %v3118_v31 = vmax.f32 %v2914_v61, 0.0 }
 0x4ea   :  { %v2917_v41 = vpop.f32.mrf.mxu1 }
 0x4eb   :  { %v2918_v54 = vadd.f32 %v2917_v41, %v6417_v15  ;;  %3650 = vmatprep.mubr.bf16.mxu0 %v3207_v10  ;;  %v3119_v59 = vmax.f32 %v2916_v17, 0.0 }
 0x4ec   :  { %v2919_v43 = vpop.f32.mrf.mxu1  ;;  %3651 = vmatmul.mubr.bf16.gmra.mxu0 %v3206_v12 }
 0x4ed   :  { %v2920_v21 = vadd.f32 %v2919_v43, %v6414_v23  ;;  %v3120_v3 = vmax.f32 %v2918_v54, 0.0 }
 0x4ee   :  { %v2923_v25 = vpop.f32.mrf.mxu1 }
 0x4ef   :  { %v3121_v53 = vmax.f32 %v2920_v21, 0.0  ;;  %v3208_v29 = vpack.c.bf16 %v3120_v3, %v3118_v31  ;;  %v2924_v4 = vadd.f32 %v2923_v25, %v6417_v15 }
 0x4f0   :  { %v2925_v35 = vpop.f32.mrf.mxu1 }
 0x4f1   :  { %v3209_v13 = vpack.c.bf16 %v3121_v53, %v3119_v59  ;;  %v2926_v6 = vadd.f32 %v2925_v35, %v6414_v23  ;;  %v3122_v7 = vmax.f32 %v2924_v4, 0.0 }
 0x4f2   :  { %v2927_v33 = vpop.f32.mrf.mxu1 }
 0x4f3   :  { %v2928_v63 = vadd.f32 %v2927_v33, %v6417_v15  ;;  %3660 = vmatprep.mubr.bf16.mxu0 %v3209_v13  ;;  %v3123_v60 = vmax.f32 %v2926_v6, 0.0 }
 0x4f4   :  { %v2929_v56 = vpop.f32.mrf.mxu1  ;;  %3661 = vmatmul.mubr.bf16.gmra.mxu0 %v3208_v29 }
 0x4f5   :  { %v2930_v1 = vadd.f32 %v2929_v56, %v6414_v23  ;;  %v3124_v42 = vmax.f32 %v2928_v63, 0.0  ;;  %v3266_v56 = vld [vmem:[%s6739_s8] sm:$0x3]  ;;  %s4349_s8 = smov [#allocation5]  }
 0x4f6   :  { %v2933_v39 = vpop.f32.mrf.mxu1  ;;  %s3924_s28 = sshll.u32 %s4349_s8, 4  ;;  %s3925_s28 = int_to_ptr.vmem [resolvable:$true] %s3924_s28 }
 0x4f7   :  { %v3125_v49 = vmax.f32 %v2930_v1, 0.0  ;;  %v3210_v51 = vpack.c.bf16 %v3124_v42, %v3122_v7  ;;  %v2934_v5 = vadd.f32 %v2933_v39, %v6417_v15  ;;  %v6567_v7 = vrot.slane %v3266_v56, %v6837_v46  ;;  %s4318_s29 = scalar_lea.vmem %s3925_s28, 16384  ;;  %p4323_p6 = scmp.lt.s32.totalorder %s3925_s28, %s3925_s28 }
 0x4f8   :  { %v2935_v16 = vpop.f32.mrf.mxu1  ;;  %p4319_p5 = scmp.ne.s32.totalorder %s3925_s28, %s4318_s29  ;;  %p4324_p7 = scmp.lt.s32.totalorder %s4318_s29, %s4318_s29 }
 0x4f9   :  { %v3211_v52 = vpack.c.bf16 %v3125_v49, %v3123_v60  ;;  %v2936_v14 = vadd.f32 %v2935_v16, %v6414_v23  ;;  %v3126_v22 = vmax.f32 %v2934_v5, 0.0 }
 0x4fa   :  { %v2937_v34 = vpop.f32.mrf.mxu1  ;;  %p4325_p8 = por %p4324_p7, %p4323_p6 }
 0x4fb   :  { %v2938_v38 = vadd.f32 %v2937_v34, %v6417_v15  ;;  %3670 = vmatprep.mubr.bf16.mxu0 %v3211_v52  ;;  %v3127_v47 = vmax.f32 %v2936_v14, 0.0  ;;  %v6572_v14 = vrot.slane %v3266_v56, %v6836_v62 }
 0x4fc   :  { %v2939_v45 = vpop.f32.mrf.mxu1  ;;  %3671 = vmatmul.mubr.bf16.gmra.mxu0 %v3210_v51  ;;  %p4326_p9 = pnand %p4325_p8, %p4319_p5 }
 0x4fd   :  { %v2940_v9 = vadd.f32 %v2939_v45, %v6414_v23  ;;  %v3128_v44 = vmax.f32 %v2938_v38, 0.0 }
 0x4fe   :  { %v2943_v30 = vpop.f32.mrf.mxu1 }
 0x4ff   :  { %v3129_v32 = vmax.f32 %v2940_v9, 0.0  ;;  %v3212_v55 = vpack.c.bf16 %v3128_v44, %v3126_v22  ;;  %v2944_v58 = vadd.f32 %v2943_v30, %v6417_v15 }
 0x500   :  { %v2945_v50 = vpop.f32.mrf.mxu1 }
 0x501   :  { %v3213_v18 = vpack.c.bf16 %v3129_v32, %v3127_v47  ;;  %v2946_v57 = vadd.f32 %v2945_v50, %v6414_v23  ;;  %v3130_v28 = vmax.f32 %v2944_v58, 0.0 }
 0x502   :  { %v2947_v20 = vpop.f32.mrf.mxu1 }
 0x503   :  { %v2948_v36 = vadd.f32 %v2947_v20, %v6417_v15  ;;  %3680 = vmatprep.mubr.bf16.mxu0 %v3213_v18  ;;  %v3131_v40 = vmax.f32 %v2946_v57, 0.0 }
 0x504   :  { %v2949_v2 = vpop.f32.mrf.mxu1  ;;  %3681 = vmatmul.mubr.bf16.gmra.mxu0 %v3212_v55 }
 0x505   :  { %v2950_v48 = vadd.f32 %v2949_v2, %v6414_v23  ;;  %v3132_v27 = vmax.f32 %v2948_v36, 0.0 }
 0x506   :  { %v2953_v26 = vpop.f32.mrf.mxu1 }
 0x507   :  { %v3133_v11 = vmax.f32 %v2950_v48, 0.0  ;;  %v3214_v0 = vpack.c.bf16 %v3132_v27, %v3130_v28  ;;  %v2954_v12 = vadd.f32 %v2953_v26, %v6417_v15 }
 0x508   :  { %v2955_v19 = vpop.f32.mrf.mxu1 }
 0x509   :  { %v3215_v37 = vpack.c.bf16 %v3133_v11, %v3131_v40  ;;  %v2956_v24 = vadd.f32 %v2955_v19, %v6414_v23  ;;  %v3134_v3 = vmax.f32 %v2954_v12, 0.0 }
 0x50a   :  { %v2957_v8 = vpop.f32.mrf.mxu1 }
 0x50b   :  { %v2958_v10 = vadd.f32 %v2957_v8, %v6417_v15  ;;  %3690 = vmatprep.mubr.bf16.mxu0 %v3215_v37  ;;  %v3135_v43 = vmax.f32 %v2956_v24, 0.0 }
 0x50c   :  { %v2959_v41 = vpop.f32.mrf.mxu1  ;;  %3691 = vmatmul.mubr.bf16.gmra.mxu0 %v3214_v0 }
 0x50d   :  { %v2960_v17 = vadd.f32 %v2959_v41, %v6414_v23  ;;  %v3136_v54 = vmax.f32 %v2958_v10, 0.0 }
 0x50e   :  { %v2963_v61 = vpop.f32.mrf.mxu1 }
 0x50f   :  { %v3137_v21 = vmax.f32 %v2960_v17, 0.0  ;;  %v3216_v53 = vpack.c.bf16 %v3136_v54, %v3134_v3  ;;  %v2964_v29 = vadd.f32 %v2963_v61, %v6417_v15 }
 0x510   :  { %v2965_v25 = vpop.f32.mrf.mxu1 }
 0x511   :  { %v3217_v59 = vpack.c.bf16 %v3137_v21, %v3135_v43  ;;  %v2966_v35 = vadd.f32 %v2965_v25, %v6414_v23  ;;  %v3138_v39 = vmax.f32 %v2964_v29, 0.0 }
 0x512   :  { %v2967_v31 = vpop.f32.mrf.mxu1 }
 0x513   :  { %v2968_v13 = vadd.f32 %v2967_v31, %v6417_v15  ;;  %3700 = vmatprep.mubr.bf16.mxu0 %v3217_v59  ;;  %v3139_v1 = vmax.f32 %v2966_v35, 0.0 }
 0x514   :  { %v2969_v33 = vpop.f32.mrf.mxu1  ;;  %3701 = vmatmul.mubr.bf16.gmra.mxu0 %v3216_v53 }
 0x515   :  { %v2970_v6 = vadd.f32 %v2969_v33, %v6414_v23  ;;  %v3140_v63 = vmax.f32 %v2968_v13, 0.0 }
 0x516   :  { %v2973_v4 = vpop.f32.mrf.mxu1 }
 0x517   :  { %v3141_v42 = vmax.f32 %v2970_v6, 0.0  ;;  %v3218_v16 = vpack.c.bf16 %v3140_v63, %v3138_v39  ;;  %v2974_v38 = vadd.f32 %v2973_v4, %v6417_v15 }
 0x518   :  { %v2975_v60 = vpop.f32.mrf.mxu1 }
 0x519   :  { %v3219_v49 = vpack.c.bf16 %v3141_v42, %v3139_v1  ;;  %v2976_v51 = vadd.f32 %v2975_v60, %v6414_v23  ;;  %v3142_v18 = vmax.f32 %v2974_v38, 0.0 }
 0x51a   :  { %v2977_v52 = vpop.f32.mrf.mxu1 }
 0x51b   :  { %v2978_v34 = vadd.f32 %v2977_v52, %v6417_v15  ;;  %3710 = vmatprep.mubr.bf16.mxu0 %v3219_v49  ;;  %v3143_v32 = vmax.f32 %v2976_v51, 0.0 }
 0x51c   :  { %v2979_v5 = vpop.f32.mrf.mxu1  ;;  %v3472_v45 = vpop.f32.mrf.mxu0  ;;  %3711 = vmatmul.mubr.bf16.gmra.mxu0 %v3218_v16 }
 0x51d   :  { %v2980_v9 = vadd.f32 %v2979_v5, %v6414_v23  ;;  %v3473_v46 = vadd.f32 %v3472_v45, %v6567_v7  ;;  %v3144_v44 = vmax.f32 %v2978_v34, 0.0 }
 0x51e   :  { %v2983_v30 = vpop.f32.mrf.mxu1  ;;  %v3474_v47 = vpop.f32.mrf.mxu0 }
 0x51f   :  { %v3145_v22 = vmax.f32 %v2980_v9, 0.0  ;;  %3791 = vst [vmem:[#allocation5] sm:$0xff] %v3473_v46  ;;  %v3475_v50 = vadd.f32 %v3474_v47, %v6572_v14  ;;  %v3220_v36 = vpack.c.bf16 %v3144_v44, %v3142_v18  ;;  %v2984_v40 = vadd.f32 %v2983_v30, %v6417_v15 }
 0x520   :  { %v2985_v62 = vpop.f32.mrf.mxu1  ;;  %v3476_v55 = vpop.f32.mrf.mxu0 }
 0x521   :  { %v3221_v20 = vpack.c.bf16 %v3145_v22, %v3143_v32  ;;  %3792 = vst [vmem:[#allocation5 + $0x8] sm:$0xff] %v3475_v50  ;;  %v3477_v57 = vadd.f32 %v3476_v55, %v6567_v7  ;;  %v2986_v48 = vadd.f32 %v2985_v62, %v6414_v23  ;;  %v3146_v17 = vmax.f32 %v2984_v40, 0.0 }
 0x522   :  { %v2987_v58 = vpop.f32.mrf.mxu1  ;;  %v3478_v2 = vpop.f32.mrf.mxu0 }
 0x523   :  { %3793 = vst [vmem:[#allocation5 + $0x10] sm:$0xff] %v3477_v57  ;;  %v2988_v27 = vadd.f32 %v2987_v58, %v6417_v15  ;;  %v3479_v26 = vadd.f32 %v3478_v2, %v6572_v14  ;;  %3720 = vmatprep.mubr.bf16.mxu0 %v3221_v20  ;;  %v3147_v10 = vmax.f32 %v2986_v48, 0.0 }
 0x524   :  { %v2989_v11 = vpop.f32.mrf.mxu1  ;;  %v3482_v28 = vpop.f32.mrf.mxu0  ;;  %3721 = vmatmul.mubr.bf16.gmra.mxu0 %v3220_v36 }
 0x525   :  { %3794 = vst [vmem:[#allocation5 + $0x18] sm:$0xff] %v3479_v26  ;;  %v2990_v19 = vadd.f32 %v2989_v11, %v6414_v23  ;;  %v3483_v37 = vadd.f32 %v3482_v28, %v6567_v7  ;;  %v3148_v0 = vmax.f32 %v2988_v27, 0.0 }
 0x526   :  { %v2993_v8 = vpop.f32.mrf.mxu1  ;;  %v3484_v24 = vpop.f32.mrf.mxu0 }
 0x527   :  { %v3149_v12 = vmax.f32 %v2990_v19, 0.0  ;;  %3795 = vst [vmem:[#allocation5 + $0x20] sm:$0xff] %v3483_v37  ;;  %v3485_v41 = vadd.f32 %v3484_v24, %v6572_v14  ;;  %v3222_v3 = vpack.c.bf16 %v3148_v0, %v3146_v17  ;;  %v2994_v13 = vadd.f32 %v2993_v8, %v6417_v15 }
 0x528   :  { %v2995_v54 = vpop.f32.mrf.mxu1  ;;  %v3486_v61 = vpop.f32.mrf.mxu0 }
 0x529   :  { %v3223_v43 = vpack.c.bf16 %v3149_v12, %v3147_v10  ;;  %3796 = vst [vmem:[#allocation5 + $0x28] sm:$0xff] %v3485_v41  ;;  %v3487_v21 = vadd.f32 %v3486_v61, %v6567_v7  ;;  %v2996_v53 = vadd.f32 %v2995_v54, %v6414_v23  ;;  %v3150_v49 = vmax.f32 %v2994_v13, 0.0 }
 0x52a   :  { %v2997_v25 = vpop.f32.mrf.mxu1  ;;  %v3488_v59 = vpop.f32.mrf.mxu0 }
 0x52b   :  { %3797 = vst [vmem:[#allocation5 + $0x30] sm:$0xff] %v3487_v21  ;;  %v2998_v31 = vadd.f32 %v2997_v25, %v6417_v15  ;;  %v3489_v35 = vadd.f32 %v3488_v59, %v6572_v14  ;;  %3730 = vmatprep.mubr.bf16.mxu0 %v3223_v43  ;;  %v3151_v42 = vmax.f32 %v2996_v53, 0.0 }
 0x52c   :  { %v2999_v29 = vpop.f32.mrf.mxu1  ;;  %v3492_v33 = vpop.f32.mrf.mxu0  ;;  %3731 = vmatmul.mubr.bf16.gmra.mxu0 %v3222_v3 }
 0x52d   :  { %3798 = vst [vmem:[#allocation5 + $0x38] sm:$0xff] %v3489_v35  ;;  %v3000_v6 = vadd.f32 %v2999_v29, %v6414_v23  ;;  %v3493_v63 = vadd.f32 %v3492_v33, %v6567_v7  ;;  %v3152_v4 = vmax.f32 %v2998_v31, 0.0 }
 0x52e   :  { %v3003_v56 = vpop.f32.mrf.mxu1  ;;  %v3494_v1 = vpop.f32.mrf.mxu0 }
 0x52f   :  { %v3153_v39 = vmax.f32 %v3000_v6, 0.0  ;;  %3799 = vst [vmem:[#allocation5 + $0x40] sm:$0xff] %v3493_v63  ;;  %v3495_v60 = vadd.f32 %v3494_v1, %v6572_v14  ;;  %v3224_v38 = vpack.c.bf16 %v3152_v4, %v3150_v49  ;;  %v3004_v30 = vadd.f32 %v3003_v56, %v6417_v15 }
 0x530   :  { %v3005_v16 = vpop.f32.mrf.mxu1  ;;  %v3496_v52 = vpop.f32.mrf.mxu0 }
 0x531   :  { %v3225_v51 = vpack.c.bf16 %v3153_v39, %v3151_v42  ;;  %3800 = vst [vmem:[#allocation5 + $0x48] sm:$0xff] %v3495_v60  ;;  %v3497_v34 = vadd.f32 %v3496_v52, %v6567_v7  ;;  %v3006_v9 = vadd.f32 %v3005_v16, %v6414_v23  ;;  %v3154_v58 = vmax.f32 %v3004_v30, 0.0 }
 0x532   :  { %v3007_v5 = vpop.f32.mrf.mxu1  ;;  %v3498_v45 = vpop.f32.mrf.mxu0 }
 0x533   :  { %3801 = vst [vmem:[#allocation5 + $0x50] sm:$0xff] %v3497_v34  ;;  %v3008_v46 = vadd.f32 %v3007_v5, %v6417_v15  ;;  %v3499_v44 = vadd.f32 %v3498_v45, %v6572_v14  ;;  %3740 = vmatprep.mubr.bf16.mxu0 %v3225_v51  ;;  %v3155_v20 = vmax.f32 %v3006_v9, 0.0 }
 0x534   :  { %v3009_v47 = vpop.f32.mrf.mxu1  ;;  %v3502_v32 = vpop.f32.mrf.mxu0  ;;  %3741 = vmatmul.mubr.bf16.gmra.mxu0 %v3224_v38 }
 0x535   :  { %3802 = vst [vmem:[#allocation5 + $0x58] sm:$0xff] %v3499_v44  ;;  %v3010_v22 = vadd.f32 %v3009_v47, %v6414_v23  ;;  %v3503_v50 = vadd.f32 %v3502_v32, %v6567_v7  ;;  %v3156_v18 = vmax.f32 %v3008_v46, 0.0 }
 0x536   :  { %v3013_v62 = vpop.f32.mrf.mxu1  ;;  %v3504_v55 = vpop.f32.mrf.mxu0 }
 0x537   :  { %v3157_v57 = vmax.f32 %v3010_v22, 0.0  ;;  %3803 = vst [vmem:[#allocation5 + $0x60] sm:$0xff] %v3503_v50  ;;  %v3505_v36 = vadd.f32 %v3504_v55, %v6572_v14  ;;  %v3226_v40 = vpack.c.bf16 %v3156_v18, %v3154_v58  ;;  %v3014_v8 = vadd.f32 %v3013_v62, %v6417_v15 }
 0x538   :  { %v3015_v2 = vpop.f32.mrf.mxu1  ;;  %v3506_v48 = vpop.f32.mrf.mxu0 }
 0x539   :  { %v3227_v27 = vpack.c.bf16 %v3157_v57, %v3155_v20  ;;  %3804 = vst [vmem:[#allocation5 + $0x68] sm:$0xff] %v3505_v36  ;;  %v3507_v26 = vadd.f32 %v3506_v48, %v6567_v7  ;;  %v3016_v19 = vadd.f32 %v3015_v2, %v6414_v23  ;;  %v3158_v25 = vmax.f32 %v3014_v8, 0.0 }
 0x53a   :  { %v3017_v11 = vpop.f32.mrf.mxu1  ;;  %v3508_v28 = vpop.f32.mrf.mxu0 }
 0x53b   :  { %3805 = vst [vmem:[#allocation5 + $0x70] sm:$0xff] %v3507_v26  ;;  %v3018_v37 = vadd.f32 %v3017_v11, %v6417_v15  ;;  %v3509_v0 = vadd.f32 %v3508_v28, %v6572_v14  ;;  %3750 = vmatprep.mubr.bf16.mxu0 %v3227_v27  ;;  %v3159_v43 = vmax.f32 %v3016_v19, 0.0 }
 0x53c   :  { %v3019_v24 = vpop.f32.mrf.mxu1  ;;  %v3512_v10 = vpop.f32.mrf.mxu0  ;;  %3751 = vmatmul.mubr.bf16.gmra.mxu0 %v3226_v40 }
 0x53d   :  { %3806 = vst [vmem:[#allocation5 + $0x78] sm:$0xff] %v3509_v0  ;;  %v3020_v12 = vadd.f32 %v3019_v24, %v6414_v23  ;;  %v3513_v41 = vadd.f32 %v3512_v10, %v6567_v7  ;;  %v3160_v17 = vmax.f32 %v3018_v37, 0.0 }
 0x53e   :  { %v3023_v54 = vpop.f32.mrf.mxu1  ;;  %v3514_v61 = vpop.f32.mrf.mxu0 }
 0x53f   :  { %v3161_v21 = vmax.f32 %v3020_v12, 0.0  ;;  %3807 = vst [vmem:[#allocation5 + $0x80] sm:$0xff] %v3513_v41  ;;  %v3515_v3 = vadd.f32 %v3514_v61, %v6572_v14  ;;  %v3228_v13 = vpack.c.bf16 %v3160_v17, %v3158_v25  ;;  %v3024_v56 = vadd.f32 %v3023_v54, %v6417_v15 }
 0x540   :  { %v3025_v59 = vpop.f32.mrf.mxu1  ;;  %v3516_v53 = vpop.f32.mrf.mxu0 }
 0x541   :  { %v3229_v31 = vpack.c.bf16 %v3161_v21, %v3159_v43  ;;  %3808 = vst [vmem:[#allocation5 + $0x88] sm:$0xff] %v3515_v3  ;;  %v3517_v35 = vadd.f32 %v3516_v53, %v6567_v7  ;;  %v3026_v6 = vadd.f32 %v3025_v59, %v6414_v23  ;;  %v3162_v5 = vmax.f32 %v3024_v56, 0.0 }
 0x542   :  { %v3027_v29 = vpop.f32.mrf.mxu1  ;;  %v3518_v33 = vpop.f32.mrf.mxu0 }
 0x543   :  { %3809 = vst [vmem:[#allocation5 + $0x90] sm:$0xff] %v3517_v35  ;;  %v3028_v63 = vadd.f32 %v3027_v29, %v6417_v15  ;;  %v3519_v4 = vadd.f32 %v3518_v33, %v6572_v14  ;;  %3760 = vmatprep.mubr.bf16.mxu0 %v3229_v31  ;;  %v3163_v51 = vmax.f32 %v3026_v6, 0.0 }
 0x544   :  { %v3029_v1 = vpop.f32.mrf.mxu1  ;;  %v3522_v42 = vpop.f32.mrf.mxu0  ;;  %3761 = vmatmul.mubr.bf16.gmra.mxu0 %v3228_v13 }
 0x545   :  { %3810 = vst [vmem:[#allocation5 + $0x98] sm:$0xff] %v3519_v4  ;;  %v3030_v39 = vadd.f32 %v3029_v1, %v6414_v23  ;;  %v3523_v60 = vadd.f32 %v3522_v42, %v6567_v7  ;;  %v3164_v49 = vmax.f32 %v3028_v63, 0.0 }
 0x546   :  { %v3033_v16 = vpop.f32.mrf.mxu1  ;;  %v3524_v52 = vpop.f32.mrf.mxu0 }
 0x547   :  { %v3165_v34 = vmax.f32 %v3030_v39, 0.0  ;;  %3811 = vst [vmem:[#allocation5 + $0xa0] sm:$0xff] %v3523_v60  ;;  %v3525_v38 = vadd.f32 %v3524_v52, %v6572_v14  ;;  %v3230_v30 = vpack.c.bf16 %v3164_v49, %v3162_v5  ;;  %v3034_v62 = vadd.f32 %v3033_v16, %v6417_v15 }
 0x548   :  { %v3035_v45 = vpop.f32.mrf.mxu1  ;;  %v3526_v9 = vpop.f32.mrf.mxu0 }
 0x549   :  { %v3231_v46 = vpack.c.bf16 %v3165_v34, %v3163_v51  ;;  %3812 = vst [vmem:[#allocation5 + $0xa8] sm:$0xff] %v3525_v38  ;;  %v3527_v44 = vadd.f32 %v3526_v9, %v6567_v7  ;;  %v3036_v22 = vadd.f32 %v3035_v45, %v6414_v23  ;;  %v3166_v40 = vmax.f32 %v3034_v62, 0.0 }
 0x54a   :  { %v3037_v47 = vpop.f32.mrf.mxu1  ;;  %v3528_v32 = vpop.f32.mrf.mxu0 }
 0x54b   :  { %3813 = vst [vmem:[#allocation5 + $0xb0] sm:$0xff] %v3527_v44  ;;  %v3038_v50 = vadd.f32 %v3037_v47, %v6417_v15  ;;  %v3529_v18 = vadd.f32 %v3528_v32, %v6572_v14  ;;  %3770 = vmatprep.mubr.bf16.mxu0 %v3231_v46  ;;  %v3167_v48 = vmax.f32 %v3036_v22, 0.0 }
 0x54c   :  { %v3039_v55 = vpop.f32.mrf.mxu1  ;;  %v3532_v20 = vpop.f32.mrf.mxu0  ;;  %3771 = vmatmul.mubr.bf16.gmra.mxu0 %v3230_v30 }
 0x54d   :  { %3814 = vst [vmem:[#allocation5 + $0xb8] sm:$0xff] %v3529_v18  ;;  %v3040_v57 = vadd.f32 %v3039_v55, %v6414_v23  ;;  %v3533_v36 = vadd.f32 %v3532_v20, %v6567_v7  ;;  %v3168_v58 = vmax.f32 %v3038_v50, 0.0 }
 0x54e   :  { %v3534_v2 = vpop.f32.mrf.mxu0 }
 0x54f   :  { %v3169_v27 = vmax.f32 %v3040_v57, 0.0  ;;  %3815 = vst [vmem:[#allocation5 + $0xc0] sm:$0xff] %v3533_v36  ;;  %v3535_v26 = vadd.f32 %v3534_v2, %v6572_v14  ;;  %v3232_v19 = vpack.c.bf16 %v3168_v58, %v3166_v40 }
 0x550   :  { %v3536_v11 = vpop.f32.mrf.mxu0 }
 0x551   :  { %v3233_v28 = vpack.c.bf16 %v3169_v27, %v3167_v48  ;;  %3816 = vst [vmem:[#allocation5 + $0xc8] sm:$0xff] %v3535_v26  ;;  %v3537_v15 = vadd.f32 %v3536_v11, %v6567_v7 }
 0x552   :  { %v3538_v37 = vpop.f32.mrf.mxu0 }
 0x553   :  { %3817 = vst [vmem:[#allocation5 + $0xd0] sm:$0xff] %v3537_v15  ;;  %v3539_v23 = vadd.f32 %v3538_v37, %v6572_v14  ;;  %3780 = vmatprep.mubr.bf16.mxu0 %v3233_v28 }
 0x554   :  { %v3542_v0 = vpop.f32.mrf.mxu0  ;;  %3781 = vmatmul.mubr.bf16.gmra.mxu0 %v3232_v19 }
 0x555   :  { %3818 = vst [vmem:[#allocation5 + $0xd8] sm:$0xff] %v3539_v23  ;;  %v3543_v8 = vadd.f32 %v3542_v0, %v6567_v7 }
 0x556   :  { %v3544_v24 = vpop.f32.mrf.mxu0 }
 0x557   :  { %3819 = vst [vmem:[#allocation5 + $0xe0] sm:$0xff] %v3543_v8  ;;  %v3545_v10 = vadd.f32 %v3544_v24, %v6572_v14 }
 0x558   :  { %v3546_v12 = vpop.f32.mrf.mxu0 }
 0x559   :  { %3820 = vst [vmem:[#allocation5 + $0xe8] sm:$0xff] %v3545_v10  ;;  %v3547_v41 = vadd.f32 %v3546_v12, %v6567_v7 }
 0x55a   :  { %v3548_v17 = vpop.f32.mrf.mxu0 }
 0x55b   :  { %3821 = vst [vmem:[#allocation5 + $0xf0] sm:$0xff] %v3547_v41  ;;  %v3549_v54 = vadd.f32 %v3548_v17, %v6572_v14 }
 0x55c   :  { %v3552_v61 = vpop.f32.mrf.mxu0 }
 0x55d   :  { %3822 = vst [vmem:[#allocation5 + $0xf8] sm:$0xff] %v3549_v54  ;;  %v3553_v43 = vadd.f32 %v3552_v61, %v6567_v7 }
 0x55e   :  { %v3554_v21 = vpop.f32.mrf.mxu0 }
 0x55f   :  { %3823 = vst [vmem:[#allocation5 + $0x100] sm:$0xff] %v3553_v43  ;;  %v3555_v3 = vadd.f32 %v3554_v21, %v6572_v14 }
 0x560   :  { %v3556_v25 = vpop.f32.mrf.mxu0 }
 0x561   :  { %3824 = vst [vmem:[#allocation5 + $0x108] sm:$0xff] %v3555_v3  ;;  %v3557_v59 = vadd.f32 %v3556_v25, %v6567_v7 }
 0x562   :  { %v3558_v53 = vpop.f32.mrf.mxu0 }
 0x563   :  { %3825 = vst [vmem:[#allocation5 + $0x110] sm:$0xff] %v3557_v59  ;;  %v3559_v31 = vadd.f32 %v3558_v53, %v6572_v14 }
 0x564   :  { %v3562_v35 = vpop.f32.mrf.mxu0 }
 0x565   :  { %3826 = vst [vmem:[#allocation5 + $0x118] sm:$0xff] %v3559_v31  ;;  %v3563_v13 = vadd.f32 %v3562_v35, %v6567_v7 }
 0x566   :  { %v3564_v29 = vpop.f32.mrf.mxu0 }
 0x567   :  { %3827 = vst [vmem:[#allocation5 + $0x120] sm:$0xff] %v3563_v13  ;;  %v3565_v33 = vadd.f32 %v3564_v29, %v6572_v14 }
 0x568   :  { %v3566_v6 = vpop.f32.mrf.mxu0 }
 0x569   :  { %3828 = vst [vmem:[#allocation5 + $0x128] sm:$0xff] %v3565_v33  ;;  %v3567_v63 = vadd.f32 %v3566_v6, %v6567_v7 }
 0x56a   :  { %v3568_v4 = vpop.f32.mrf.mxu0 }
 0x56b   :  { %3829 = vst [vmem:[#allocation5 + $0x130] sm:$0xff] %v3567_v63  ;;  %v3569_v56 = vadd.f32 %v3568_v4, %v6572_v14 }
 0x56c   :  { %v3572_v1 = vpop.f32.mrf.mxu0 }
 0x56d   :  { %3830 = vst [vmem:[#allocation5 + $0x138] sm:$0xff] %v3569_v56  ;;  %v3573_v42 = vadd.f32 %v3572_v1, %v6567_v7 }
 0x56e   :  { %v3574_v39 = vpop.f32.mrf.mxu0 }
 0x56f   :  { %3831 = vst [vmem:[#allocation5 + $0x140] sm:$0xff] %v3573_v42  ;;  %v3575_v60 = vadd.f32 %v3574_v39, %v6572_v14 }
 0x570   :  { %v3576_v49 = vpop.f32.mrf.mxu0 }
 0x571   :  { %3832 = vst [vmem:[#allocation5 + $0x148] sm:$0xff] %v3575_v60  ;;  %v3577_v16 = vadd.f32 %v3576_v49, %v6567_v7 }
 0x572   :  { %v3578_v52 = vpop.f32.mrf.mxu0 }
 0x573   :  { %3833 = vst [vmem:[#allocation5 + $0x150] sm:$0xff] %v3577_v16  ;;  %v3579_v51 = vadd.f32 %v3578_v52, %v6572_v14 }
 0x574   :  { %v3582_v34 = vpop.f32.mrf.mxu0 }
 0x575   :  { %3834 = vst [vmem:[#allocation5 + $0x158] sm:$0xff] %v3579_v51  ;;  %v3583_v38 = vadd.f32 %v3582_v34, %v6567_v7 }
 0x576   :  { %v3584_v5 = vpop.f32.mrf.mxu0 }
 0x577   :  { %3835 = vst [vmem:[#allocation5 + $0x160] sm:$0xff] %v3583_v38  ;;  %v3585_v45 = vadd.f32 %v3584_v5, %v6572_v14 }
 0x578   :  { %v3586_v9 = vpop.f32.mrf.mxu0 }
 0x579   :  { %3836 = vst [vmem:[#allocation5 + $0x168] sm:$0xff] %v3585_v45  ;;  %v3587_v46 = vadd.f32 %v3586_v9, %v6567_v7 }
 0x57a   :  { %v3588_v44 = vpop.f32.mrf.mxu0 }
 0x57b   :  { %3837 = vst [vmem:[#allocation5 + $0x170] sm:$0xff] %v3587_v46  ;;  %v3589_v30 = vadd.f32 %v3588_v44, %v6572_v14 }
 0x57c   :  { %v3592_v47 = vpop.f32.mrf.mxu0 }
 0x57d   :  { %3838 = vst [vmem:[#allocation5 + $0x178] sm:$0xff] %v3589_v30  ;;  %v3593_v32 = vadd.f32 %v3592_v47, %v6567_v7 }
 0x57e   :  { %v3594_v22 = vpop.f32.mrf.mxu0 }
 0x57f   :  { %3839 = vst [vmem:[#allocation5 + $0x180] sm:$0xff] %v3593_v32  ;;  %v3595_v50 = vadd.f32 %v3594_v22, %v6572_v14 }
 0x580   :  { %v3596_v18 = vpop.f32.mrf.mxu0 }
 0x581   :  { %3840 = vst [vmem:[#allocation5 + $0x188] sm:$0xff] %v3595_v50  ;;  %v3597_v62 = vadd.f32 %v3596_v18, %v6567_v7 }
 0x582   :  { %v3598_v55 = vpop.f32.mrf.mxu0 }
 0x583   :  { %3841 = vst [vmem:[#allocation5 + $0x190] sm:$0xff] %v3597_v62  ;;  %v3599_v20 = vadd.f32 %v3598_v55, %v6572_v14 }
 0x584   :  { %v3602_v57 = vpop.f32.mrf.mxu0 }
 0x585   :  { %3842 = vst [vmem:[#allocation5 + $0x198] sm:$0xff] %v3599_v20  ;;  %v3603_v36 = vadd.f32 %v3602_v57, %v6567_v7 }
 0x586   :  { %v3604_v58 = vpop.f32.mrf.mxu0 }
 0x587   :  { %3843 = vst [vmem:[#allocation5 + $0x1a0] sm:$0xff] %v3603_v36  ;;  %v3605_v2 = vadd.f32 %v3604_v58, %v6572_v14 }
 0x588   :  { %v3606_v48 = vpop.f32.mrf.mxu0 }
 0x589   :  { %3844 = vst [vmem:[#allocation5 + $0x1a8] sm:$0xff] %v3605_v2  ;;  %v3607_v27 = vadd.f32 %v3606_v48, %v6567_v7 }
 0x58a   :  { %v3608_v26 = vpop.f32.mrf.mxu0 }
 0x58b   :  { %3845 = vst [vmem:[#allocation5 + $0x1b0] sm:$0xff] %v3607_v27  ;;  %v3609_v40 = vadd.f32 %v3608_v26, %v6572_v14 }
 0x58c   :  { %v3612_v11 = vpop.f32.mrf.mxu0 }
 0x58d   :  { %3846 = vst [vmem:[#allocation5 + $0x1b8] sm:$0xff] %v3609_v40  ;;  %v3613_v28 = vadd.f32 %v3612_v11, %v6567_v7 }
 0x58e   :  { %v3614_v15 = vpop.f32.mrf.mxu0 }
 0x58f   :  { %3847 = vst [vmem:[#allocation5 + $0x1c0] sm:$0xff] %v3613_v28  ;;  %v3615_v19 = vadd.f32 %v3614_v15, %v6572_v14 }
 0x590   :  { %v3616_v37 = vpop.f32.mrf.mxu0 }
 0x591   :  { %3848 = vst [vmem:[#allocation5 + $0x1c8] sm:$0xff] %v3615_v19  ;;  %v3617_v23 = vadd.f32 %v3616_v37, %v6567_v7 }
 0x592   :  { %v3618_v0 = vpop.f32.mrf.mxu0 }
 0x593   :  { %3849 = vst [vmem:[#allocation5 + $0x1d0] sm:$0xff] %v3617_v23  ;;  %v3619_v8 = vadd.f32 %v3618_v0, %v6572_v14 }
 0x594   :  { %v3622_v24 = vpop.f32.mrf.mxu0 }
 0x595   :  { %3850 = vst [vmem:[#allocation5 + $0x1d8] sm:$0xff] %v3619_v8  ;;  %v3623_v10 = vadd.f32 %v3622_v24, %v6567_v7 }
 0x596   :  { %v3624_v12 = vpop.f32.mrf.mxu0 }
 0x597   :  { %3851 = vst [vmem:[#allocation5 + $0x1e0] sm:$0xff] %v3623_v10  ;;  %v3625_v41 = vadd.f32 %v3624_v12, %v6572_v14 }
 0x598   :  { %v3626_v17 = vpop.f32.mrf.mxu0 }
 0x599   :  { %3852 = vst [vmem:[#allocation5 + $0x1e8] sm:$0xff] %v3625_v41  ;;  %v3627_v54 = vadd.f32 %v3626_v17, %v6567_v7 }
 0x59a   :  { %v3628_v61 = vpop.f32.mrf.mxu0 }
 0x59b   :  { %3853 = vst [vmem:[#allocation5 + $0x1f0] sm:$0xff] %v3627_v54  ;;  %v3629_v43 = vadd.f32 %v3628_v61, %v6572_v14 }
 0x59c   :  { %v3632_v21 = vpop.f32.mrf.mxu0 }
 0x59d   :  { %3854 = vst [vmem:[#allocation5 + $0x1f8] sm:$0xff] %v3629_v43  ;;  %v3633_v3 = vadd.f32 %v3632_v21, %v6567_v7 }
 0x59e   :  { %v3634_v25 = vpop.f32.mrf.mxu0 }
 0x59f   :  { %3855 = vst [vmem:[#allocation5 + $0x200] sm:$0xff] %v3633_v3  ;;  %v3635_v59 = vadd.f32 %v3634_v25, %v6572_v14 }
 0x5a0   :  { %v3636_v53 = vpop.f32.mrf.mxu0 }
 0x5a1   :  { %3856 = vst [vmem:[#allocation5 + $0x208] sm:$0xff] %v3635_v59  ;;  %v3637_v31 = vadd.f32 %v3636_v53, %v6567_v7 }
 0x5a2   :  { %v3638_v35 = vpop.f32.mrf.mxu0 }
 0x5a3   :  { %3857 = vst [vmem:[#allocation5 + $0x210] sm:$0xff] %v3637_v31  ;;  %v3639_v13 = vadd.f32 %v3638_v35, %v6572_v14 }
 0x5a4   :  { %v3642_v29 = vpop.f32.mrf.mxu0 }
 0x5a5   :  { %3858 = vst [vmem:[#allocation5 + $0x218] sm:$0xff] %v3639_v13  ;;  %v3643_v33 = vadd.f32 %v3642_v29, %v6567_v7 }
 0x5a6   :  { %v3644_v6 = vpop.f32.mrf.mxu0 }
 0x5a7   :  { %3859 = vst [vmem:[#allocation5 + $0x220] sm:$0xff] %v3643_v33  ;;  %v3645_v63 = vadd.f32 %v3644_v6, %v6572_v14 }
 0x5a8   :  { %v3646_v4 = vpop.f32.mrf.mxu0 }
 0x5a9   :  { %3860 = vst [vmem:[#allocation5 + $0x228] sm:$0xff] %v3645_v63  ;;  %v3647_v56 = vadd.f32 %v3646_v4, %v6567_v7 }
 0x5aa   :  { %v3648_v1 = vpop.f32.mrf.mxu0 }
 0x5ab   :  { %3861 = vst [vmem:[#allocation5 + $0x230] sm:$0xff] %v3647_v56  ;;  %v3649_v42 = vadd.f32 %v3648_v1, %v6572_v14 }
 0x5ac   :  { %v3652_v39 = vpop.f32.mrf.mxu0 }
 0x5ad   :  { %3862 = vst [vmem:[#allocation5 + $0x238] sm:$0xff] %v3649_v42  ;;  %v3653_v60 = vadd.f32 %v3652_v39, %v6567_v7 }
 0x5ae   :  { %v3654_v49 = vpop.f32.mrf.mxu0 }
 0x5af   :  { %3863 = vst [vmem:[#allocation5 + $0x240] sm:$0xff] %v3653_v60  ;;  %v3655_v16 = vadd.f32 %v3654_v49, %v6572_v14 }
 0x5b0   :  { %v3656_v52 = vpop.f32.mrf.mxu0 }
 0x5b1   :  { %3864 = vst [vmem:[#allocation5 + $0x248] sm:$0xff] %v3655_v16  ;;  %v3657_v51 = vadd.f32 %v3656_v52, %v6567_v7 }
 0x5b2   :  { %v3658_v34 = vpop.f32.mrf.mxu0 }
 0x5b3   :  { %3865 = vst [vmem:[#allocation5 + $0x250] sm:$0xff] %v3657_v51  ;;  %v3659_v38 = vadd.f32 %v3658_v34, %v6572_v14 }
 0x5b4   :  { %v3662_v5 = vpop.f32.mrf.mxu0 }
 0x5b5   :  { %3866 = vst [vmem:[#allocation5 + $0x258] sm:$0xff] %v3659_v38  ;;  %v3663_v45 = vadd.f32 %v3662_v5, %v6567_v7 }
 0x5b6   :  { %v3664_v9 = vpop.f32.mrf.mxu0 }
 0x5b7   :  { %3867 = vst [vmem:[#allocation5 + $0x260] sm:$0xff] %v3663_v45  ;;  %v3665_v46 = vadd.f32 %v3664_v9, %v6572_v14 }
 0x5b8   :  { %v3666_v44 = vpop.f32.mrf.mxu0 }
 0x5b9   :  { %3868 = vst [vmem:[#allocation5 + $0x268] sm:$0xff] %v3665_v46  ;;  %v3667_v30 = vadd.f32 %v3666_v44, %v6567_v7 }
 0x5ba   :  { %v3668_v47 = vpop.f32.mrf.mxu0 }
 0x5bb   :  { %3869 = vst [vmem:[#allocation5 + $0x270] sm:$0xff] %v3667_v30  ;;  %v3669_v32 = vadd.f32 %v3668_v47, %v6572_v14 }
 0x5bc   :  { %v3672_v22 = vpop.f32.mrf.mxu0 }
 0x5bd   :  { %3870 = vst [vmem:[#allocation5 + $0x278] sm:$0xff] %v3669_v32  ;;  %v3673_v50 = vadd.f32 %v3672_v22, %v6567_v7 }
 0x5be   :  { %v3674_v18 = vpop.f32.mrf.mxu0 }
 0x5bf   :  { %3871 = vst [vmem:[#allocation5 + $0x280] sm:$0xff] %v3673_v50  ;;  %v3675_v62 = vadd.f32 %v3674_v18, %v6572_v14 }
 0x5c0   :  { %v3676_v55 = vpop.f32.mrf.mxu0 }
 0x5c1   :  { %3872 = vst [vmem:[#allocation5 + $0x288] sm:$0xff] %v3675_v62  ;;  %v3677_v20 = vadd.f32 %v3676_v55, %v6567_v7 }
 0x5c2   :  { %v3678_v57 = vpop.f32.mrf.mxu0 }
 0x5c3   :  { %3873 = vst [vmem:[#allocation5 + $0x290] sm:$0xff] %v3677_v20  ;;  %v3679_v36 = vadd.f32 %v3678_v57, %v6572_v14 }
 0x5c4   :  { %v3682_v58 = vpop.f32.mrf.mxu0 }
 0x5c5   :  { %3874 = vst [vmem:[#allocation5 + $0x298] sm:$0xff] %v3679_v36  ;;  %v3683_v2 = vadd.f32 %v3682_v58, %v6567_v7 }
 0x5c6   :  { %v3684_v48 = vpop.f32.mrf.mxu0 }
 0x5c7   :  { %3875 = vst [vmem:[#allocation5 + $0x2a0] sm:$0xff] %v3683_v2  ;;  %v3685_v27 = vadd.f32 %v3684_v48, %v6572_v14 }
 0x5c8   :  { %v3686_v26 = vpop.f32.mrf.mxu0 }
 0x5c9   :  { %3876 = vst [vmem:[#allocation5 + $0x2a8] sm:$0xff] %v3685_v27  ;;  %v3687_v40 = vadd.f32 %v3686_v26, %v6567_v7 }
 0x5ca   :  { %v3688_v11 = vpop.f32.mrf.mxu0 }
 0x5cb   :  { %3877 = vst [vmem:[#allocation5 + $0x2b0] sm:$0xff] %v3687_v40  ;;  %v3689_v28 = vadd.f32 %v3688_v11, %v6572_v14 }
 0x5cc   :  { %v3692_v15 = vpop.f32.mrf.mxu0 }
 0x5cd   :  { %3878 = vst [vmem:[#allocation5 + $0x2b8] sm:$0xff] %v3689_v28  ;;  %v3693_v19 = vadd.f32 %v3692_v15, %v6567_v7 }
 0x5ce   :  { %v3694_v37 = vpop.f32.mrf.mxu0 }
 0x5cf   :  { %3879 = vst [vmem:[#allocation5 + $0x2c0] sm:$0xff] %v3693_v19  ;;  %v3695_v23 = vadd.f32 %v3694_v37, %v6572_v14 }
 0x5d0   :  { %v3696_v0 = vpop.f32.mrf.mxu0 }
 0x5d1   :  { %3880 = vst [vmem:[#allocation5 + $0x2c8] sm:$0xff] %v3695_v23  ;;  %v3697_v8 = vadd.f32 %v3696_v0, %v6567_v7 }
 0x5d2   :  { %v3698_v24 = vpop.f32.mrf.mxu0 }
 0x5d3   :  { %3881 = vst [vmem:[#allocation5 + $0x2d0] sm:$0xff] %v3697_v8  ;;  %v3699_v10 = vadd.f32 %v3698_v24, %v6572_v14 }
 0x5d4   :  { %v3702_v12 = vpop.f32.mrf.mxu0 }
 0x5d5   :  { %3882 = vst [vmem:[#allocation5 + $0x2d8] sm:$0xff] %v3699_v10  ;;  %v3703_v41 = vadd.f32 %v3702_v12, %v6567_v7 }
 0x5d6   :  { %v3704_v17 = vpop.f32.mrf.mxu0 }
 0x5d7   :  { %3883 = vst [vmem:[#allocation5 + $0x2e0] sm:$0xff] %v3703_v41  ;;  %v3705_v54 = vadd.f32 %v3704_v17, %v6572_v14 }
 0x5d8   :  { %v3706_v61 = vpop.f32.mrf.mxu0 }
 0x5d9   :  { %3884 = vst [vmem:[#allocation5 + $0x2e8] sm:$0xff] %v3705_v54  ;;  %v3707_v43 = vadd.f32 %v3706_v61, %v6567_v7 }
 0x5da   :  { %v3708_v21 = vpop.f32.mrf.mxu0 }
 0x5db   :  { %3885 = vst [vmem:[#allocation5 + $0x2f0] sm:$0xff] %v3707_v43  ;;  %v3709_v3 = vadd.f32 %v3708_v21, %v6572_v14 }
 0x5dc   :  { %v3712_v25 = vpop.f32.mrf.mxu0 }
 0x5dd   :  { %3886 = vst [vmem:[#allocation5 + $0x2f8] sm:$0xff] %v3709_v3  ;;  %v3713_v59 = vadd.f32 %v3712_v25, %v6567_v7 }
 0x5de   :  { %v3714_v53 = vpop.f32.mrf.mxu0 }
 0x5df   :  { %3887 = vst [vmem:[#allocation5 + $0x300] sm:$0xff] %v3713_v59  ;;  %v3715_v31 = vadd.f32 %v3714_v53, %v6572_v14 }
 0x5e0   :  { %v3716_v35 = vpop.f32.mrf.mxu0 }
 0x5e1   :  { %3888 = vst [vmem:[#allocation5 + $0x308] sm:$0xff] %v3715_v31  ;;  %v3717_v13 = vadd.f32 %v3716_v35, %v6567_v7 }
 0x5e2   :  { %v3718_v29 = vpop.f32.mrf.mxu0 }
 0x5e3   :  { %3889 = vst [vmem:[#allocation5 + $0x310] sm:$0xff] %v3717_v13  ;;  %v3719_v33 = vadd.f32 %v3718_v29, %v6572_v14 }
 0x5e4   :  { %v3722_v6 = vpop.f32.mrf.mxu0 }
 0x5e5   :  { %3890 = vst [vmem:[#allocation5 + $0x318] sm:$0xff] %v3719_v33  ;;  %v3723_v63 = vadd.f32 %v3722_v6, %v6567_v7 }
 0x5e6   :  { %v3724_v4 = vpop.f32.mrf.mxu0 }
 0x5e7   :  { %3891 = vst [vmem:[#allocation5 + $0x320] sm:$0xff] %v3723_v63  ;;  %v3725_v56 = vadd.f32 %v3724_v4, %v6572_v14 }
 0x5e8   :  { %v3726_v1 = vpop.f32.mrf.mxu0 }
 0x5e9   :  { %3892 = vst [vmem:[#allocation5 + $0x328] sm:$0xff] %v3725_v56  ;;  %v3727_v42 = vadd.f32 %v3726_v1, %v6567_v7 }
 0x5ea   :  { %v3728_v39 = vpop.f32.mrf.mxu0 }
 0x5eb   :  { %3893 = vst [vmem:[#allocation5 + $0x330] sm:$0xff] %v3727_v42  ;;  %v3729_v60 = vadd.f32 %v3728_v39, %v6572_v14 }
 0x5ec   :  { %v3732_v49 = vpop.f32.mrf.mxu0 }
 0x5ed   :  { %3894 = vst [vmem:[#allocation5 + $0x338] sm:$0xff] %v3729_v60  ;;  %v3733_v16 = vadd.f32 %v3732_v49, %v6567_v7 }
 0x5ee   :  { %v3734_v52 = vpop.f32.mrf.mxu0 }
 0x5ef   :  { %3895 = vst [vmem:[#allocation5 + $0x340] sm:$0xff] %v3733_v16  ;;  %v3735_v51 = vadd.f32 %v3734_v52, %v6572_v14 }
 0x5f0   :  { %v3736_v34 = vpop.f32.mrf.mxu0 }
 0x5f1   :  { %3896 = vst [vmem:[#allocation5 + $0x348] sm:$0xff] %v3735_v51  ;;  %v3737_v38 = vadd.f32 %v3736_v34, %v6567_v7 }
 0x5f2   :  { %v3738_v5 = vpop.f32.mrf.mxu0 }
 0x5f3   :  { %3897 = vst [vmem:[#allocation5 + $0x350] sm:$0xff] %v3737_v38  ;;  %v3739_v45 = vadd.f32 %v3738_v5, %v6572_v14 }
 0x5f4   :  { %v3742_v9 = vpop.f32.mrf.mxu0 }
 0x5f5   :  { %3898 = vst [vmem:[#allocation5 + $0x358] sm:$0xff] %v3739_v45  ;;  %v3743_v46 = vadd.f32 %v3742_v9, %v6567_v7 }
 0x5f6   :  { %v3744_v44 = vpop.f32.mrf.mxu0 }
 0x5f7   :  { %3899 = vst [vmem:[#allocation5 + $0x360] sm:$0xff] %v3743_v46  ;;  %v3745_v30 = vadd.f32 %v3744_v44, %v6572_v14 }
 0x5f8   :  { %v3746_v47 = vpop.f32.mrf.mxu0 }
 0x5f9   :  { %3900 = vst [vmem:[#allocation5 + $0x368] sm:$0xff] %v3745_v30  ;;  %v3747_v32 = vadd.f32 %v3746_v47, %v6567_v7 }
 0x5fa   :  { %v3748_v22 = vpop.f32.mrf.mxu0 }
 0x5fb   :  { %3901 = vst [vmem:[#allocation5 + $0x370] sm:$0xff] %v3747_v32  ;;  %v3749_v50 = vadd.f32 %v3748_v22, %v6572_v14 }
 0x5fc   :  { %v3752_v18 = vpop.f32.mrf.mxu0 }
 0x5fd   :  { %3902 = vst [vmem:[#allocation5 + $0x378] sm:$0xff] %v3749_v50  ;;  %v3753_v62 = vadd.f32 %v3752_v18, %v6567_v7 }
 0x5fe   :  { %v3754_v55 = vpop.f32.mrf.mxu0 }
 0x5ff   :  { %3903 = vst [vmem:[#allocation5 + $0x380] sm:$0xff] %v3753_v62  ;;  %v3755_v20 = vadd.f32 %v3754_v55, %v6572_v14 }
 0x600   :  { %v3756_v57 = vpop.f32.mrf.mxu0 }
 0x601   :  { %3904 = vst [vmem:[#allocation5 + $0x388] sm:$0xff] %v3755_v20  ;;  %v3757_v36 = vadd.f32 %v3756_v57, %v6567_v7 }
 0x602   :  { %v3758_v58 = vpop.f32.mrf.mxu0 }
 0x603   :  { %3905 = vst [vmem:[#allocation5 + $0x390] sm:$0xff] %v3757_v36  ;;  %v3759_v2 = vadd.f32 %v3758_v58, %v6572_v14 }
 0x604   :  { %v3762_v48 = vpop.f32.mrf.mxu0 }
 0x605   :  { %3906 = vst [vmem:[#allocation5 + $0x398] sm:$0xff] %v3759_v2  ;;  %v3763_v27 = vadd.f32 %v3762_v48, %v6567_v7 }
 0x606   :  { %v3764_v26 = vpop.f32.mrf.mxu0 }
 0x607   :  { %3907 = vst [vmem:[#allocation5 + $0x3a0] sm:$0xff] %v3763_v27  ;;  %v3765_v40 = vadd.f32 %v3764_v26, %v6572_v14 }
 0x608   :  { %v3766_v11 = vpop.f32.mrf.mxu0 }
 0x609   :  { %3908 = vst [vmem:[#allocation5 + $0x3a8] sm:$0xff] %v3765_v40  ;;  %v3767_v28 = vadd.f32 %v3766_v11, %v6567_v7 }
 0x60a   :  { %v3768_v15 = vpop.f32.mrf.mxu0 }
 0x60b   :  { %3909 = vst [vmem:[#allocation5 + $0x3b0] sm:$0xff] %v3767_v28  ;;  %v3769_v19 = vadd.f32 %v3768_v15, %v6572_v14 }
 0x60c   :  { %v3772_v37 = vpop.f32.mrf.mxu0 }
 0x60d   :  { %3910 = vst [vmem:[#allocation5 + $0x3b8] sm:$0xff] %v3769_v19  ;;  %v3773_v23 = vadd.f32 %v3772_v37, %v6567_v7 }
 0x60e   :  { %v3774_v0 = vpop.f32.mrf.mxu0 }
 0x60f   :  { %3911 = vst [vmem:[#allocation5 + $0x3c0] sm:$0xff] %v3773_v23  ;;  %v3775_v8 = vadd.f32 %v3774_v0, %v6572_v14 }
 0x610   :  { %v3776_v24 = vpop.f32.mrf.mxu0 }
 0x611   :  { %3912 = vst [vmem:[#allocation5 + $0x3c8] sm:$0xff] %v3775_v8  ;;  %v3777_v10 = vadd.f32 %v3776_v24, %v6567_v7 }
 0x612   :  { %v3778_v12 = vpop.f32.mrf.mxu0 }
 0x613   :  { %3913 = vst [vmem:[#allocation5 + $0x3d0] sm:$0xff] %v3777_v10  ;;  %v3779_v41 = vadd.f32 %v3778_v12, %v6572_v14 }
 0x614   :  { %v3782_v17 = vpop.f32.mrf.mxu0 }
 0x615   :  { %3914 = vst [vmem:[#allocation5 + $0x3d8] sm:$0xff] %v3779_v41  ;;  %v3783_v54 = vadd.f32 %v3782_v17, %v6567_v7 }
 0x616   :  { %v3784_v61 = vpop.f32.mrf.mxu0 }
 0x617   :  { %3915 = vst [vmem:[#allocation5 + $0x3e0] sm:$0xff] %v3783_v54  ;;  %v3785_v43 = vadd.f32 %v3784_v61, %v6572_v14 }
 0x618   :  { %v3786_v21 = vpop.f32.mrf.mxu0 }
 0x619   :  { %3916 = vst [vmem:[#allocation5 + $0x3e8] sm:$0xff] %v3785_v43  ;;  %v3787_v3 = vadd.f32 %v3786_v21, %v6567_v7 }
 0x61a   :  { %v3788_v25 = vpop.f32.mrf.mxu0 }
 0x61b   :  { %3917 = vst [vmem:[#allocation5 + $0x3f0] sm:$0xff] %v3787_v3  ;;  %v3789_v59 = vadd.f32 %v3788_v25, %v6572_v14 }
 0x61d   :  { %3918 = vst [vmem:[#allocation5 + $0x3f8] sm:$0xff] %v3789_v59 }
 0x61e   :  { %4329 = shalt.err (!%p4326_p9)
}
 0x61f   :  { %s4350_s30 = smov 256   ;;  %s4351_s10 = smov 16  }
 0x620   :  { %3930 = dma.vmem_to_hbm [thread:$0]  %s3925_s28, 16384, %s6740_s9, [#allocation4], %s4350_s30, %s4350_s30, %s4351_s10  }
 0x621   :  { %4340 = dma.done.wait [#allocation4], 16384  }
 0x622   :  { %4341 = vsyncadd [#allocation4], 4294950912 }
 0x623   :  { %3934 = vsyncpa [#allocation3], 1 }
 0x624   :  { %3935 = vsyncpa [#allocation4], 1 }

</bundles_post_ra>
